<compile_context>
chip_gen: v5e
topology: v5e:2x2
jax: 0.10.0
libtpu: 0.0.40
codegen_flags: <defaults>
</compile_context>

<pallas_src>
import functools

import jax
import jax.numpy as jnp
from jax.experimental import pallas as pl
from jax.experimental.pallas import tpu as pltpu


def _round_up(x, m):
    return ((x + m - 1) // m) * m


def _pad_to(x, shape):
    return jnp.pad(x, [(0, t - s) for s, t in zip(x.shape, shape)])


# ----------------------------------------------------------------------------
# Pallas kernel: head-batched attention probabilities + cross attention + masked softmax
# ----------------------------------------------------------------------------
def vpg_kernel(qt_ref, kt_ref, qs_ref, ks_ref, valid_ref, visual_ref, tattn_ref,
               *, num_patches):
    f32, bf16 = jnp.float32, jnp.bfloat16
    Bb, H, Tp, Dh = qt_ref.shape
    Sp = qs_ref.shape[2]
    Pp = kt_ref.shape[3]
    neg = f32(-1e9)

    # Mask for patch columns that only exist because of lane-alignment padding (P -> Pp).
    patch_valid = jax.lax.broadcasted_iota(jnp.int32, (1, 1, Pp), 2) < num_patches

    def head_avg_probs(q_ref, k_ref):
        """q_ref: (Bb, H, L, Dh) bf16 (scaling pre-folded), k_ref: (Bb, H, Dh, Pp) bf16.
        Returns head-averaged softmax probabilities, (Bb, L, Pp) f32."""
        L = q_ref.shape[2]
        q = q_ref[...].reshape(Bb * H, L, Dh)      # leading-dim merge only (free)
        k = k_ref[...].reshape(Bb * H, Dh, Pp)     # K arrives pre-transposed per head
        # Single head-batched standard (M,K)@(K,N) matmul: no per-head lane slices,
        # no in-kernel XLU transposes.  bf16 operands, f32 accumulation.
        s = jax.lax.dot_general(q, k, (((2,), (1,)), ((0,), (0,))),
                                preferred_element_type=f32)          # (Bb*H, L, Pp)
        s = jnp.where(patch_valid, s, neg)                           # mask padded patches
        s = s - jnp.max(s, axis=-1, keepdims=True)
        e = jnp.exp(s)
        p = e * pl.reciprocal(jnp.sum(e, axis=-1, keepdims=True), approx=True)
        return jnp.sum(p.reshape(Bb, H, L, Pp), axis=1) * f32(1.0 / H)   # mean over heads

    t_attn = head_avg_probs(qt_ref, kt_ref)        # (Bb, Tp, Pp)  == target_patch_attn
    s_attn = head_avg_probs(qs_ref, ks_ref)        # (Bb, Sp, Pp)  == source_patch_attn

    # visual_attn_raw = target_patch_attn @ source_patch_attn^T (contract over patches).
    # Transpose s_attn once (single minor-2D vxpose) so the matmul is a standard contraction.
    s_attn_t = jnp.swapaxes(s_attn, 1, 2)          # (Bb, Pp, Sp)
    raw = jax.lax.dot_general(t_attn.astype(bf16), s_attn_t.astype(bf16),
                              (((2,), (1,)), ((0,), (0,))),
                              preferred_element_type=f32)            # (Bb, Tp, Sp)

    # TODO(synk): get_masked_softmax is not defined in the source snippet; assumed semantics are
    # "fill invalid (padding) positions with a large negative value, softmax over the source axis".
    valid = valid_ref[...]                          # (Bb, 1, Sp): 1.0 = valid, 0.0 = padding
    logits = jnp.where(valid > 0.5, raw, neg)
    logits = logits - jnp.max(logits, axis=-1, keepdims=True)
    e = jnp.exp(logits)
    visual = e * pl.reciprocal(jnp.sum(e, axis=-1, keepdims=True), approx=True)

    visual_ref[...] = visual.astype(visual_ref.dtype)   # lane-dense store (Sp multiple of 128)
    tattn_ref[...] = t_attn.astype(tattn_ref.dtype)     # lane-dense store (Pp multiple of 128)


# ----------------------------------------------------------------------------
# Wrapper: layout / padding glue, projections (hoisted per review), pallas_call
# ----------------------------------------------------------------------------
def vpg_forward(target_vec, source_vec, img_vec, encoder_padding_mask, params,
                *, num_heads, block_b=None):
    """target_vec: (T, B, E), source_vec: (S, B, E), img_vec: (B, P, E_enc),
    encoder_padding_mask: (B, S) bool, True = padding.
    Returns (visual_attn (B, T, S), target_patch_attn (B, T, P))."""
    T, B, E = target_vec.shape
    S = source_vec.shape[0]
    P, E_enc = img_vec.shape[1], img_vec.shape[2]
    H = num_heads
    Dh = E // H
    scaling = float(Dh) ** -0.5
    bf16, f32 = jnp.bfloat16, jnp.float32

    if block_b is None:
        # Several batch elements per grid step: amortizes per-step overhead and keeps the
        # grid axis "parallel" (sharded across v7x's two TensorCores once B grows).
        block_b = max(1, min(B, 8))
    T_pad = _round_up(T, 8)      # sublane-aligned second-minor dim of both outputs
    S_pad = _round_up(S, 128)    # lane-dense last dim of visual_attn
    P_pad = _round_up(P, 128)    # lane-dense last dim of target_patch_attn
    B_pad = _round_up(B, block_b)

    # Batch-first, padded activations (padding is zeros; masked in-kernel / sliced off below).
    tgt = _pad_to(jnp.transpose(target_vec, (1, 0, 2)), (B_pad, T_pad, E)).astype(bf16)
    src = _pad_to(jnp.transpose(source_vec, (1, 0, 2)), (B_pad, S_pad, E)).astype(bf16)
    img = _pad_to(img_vec, (B_pad, P_pad, E_enc)).astype(bf16)
    valid = _pad_to((~encoder_padding_mask).astype(f32)[:, None, :], (B_pad, 1, S_pad))

    # Q/K projections hoisted out of the per-batch grid: one full-height matmul each
    # (weights shared across batch). Scaling folded into Wq / bq. bf16 operands, f32 accum.
    def project_q(x, w, b):                                   # -> (B_pad, H, L, Dh) bf16
        y = jnp.einsum("ble,ef->blf", x, (w * scaling).astype(bf16),
                       preferred_element_type=f32) + (b * scaling)
        y = y.reshape(B_pad, -1, H, Dh)
        return jnp.transpose(y, (0, 2, 1, 3)).astype(bf16)

    def project_k(x, w, b):                                   # -> (B_pad, H, Dh, P_pad) bf16
        y = jnp.einsum("bpe,ef->bpf", x, w.astype(bf16),
                       preferred_element_type=f32) + b
        y = y.reshape(B_pad, P_pad, H, Dh)
        return jnp.transpose(y, (0, 2, 3, 1)).astype(bf16)    # K already transposed per head

    q_t = project_q(tgt, params["wq_t"], params["bq_t"])      # (B_pad, H, T_pad, Dh)
    q_s = project_q(src, params["wq_s"], params["bq_s"])      # (B_pad, H, S_pad, Dh)
    k_t = project_k(img, params["wk_t"], params["bk_t"])      # (B_pad, H, Dh, P_pad)
    k_s = project_k(img, params["wk_s"], params["bk_s"])      # (B_pad, H, Dh, P_pad)

    kernel = functools.partial(vpg_kernel, num_patches=P)
    b4 = lambda b: (b, 0, 0, 0)
    b3 = lambda b: (b, 0, 0)

    grid_spec = pltpu.PrefetchScalarGridSpec(
        num_scalar_prefetch=0,
        grid=(B_pad // block_b,),
        in_specs=[
            pl.BlockSpec((block_b, H, T_pad, Dh), b4),
            pl.BlockSpec((block_b, H, Dh, P_pad), b4),
            pl.BlockSpec((block_b, H, S_pad, Dh), b4),
            pl.BlockSpec((block_b, H, Dh, P_pad), b4),
            pl.BlockSpec((block_b, 1, S_pad), b3),
        ],
        out_specs=[
            pl.BlockSpec((block_b, T_pad, S_pad), b3),
            pl.BlockSpec((block_b, T_pad, P_pad), b3),
        ],
    )

    visual_full, tattn_full = pl.pallas_call(
        kernel,
        out_shape=(jax.ShapeDtypeStruct((B_pad, T_pad, S_pad), f32),
                   jax.ShapeDtypeStruct((B_pad, T_pad, P_pad), f32)),
        grid_spec=grid_spec,
        compiler_params=pltpu.CompilerParams(
            dimension_semantics=("parallel",),
            vmem_limit_bytes=32 * 1024 * 1024),   # explicit budget, safe on v5e / v6e / v7x
    )(q_t, k_t, q_s, k_s, valid)

    return visual_full[:B, :T, :S], tattn_full[:B, :T, :P]


# ----------------------------------------------------------------------------
# Pure-JAX reference (for correctness check only)
# ----------------------------------------------------------------------------
def vpg_reference(target_vec, source_vec, img_vec, encoder_padding_mask, params, *, num_heads):
    def attn_probs(x_lbe, img_bpe, wq, bq, wk, bk):
        x = jnp.transpose(x_lbe, (1, 0, 2))                         # (B, L, E)
        q = x @ wq + bq
        k = img_bpe @ wk + bk
        B, L, E = q.shape
        Dh = E // num_heads
        q = q.reshape(B, L, num_heads, Dh) * (Dh ** -0.5)
        k = k.reshape(B, -1, num_heads, Dh)
        s = jnp.einsum("blhd,bphd->bhlp", q, k)
        return jax.nn.softmax(s, axis=-1).mean(axis=1)              # (B, L, P)

    t_attn = attn_probs(target_vec, img_vec, params["wq_t"], params["bq_t"],
                        params["wk_t"], params["bk_t"])
    s_attn = attn_probs(source_vec, img_vec, params["wq_s"], params["bq_s"],
                        params["wk_s"], params["bk_s"])
    raw = jnp.einsum("btp,bsp->bts", t_attn, s_attn)
    logits = jnp.where(~encoder_padding_mask[:, None, :], raw, -1e9)
    return jax.nn.softmax(logits, axis=-1), t_attn


def init_params(key, embed_dim, encoder_embed_dim, num_heads):
    """Deterministic synthetic params. Weights are stored input-major (in, out), i.e.
    already transposed relative to torch.nn.Linear's (out, in) weight, so x @ W + b."""
    ks = jax.random.split(key, 8)
    s = 0.1
    return {
        "wq_t": s * jax.random.normal(ks[0], (embed_dim, embed_dim), jnp.float32),
        "bq_t": s * jax.random.normal(ks[1], (1, embed_dim), jnp.float32),
        "wk_t": s * jax.random.normal(ks[2], (encoder_embed_dim, embed_dim), jnp.float32),
        "bk_t": s * jax.random.normal(ks[3], (1, embed_dim), jnp.float32),
        "wq_s": s * jax.random.normal(ks[4], (embed_dim, embed_dim), jnp.float32),
        "bq_s": s * jax.random.normal(ks[5], (1, embed_dim), jnp.float32),
        "wk_s": s * jax.random.normal(ks[6], (encoder_embed_dim, embed_dim), jnp.float32),
        "bk_s": s * jax.random.normal(ks[7], (1, embed_dim), jnp.float32),
    }


if __name__ == "__main__":
    B, T, S, P = 2, 8, 8, 16          # batch, target len, source len, num image patches
    E = 32                            # embed_dim == encoder_embed_dim
    H = 4                             # decoder_attention_heads

    key = jax.random.PRNGKey(0)
    k_t, k_s, k_i, k_p = jax.random.split(key, 4)
    target_vec = jax.random.normal(k_t, (T, B, E), jnp.float32)       # fairseq (T, B, E)
    source_vec = jax.random.normal(k_s, (S, B, E), jnp.float32)       # fairseq (S, B, E)
    img_vec = jax.random.normal(k_i, (B, P, E), jnp.float32)          # (B, P, E)
    encoder_padding_mask = jnp.zeros((B, S), jnp.bool_).at[1, S - 3:].set(True)  # True = pad

    params = init_params(k_p, E, E, H)

    visual_attn, target_patch_attn = vpg_forward(
        target_vec, source_vec, img_vec, encoder_padding_mask, params, num_heads=H)
    jax.block_until_ready((visual_attn, target_patch_attn))

    vis_ref, tattn_ref = vpg_reference(
        target_vec, source_vec, img_vec, encoder_padding_mask, params, num_heads=H)
    assert visual_attn.shape == (B, T, S) and target_patch_attn.shape == (B, T, P)
    # Tolerance loosened vs the f32 reference: bf16 MXU operands + approx reciprocal
    # (observed error is a few 1e-3 on these probability outputs).
    assert jnp.allclose(visual_attn, vis_ref, atol=2e-2, rtol=2e-2)
    assert jnp.allclose(target_patch_attn, tattn_ref, atol=2e-2, rtol=2e-2)

    print("KERNEL_OK")
</pallas_src>

<mosaic_0001>
module attributes {stable_mosaic.version = 11 : i64} {
  func.func @vpg_kernel(%arg0: i32, %arg1: memref<2x4x8x8xbf16, #tpu.memory_space<vmem>>, %arg2: memref<2x4x8x128xbf16, #tpu.memory_space<vmem>>, %arg3: memref<2x4x128x8xbf16, #tpu.memory_space<vmem>>, %arg4: memref<2x4x8x128xbf16, #tpu.memory_space<vmem>>, %arg5: memref<2x1x128xf32, #tpu.memory_space<vmem>>, %arg6: memref<2x8x128xf32, #tpu.memory_space<vmem>>, %arg7: memref<2x8x128xf32, #tpu.memory_space<vmem>>) attributes {dimension_semantics = [#tpu.dimension_semantics<parallel>], iteration_bounds = array<i64: 1>, scalar_prefetch = 0 : i64, scratch_operands = 0 : i64, tpu.core_type = #tpu.core_type<tc>, window_params = [{transform_indices = @transform_0, window_bounds = array<i64: 2, 4, 8, 8>}, {transform_indices = @transform_1, window_bounds = array<i64: 2, 4, 8, 128>}, {transform_indices = @transform_2, window_bounds = array<i64: 2, 4, 128, 8>}, {transform_indices = @transform_3, window_bounds = array<i64: 2, 4, 8, 128>}, {transform_indices = @transform_4, window_bounds = array<i64: 2, 1, 128>}, {transform_indices = @transform_5, window_bounds = array<i64: 2, 8, 128>}, {transform_indices = @transform_6, window_bounds = array<i64: 2, 8, 128>}]} {
    %0 = tpu.iota {dimensions = array<i32: 2>} : vector<1x1x128xi32>
    %c16_i32 = arith.constant 16 : i32
    %1 = vector.broadcast %c16_i32 : i32 to vector<1x1x128xi32>
    %2 = arith.cmpi slt, %0, %1 : vector<1x1x128xi32>
    %c0 = arith.constant 0 : index
    %c0_0 = arith.constant 0 : index
    %c0_1 = arith.constant 0 : index
    %c0_2 = arith.constant 0 : index
    %3 = vector.load %arg1[%c0, %c0_0, %c0_1, %c0_2] : memref<2x4x8x8xbf16, #tpu.memory_space<vmem>>, vector<2x4x8x8xbf16>
    %4 = vector.shape_cast %3 : vector<2x4x8x8xbf16> to vector<8x8x8xbf16>
    %c0_3 = arith.constant 0 : index
    %c0_4 = arith.constant 0 : index
    %c0_5 = arith.constant 0 : index
    %c0_6 = arith.constant 0 : index
    %5 = vector.load %arg2[%c0_3, %c0_4, %c0_5, %c0_6] : memref<2x4x8x128xbf16, #tpu.memory_space<vmem>>, vector<2x4x8x128xbf16>
    %6 = vector.shape_cast %5 : vector<2x4x8x128xbf16> to vector<8x8x128xbf16>
    %cst = arith.constant dense<0.000000e+00> : vector<8x8x128xf32>
    %7 = tpu.matmul %4, %6, %cst {dimension_numbers = #tpu.dot_dimension_numbers<[2], [1], [1], [2], [0, 0, 0, 1, 1, 2], [0], [0]>} : vector<8x8x8xbf16>, vector<8x8x128xbf16>, vector<8x8x128xf32> -> vector<8x8x128xf32>
    %cst_7 = arith.constant -1.000000e+09 : f32
    %8 = vector.shape_cast %2 : vector<1x1x128xi1> to vector<1x1x128xi1>
    %9 = vector.broadcast %8 : vector<1x1x128xi1> to vector<8x8x128xi1>
    %10 = vector.broadcast %cst_7 : f32 to vector<8x8x128xf32>
    %11 = arith.select %9, %7, %10 : vector<8x8x128xi1>, vector<8x8x128xf32>
    %cst_8 = arith.constant dense<0xFF800000> : vector<8x8xf32>
    %12 = vector.multi_reduction <maximumf>, %11, %cst_8 [2] : vector<8x8x128xf32> to vector<8x8xf32>
    %13 = vector.shape_cast %12 : vector<8x8xf32> to vector<8x8x1xf32>
    %14 = vector.broadcast %13 : vector<8x8x1xf32> to vector<8x8x128xf32>
    %15 = arith.subf %11, %14 : vector<8x8x128xf32>
    %16 = math.exp %15 : vector<8x8x128xf32>
    %cst_9 = arith.constant dense<0.000000e+00> : vector<8x8xf32>
    %17 = vector.multi_reduction <add>, %16, %cst_9 [2] : vector<8x8x128xf32> to vector<8x8xf32>
    %18 = vector.shape_cast %17 : vector<8x8xf32> to vector<8x8x1xf32>
    %19 = tpu.reciprocal %18 {approx = true} : vector<8x8x1xf32> -> vector<8x8x1xf32>
    %20 = vector.broadcast %19 : vector<8x8x1xf32> to vector<8x8x128xf32>
    %21 = arith.mulf %16, %20 : vector<8x8x128xf32>
    %22 = vector.shape_cast %21 : vector<8x8x128xf32> to vector<2x4x8x128xf32>
    %cst_10 = arith.constant dense<0.000000e+00> : vector<2x8x128xf32>
    %23 = vector.multi_reduction <add>, %22, %cst_10 [1] : vector<2x4x8x128xf32> to vector<2x8x128xf32>
    %cst_11 = arith.constant 2.500000e-01 : f32
    %24 = vector.broadcast %cst_11 : f32 to vector<2x8x128xf32>
    %25 = arith.mulf %23, %24 : vector<2x8x128xf32>
    %c0_12 = arith.constant 0 : index
    %c0_13 = arith.constant 0 : index
    %c0_14 = arith.constant 0 : index
    %c0_15 = arith.constant 0 : index
    %26 = vector.load %arg3[%c0_12, %c0_13, %c0_14, %c0_15] : memref<2x4x128x8xbf16, #tpu.memory_space<vmem>>, vector<2x4x128x8xbf16>
    %27 = vector.shape_cast %26 : vector<2x4x128x8xbf16> to vector<8x128x8xbf16>
    %c0_16 = arith.constant 0 : index
    %c0_17 = arith.constant 0 : index
    %c0_18 = arith.constant 0 : index
    %c0_19 = arith.constant 0 : index
    %28 = vector.load %arg4[%c0_16, %c0_17, %c0_18, %c0_19] : memref<2x4x8x128xbf16, #tpu.memory_space<vmem>>, vector<2x4x8x128xbf16>
    %29 = vector.shape_cast %28 : vector<2x4x8x128xbf16> to vector<8x8x128xbf16>
    %cst_20 = arith.constant dense<0.000000e+00> : vector<8x128x128xf32>
    %30 = tpu.matmul %27, %29, %cst_20 {dimension_numbers = #tpu.dot_dimension_numbers<[2], [1], [1], [2], [0, 0, 0, 1, 1, 2], [0], [0]>} : vector<8x128x8xbf16>, vector<8x8x128xbf16>, vector<8x128x128xf32> -> vector<8x128x128xf32>
    %cst_21 = arith.constant -1.000000e+09 : f32
    %31 = vector.shape_cast %2 : vector<1x1x128xi1> to vector<1x1x128xi1>
    %32 = vector.broadcast %31 : vector<1x1x128xi1> to vector<8x128x128xi1>
    %33 = vector.broadcast %cst_21 : f32 to vector<8x128x128xf32>
    %34 = arith.select %32, %30, %33 : vector<8x128x128xi1>, vector<8x128x128xf32>
    %cst_22 = arith.constant dense<0xFF800000> : vector<8x128xf32>
    %35 = vector.multi_reduction <maximumf>, %34, %cst_22 [2] : vector<8x128x128xf32> to vector<8x128xf32>
    %36 = vector.shape_cast %35 : vector<8x128xf32> to vector<8x128x1xf32>
    %37 = vector.broadcast %36 : vector<8x128x1xf32> to vector<8x128x128xf32>
    %38 = arith.subf %34, %37 : vector<8x128x128xf32>
    %39 = math.exp %38 : vector<8x128x128xf32>
    %cst_23 = arith.constant dense<0.000000e+00> : vector<8x128xf32>
    %40 = vector.multi_reduction <add>, %39, %cst_23 [2] : vector<8x128x128xf32> to vector<8x128xf32>
    %41 = vector.shape_cast %40 : vector<8x128xf32> to vector<8x128x1xf32>
    %42 = tpu.reciprocal %41 {approx = true} : vector<8x128x1xf32> -> vector<8x128x1xf32>
    %43 = vector.broadcast %42 : vector<8x128x1xf32> to vector<8x128x128xf32>
    %44 = arith.mulf %39, %43 : vector<8x128x128xf32>
    %45 = vector.shape_cast %44 : vector<8x128x128xf32> to vector<2x4x128x128xf32>
    %cst_24 = arith.constant dense<0.000000e+00> : vector<2x128x128xf32>
    %46 = vector.multi_reduction <add>, %45, %cst_24 [1] : vector<2x4x128x128xf32> to vector<2x128x128xf32>
    %cst_25 = arith.constant 2.500000e-01 : f32
    %47 = vector.broadcast %cst_25 : f32 to vector<2x128x128xf32>
    %48 = arith.mulf %46, %47 : vector<2x128x128xf32>
    %49 = tpu.transpose %48, [0, 2, 1] : vector<2x128x128xf32> -> vector<2x128x128xf32>
    %50 = arith.truncf %25 : vector<2x8x128xf32> to vector<2x8x128xbf16>
    %51 = arith.truncf %49 : vector<2x128x128xf32> to vector<2x128x128xbf16>
    %cst_26 = arith.constant dense<0.000000e+00> : vector<2x8x128xf32>
    %52 = tpu.matmul %50, %51, %cst_26 {dimension_numbers = #tpu.dot_dimension_numbers<[2], [1], [1], [2], [0, 0, 0, 1, 1, 2], [0], [0]>} : vector<2x8x128xbf16>, vector<2x128x128xbf16>, vector<2x8x128xf32> -> vector<2x8x128xf32>
    %c0_27 = arith.constant 0 : index
    %c0_28 = arith.constant 0 : index
    %c0_29 = arith.constant 0 : index
    %53 = vector.load %arg5[%c0_27, %c0_28, %c0_29] : memref<2x1x128xf32, #tpu.memory_space<vmem>>, vector<2x1x128xf32>
    %cst_30 = arith.constant 5.000000e-01 : f32
    %54 = vector.broadcast %cst_30 : f32 to vector<2x1x128xf32>
    %55 = arith.cmpf ogt, %53, %54 : vector<2x1x128xf32>
    %cst_31 = arith.constant -1.000000e+09 : f32
    %56 = vector.shape_cast %55 : vector<2x1x128xi1> to vector<2x1x128xi1>
    %57 = vector.broadcast %56 : vector<2x1x128xi1> to vector<2x8x128xi1>
    %58 = vector.broadcast %cst_31 : f32 to vector<2x8x128xf32>
    %59 = arith.select %57, %52, %58 : vector<2x8x128xi1>, vector<2x8x128xf32>
    %cst_32 = arith.constant dense<0xFF800000> : vector<2x8xf32>
    %60 = vector.multi_reduction <maximumf>, %59, %cst_32 [2] : vector<2x8x128xf32> to vector<2x8xf32>
    %61 = vector.shape_cast %60 : vector<2x8xf32> to vector<2x8x1xf32>
    %62 = vector.broadcast %61 : vector<2x8x1xf32> to vector<2x8x128xf32>
    %63 = arith.subf %59, %62 : vector<2x8x128xf32>
    %64 = math.exp %63 : vector<2x8x128xf32>
    %cst_33 = arith.constant dense<0.000000e+00> : vector<2x8xf32>
    %65 = vector.multi_reduction <add>, %64, %cst_33 [2] : vector<2x8x128xf32> to vector<2x8xf32>
    %66 = vector.shape_cast %65 : vector<2x8xf32> to vector<2x8x1xf32>
    %67 = tpu.reciprocal %66 {approx = true} : vector<2x8x1xf32> -> vector<2x8x1xf32>
    %68 = vector.broadcast %67 : vector<2x8x1xf32> to vector<2x8x128xf32>
    %69 = arith.mulf %64, %68 : vector<2x8x128xf32>
    %c0_34 = arith.constant 0 : index
    %c0_35 = arith.constant 0 : index
    %c0_36 = arith.constant 0 : index
    %70 = vector.load %arg6[%c0_34, %c0_35, %c0_36] : memref<2x8x128xf32, #tpu.memory_space<vmem>>, vector<2x8x128xf32>
    tpu.vector_store %arg6[%c0_34, %c0_35, %c0_36], %69 {strides = array<i32>} : memref<2x8x128xf32, #tpu.memory_space<vmem>>, vector<2x8x128xf32>,
    %c0_37 = arith.constant 0 : index
    %c0_38 = arith.constant 0 : index
    %c0_39 = arith.constant 0 : index
    %71 = vector.load %arg7[%c0_37, %c0_38, %c0_39] : memref<2x8x128xf32, #tpu.memory_space<vmem>>, vector<2x8x128xf32>
    tpu.vector_store %arg7[%c0_37, %c0_38, %c0_39], %25 {strides = array<i32>} : memref<2x8x128xf32, #tpu.memory_space<vmem>>, vector<2x8x128xf32>,
    return
  }
  func.func @transform_0(%arg0: i32) -> (i32, i32, i32, i32) {
    %c0_i32 = arith.constant 0 : i32
    %c0_i32_0 = arith.constant 0 : i32
    %c0_i32_1 = arith.constant 0 : i32
    %c0_i32_2 = arith.constant 0 : i32
    return %arg0, %c0_i32, %c0_i32_0, %c0_i32_1 : i32, i32, i32, i32
  }
  func.func @transform_1(%arg0: i32) -> (i32, i32, i32, i32) {
    %c0_i32 = arith.constant 0 : i32
    %c0_i32_0 = arith.constant 0 : i32
    %c0_i32_1 = arith.constant 0 : i32
    %c0_i32_2 = arith.constant 0 : i32
    return %arg0, %c0_i32, %c0_i32_0, %c0_i32_1 : i32, i32, i32, i32
  }
  func.func @transform_2(%arg0: i32) -> (i32, i32, i32, i32) {
    %c0_i32 = arith.constant 0 : i32
    %c0_i32_0 = arith.constant 0 : i32
    %c0_i32_1 = arith.constant 0 : i32
    %c0_i32_2 = arith.constant 0 : i32
    return %arg0, %c0_i32, %c0_i32_0, %c0_i32_1 : i32, i32, i32, i32
  }
  func.func @transform_3(%arg0: i32) -> (i32, i32, i32, i32) {
    %c0_i32 = arith.constant 0 : i32
    %c0_i32_0 = arith.constant 0 : i32
    %c0_i32_1 = arith.constant 0 : i32
    %c0_i32_2 = arith.constant 0 : i32
    return %arg0, %c0_i32, %c0_i32_0, %c0_i32_1 : i32, i32, i32, i32
  }
  func.func @transform_4(%arg0: i32) -> (i32, i32, i32) {
    %c0_i32 = arith.constant 0 : i32
    %c0_i32_0 = arith.constant 0 : i32
    %c0_i32_1 = arith.constant 0 : i32
    return %arg0, %c0_i32, %c0_i32_0 : i32, i32, i32
  }
  func.func @transform_5(%arg0: i32) -> (i32, i32, i32) {
    %c0_i32 = arith.constant 0 : i32
    %c0_i32_0 = arith.constant 0 : i32
    %c0_i32_1 = arith.constant 0 : i32
    return %arg0, %c0_i32, %c0_i32_0 : i32, i32, i32
  }
  func.func @transform_6(%arg0: i32) -> (i32, i32, i32) {
    %c0_i32 = arith.constant 0 : i32
    %c0_i32_0 = arith.constant 0 : i32
    %c0_i32_1 = arith.constant 0 : i32
    return %arg0, %c0_i32, %c0_i32_0 : i32, i32, i32
  }
}

</mosaic_0001>

<bundles_post_ra>
// kernel: tpu_custom_call.1
= control target key start
LH: loop header
LB: loop body
LE: loop exit
PB: predicated region body
PF: predicated region fallthrough
CT: control target
= control target key end

     0   :  { %12 = vsyncpa [#allocation3], 0  ;;  %vm48_vm0 = vcmask 1043456   ;;  %vm44_vm1 = vcmask 64512   ;;  %s6643_s0 = inlined_call_operand.vmem [shape: bf16[2,4,8,8], index: 0, kind: input, shape index: {}]   ;;  %s6644_s1 = inlined_call_operand.vmem [shape: bf16[2,4,8,128], index: 1, kind: input, shape index: {}]   ;;  %s6645_s2 = inlined_call_operand.vmem [shape: bf16[2,4,128,8], index: 2, kind: input, shape index: {}]   ;;  %s6646_s3 = inlined_call_operand.vmem [shape: bf16[2,4,8,128], index: 3, kind: input, shape index: {}]   ;;  %s6647_s4 = inlined_call_operand.vmem [shape: f32[2,1,128], index: 4, kind: input, shape index: {}]   ;;  %s6648_s5 = inlined_call_operand.hbm [shape: f32[2,8,128], index: 5, kind: output, shape index: {0}]   ;;  %s6649_s6 = inlined_call_operand.hbm [shape: f32[2,8,128], index: 6, kind: output, shape index: {1}]  }
   0x1   :  { %v36_v0 = vld [vmem:[%s6644_s1] sm:$0xf]  ;;  %v37_v1 = vld [vmem:[%s6644_s1 + $0x4] sm:$0xf]  ;;  %v38_v4 = vld [vmem:[%s6644_s1 + $0x8] sm:$0xf] }
   0x2   :  { %v50_v2 = vsel %vm48_vm0, %v36_v0, 0  ;;  %v69_v3 = vsel %vm48_vm0, %v37_v1, 0  ;;  %v39_v5 = vld [vmem:[%s6644_s1 + $0xc] sm:$0xf]  ;;  %v88_v6 = vsel %vm48_vm0, %v38_v4, 0 }
   0x3   :  { %59 = vmatpush.bf16.msra.mxu0 %v50_v2  ;;  %78 = vmatpush.bf16.msra.mxu1 %v69_v3  ;;  %v107_v7 = vsel %vm48_vm0, %v39_v5, 0  ;;  %v28_v8 = vld [vmem:[%s6643_s0] sm:$0xf]  ;;  %v29_v9 = vld [vmem:[%s6643_s0 + $0x4] sm:$0xf] }
   0x4   :  { %97 = vmatpush.bf16.msra.mxu2 %v88_v6  ;;  %116 = vmatpush.bf16.msra.mxu3 %v107_v7  ;;  %v30_v10 = vld [vmem:[%s6643_s0 + $0x8] sm:$0xf]  ;;  %v31_v11 = vld [vmem:[%s6643_s0 + $0xc] sm:$0xf]  ;;  %v40_v12 = vld [vmem:[%s6644_s1 + $0x10] sm:$0xf] }
   0x5   :  { %v126_v13 = vsel %vm48_vm0, %v40_v12, 0  ;;  %v41_v14 = vld [vmem:[%s6644_s1 + $0x14] sm:$0xf]  ;;  %v42_v15 = vld [vmem:[%s6644_s1 + $0x18] sm:$0xf] }
   0x6   :  { %3050 = vmatmul.msk.bf16.vlgmr.msra.gmra.mxu0 %vm44_vm1, %v28_v8  ;;  %3051 = vmatmul.msk.bf16.vlgmr.msra.gmra.mxu1 %vm44_vm1, %v29_v9  ;;  %v145_v16 = vsel %vm48_vm0, %v41_v14, 0  ;;  %v164_v17 = vsel %vm48_vm0, %v42_v15, 0  ;;  %v43_v18 = vld [vmem:[%s6644_s1 + $0x1c] sm:$0xf]  ;;  %v416_v20 = vld [vmem:[%s6646_s3] sm:$0xf] }
   0x7   :  { %3052 = vmatmul.msk.bf16.vlgmr.msra.gmra.mxu2 %vm44_vm1, %v30_v10  ;;  %3053 = vmatmul.msk.bf16.vlgmr.msra.gmra.mxu3 %vm44_vm1, %v31_v11  ;;  %v183_v19 = vsel %vm48_vm0, %v43_v18, 0  ;;  %v417_v21 = vld [vmem:[%s6646_s3 + $0x4] sm:$0xf]  ;;  %v489_v22 = vsel %vm48_vm0, %v416_v20, 0  ;;  %v418_v24 = vld [vmem:[%s6646_s3 + $0x8] sm:$0xf] }
   0x8   :  { %135 = vmatpush.bf16.msrb.mxu0 %v126_v13  ;;  %154 = vmatpush.bf16.msrb.mxu1 %v145_v16  ;;  %v605_v23 = vsel %vm48_vm0, %v417_v21, 0  ;;  %v419_v25 = vld [vmem:[%s6646_s3 + $0xc] sm:$0xf]  ;;  %v721_v26 = vsel %vm48_vm0, %v418_v24, 0 }
   0x9   :  { %173 = vmatpush.bf16.msrb.mxu2 %v164_v17  ;;  %192 = vmatpush.bf16.msrb.mxu3 %v183_v19  ;;  %v837_v27 = vsel %vm48_vm0, %v419_v25, 0 }
   0xc   :  { %498 = vmatpush.bf16.msra.mxu0 %v489_v22  ;;  %614 = vmatpush.bf16.msra.mxu1 %v605_v23 }
   0xd   :  { %730 = vmatpush.bf16.msra.mxu2 %v721_v26  ;;  %846 = vmatpush.bf16.msra.mxu3 %v837_v27 }
   0xe   :  { %13 = vsyncpa [#allocation5], 0  ;;  %v32_v28 = vld [vmem:[%s6643_s0 + $0x10] sm:$0xf]  ;;  %v33_v29 = vld [vmem:[%s6643_s0 + $0x14] sm:$0xf]  ;;  %v25_v56 = vlaneseq }
   0xf   :  { %v34_v30 = vld [vmem:[%s6643_s0 + $0x18] sm:$0xf]  ;;  %v35_v31 = vld [vmem:[%s6643_s0 + $0x1c] sm:$0xf]  ;;  %v3378_v32 = vld [vmem:[%s6645_s2] sm:$0xff]  ;;  %s3033_s20 = sshll.u32 %s6649_s6, 4  ;;  %s3034_s20 = int_to_ptr.hbm [resolvable:$true] %s3033_s20 }
  0x10   :  { %v3386_v33 = vld [vmem:[%s6645_s2 + $0x40] sm:$0xff]  ;;  %v3379_v36 = vld [vmem:[%s6645_s2 + $0x8] sm:$0xff]  ;;  %v3380_v40 = vld [vmem:[%s6645_s2 + $0x10] sm:$0xff]  ;;  %v4381_v57 = vand.u32 127, %v25_v56  ;;  %s4167_s21 = smov 128   ;;  %s4168_s22 = smov 8  }
  0x11   :  { %v3394_v34 = vld [vmem:[%s6645_s2 + $0x80] sm:$0xff]  ;;  %v3387_v37 = vld [vmem:[%s6645_s2 + $0x48] sm:$0xff]  ;;  %v3388_v41 = vld [vmem:[%s6645_s2 + $0x50] sm:$0xff]  ;;  %s4169_s23 = smov [#allocation2]   ;;  %s3020_s26 = sshll.u32 %s6648_s5, 4  ;;  %s3021_s26 = int_to_ptr.hbm [resolvable:$true] %s3020_s26 }
  0x12   :  { %v3402_v35 = vld [vmem:[%s6645_s2 + $0xc0] sm:$0xff]  ;;  %v3395_v38 = vld [vmem:[%s6645_s2 + $0x88] sm:$0xff]  ;;  %v3396_v42 = vld [vmem:[%s6645_s2 + $0x90] sm:$0xff]  ;;  %vm27_vm2 = vcmp.lt.s32.totalorder %v4381_v57, 16  ;;  %s3018_s24 = sshll.u32 %s4169_s23, 4  ;;  %s3019_s24 = int_to_ptr.vmem [resolvable:$true] %s3018_s24 }
  0x13   :  { %v3403_v39 = vld [vmem:[%s6645_s2 + $0xc8] sm:$0xff]  ;;  %v3404_v43 = vld [vmem:[%s6645_s2 + $0xd0] sm:$0xff]  ;;  %v3381_v44 = vld [vmem:[%s6645_s2 + $0x18] sm:$0xff] }
  0x14   :  { %v3389_v45 = vld [vmem:[%s6645_s2 + $0x58] sm:$0xff]  ;;  %v3382_v48 = vld [vmem:[%s6645_s2 + $0x20] sm:$0xff]  ;;  %v3383_v52 = vld [vmem:[%s6645_s2 + $0x28] sm:$0xff] }
  0x15   :  { %v3397_v46 = vld [vmem:[%s6645_s2 + $0x98] sm:$0xff]  ;;  %v3390_v49 = vld [vmem:[%s6645_s2 + $0x60] sm:$0xff]  ;;  %v3399_v53 = vld [vmem:[%s6645_s2 + $0xa8] sm:$0xff] }
  0x16   :  { %3054 = vmatmul.msk.bf16.vlgmr.msrb.gmra.mxu0 %vm44_vm1, %v32_v28  ;;  %3055 = vmatmul.msk.bf16.vlgmr.msrb.gmra.mxu1 %vm44_vm1, %v33_v29  ;;  %v3405_v47 = vld [vmem:[%s6645_s2 + $0xd8] sm:$0xff]  ;;  %v3398_v50 = vld [vmem:[%s6645_s2 + $0xa0] sm:$0xff]  ;;  %v3407_v54 = vld [vmem:[%s6645_s2 + $0xe8] sm:$0xff] }
  0x17   :  { %3056 = vmatmul.msk.bf16.vlgmr.msrb.gmra.mxu2 %vm44_vm1, %v34_v30  ;;  %3057 = vmatmul.msk.bf16.vlgmr.msrb.gmra.mxu3 %vm44_vm1, %v35_v31  ;;  %v3406_v51 = vld [vmem:[%s6645_s2 + $0xe0] sm:$0xff]  ;;  %v3391_v55 = vld [vmem:[%s6645_s2 + $0x68] sm:$0xff]  ;;  %v3384_v61 = vld [vmem:[%s6645_s2 + $0x30] sm:$0xff] }
  0x18   :  { %v3392_v62 = vld [vmem:[%s6645_s2 + $0x70] sm:$0xff]  ;;  %v3401_v27 = vld [vmem:[%s6645_s2 + $0xb8] sm:$0xff] }
  0x19   :  { %v3400_v5 = vld [vmem:[%s6645_s2 + $0xb0] sm:$0xff]  ;;  %v422_v28 = vld [vmem:[%s6646_s3 + $0x18] sm:$0xf]  ;;  %v423_v31 = vld [vmem:[%s6646_s3 + $0x1c] sm:$0xf] }
  0x1a   :  { %v3408_v6 = vld [vmem:[%s6645_s2 + $0xf0] sm:$0xff]  ;;  %v1185_v30 = vsel %vm48_vm0, %v422_v28, 0 }
  0x1b   :  { %v420_v26 = vld [vmem:[%s6646_s3 + $0x10] sm:$0xf]  ;;  %1194 = vmatpush.bf16.msrb.mxu2 %v1185_v30 }
  0x1c   :  { %v953_v29 = vsel %vm48_vm0, %v420_v26, 0 }
  0x1d   :  { %962 = vmatpush.bf16.msrb.mxu0 %v953_v29 }
  0x26   :  { %3090 = vmatmul.msk.bf16.vlgmr.msra.gmra.mxu0 %vm44_vm1, %v3378_v32  ;;  %3130 = vmatmul.msk.bf16.vlgmr.msra.gmra.mxu1 %vm44_vm1, %v3386_v33  ;;  %v1301_v32 = vsel %vm48_vm0, %v423_v31, 0  ;;  %v3411_v31 = vld [vmem:[%s6645_s2 + $0x108] sm:$0xff] }
  0x27   :  { %3170 = vmatmul.msk.bf16.vlgmr.msra.gmra.mxu2 %vm44_vm1, %v3394_v34  ;;  %3210 = vmatmul.msk.bf16.vlgmr.msra.gmra.mxu3 %vm44_vm1, %v3402_v35 }
  0x28   :  { %1310 = vmatpush.bf16.msrb.mxu3 %v1301_v32  ;;  %v3419_v32 = vld [vmem:[%s6645_s2 + $0x148] sm:$0xff] }
  0x36   :  { %3091 = vmatmul.msk.bf16.gmra.mxu0 %vm44_vm1, %v3379_v36  ;;  %3131 = vmatmul.msk.bf16.gmra.mxu1 %vm44_vm1, %v3387_v37 }
  0x37   :  { %3171 = vmatmul.msk.bf16.gmra.mxu2 %vm44_vm1, %v3395_v38  ;;  %3211 = vmatmul.msk.bf16.gmra.mxu3 %vm44_vm1, %v3403_v39  ;;  %v3385_v38 = vld [vmem:[%s6645_s2 + $0x38] sm:$0xff] }
  0x46   :  { %3092 = vmatmul.msk.bf16.gmra.mxu0 %vm44_vm1, %v3380_v40  ;;  %3132 = vmatmul.msk.bf16.gmra.mxu1 %vm44_vm1, %v3388_v41  ;;  %v3393_v41 = vld [vmem:[%s6645_s2 + $0x78] sm:$0xff] }
  0x47   :  { %3172 = vmatmul.msk.bf16.gmra.mxu2 %vm44_vm1, %v3396_v42  ;;  %3212 = vmatmul.msk.bf16.gmra.mxu3 %vm44_vm1, %v3404_v43  ;;  %v3409_v42 = vld [vmem:[%s6645_s2 + $0xf8] sm:$0xff] }
  0x56   :  { %3093 = vmatmul.msk.bf16.gmra.mxu0 %vm44_vm1, %v3381_v44  ;;  %3133 = vmatmul.msk.bf16.gmra.mxu1 %vm44_vm1, %v3389_v45 }
  0x57   :  { %3173 = vmatmul.msk.bf16.gmra.mxu2 %vm44_vm1, %v3397_v46  ;;  %3213 = vmatmul.msk.bf16.gmra.mxu3 %vm44_vm1, %v3405_v47 }
  0x66   :  { %3094 = vmatmul.msk.bf16.gmra.mxu0 %vm44_vm1, %v3382_v48  ;;  %3134 = vmatmul.msk.bf16.gmra.mxu1 %vm44_vm1, %v3390_v49  ;;  %v421_v49 = vld [vmem:[%s6646_s3 + $0x14] sm:$0xf] }
  0x67   :  { %3174 = vmatmul.msk.bf16.gmra.mxu2 %vm44_vm1, %v3398_v50  ;;  %3214 = vmatmul.msk.bf16.gmra.mxu3 %vm44_vm1, %v3406_v51  ;;  %v1069_v50 = vsel %vm48_vm0, %v421_v49, 0 }
  0x68   :  { %1078 = vmatpush.bf16.msrb.mxu1 %v1069_v50 }
  0x76   :  { %3095 = vmatmul.msk.bf16.gmra.mxu0 %vm44_vm1, %v3383_v52  ;;  %3135 = vmatmul.msk.bf16.gmra.mxu1 %vm44_vm1, %v3391_v55 }
  0x77   :  { %3175 = vmatmul.msk.bf16.gmra.mxu2 %vm44_vm1, %v3399_v53  ;;  %3215 = vmatmul.msk.bf16.gmra.mxu3 %vm44_vm1, %v3407_v54 }
  0x83   :  { %v61_v58 = vpop.f32.mrf.mxu0  ;;  %v80_v59 = vpop.f32.mrf.mxu1 }
  0x84   :  { %v4386_v60 = vsel %vm27_vm2, %v61_v58, -1e+09  ;;  %v4404_v4 = vsel %vm27_vm2, %v80_v59, -1e+09  ;;  %v3410_v58 = vld [vmem:[%s6645_s2 + $0x100] sm:$0xff] }
  0x85   :  { %208 = vmax.xlane.f32.xlu0 %v4386_v60  ;;  %v3426_v59 = vld [vmem:[%s6645_s2 + $0x180] sm:$0xff] }
  0x86   :  { %3096 = vmatmul.msk.bf16.gmra.mxu0 %vm44_vm1, %v3384_v61  ;;  %3136 = vmatmul.msk.bf16.gmra.mxu1 %vm44_vm1, %v3392_v62  ;;  %v3434_v61 = vld [vmem:[%s6645_s2 + $0x1c0] sm:$0xff] }
  0x87   :  { %3176 = vmatmul.msk.bf16.gmra.mxu2 %vm44_vm1, %v3400_v5  ;;  %3216 = vmatmul.msk.bf16.gmra.mxu3 %vm44_vm1, %v3408_v6 }
  0x8a   :  { %v99_v63 = vpop.f32.mrf.mxu2  ;;  %v118_v0 = vpop.f32.mrf.mxu3 }
  0x8b   :  { %v63_v1 = vpop.f32.mrf.mxu0  ;;  %v82_v2 = vpop.f32.mrf.mxu1  ;;  %v4399_v3 = vsel %vm27_vm2, %v99_v63, -1e+09  ;;  %v4417_v11 = vsel %vm27_vm2, %v118_v0, -1e+09 }
  0x8c   :  { %212 = vmax.xlane.f32.xlu1 %v4399_v3 }
  0x8d   :  { %210 = vmax.xlane.f32.xlu0 %v4404_v4 }
  0x92   :  { %v101_v7 = vpop.f32.mrf.mxu2  ;;  %v120_v8 = vpop.f32.mrf.mxu3 }
  0x93   :  { %v137_v9 = vpop.f32.mrf.mxu0  ;;  %v156_v10 = vpop.f32.mrf.mxu1 }
  0x94   :  { %214 = vmax.xlane.f32.xlu1 %v4417_v11  ;;  %v4422_v12 = vsel %vm27_vm2, %v137_v9, -1e+09  ;;  %v4437_v19 = vsel %vm27_vm2, %v156_v10, -1e+09 }
  0x95   :  { %216 = vmax.xlane.f32.xlu2 %v4422_v12 }
  0x96   :  { %3097 = vmatmul.msk.bf16.gmra.mxu0 %vm44_vm1, %v3385_v38  ;;  %3137 = vmatmul.msk.bf16.gmra.mxu1 %vm44_vm1, %v3393_v41  ;;  %v3435_v38 = vld [vmem:[%s6645_s2 + $0x1c8] sm:$0xff] }
  0x97   :  { %3177 = vmatmul.msk.bf16.gmra.mxu2 %vm44_vm1, %v3401_v27  ;;  %3217 = vmatmul.msk.bf16.gmra.mxu3 %vm44_vm1, %v3409_v42 }
  0x9a   :  { %v175_v13 = vpop.f32.mrf.mxu2  ;;  %v194_v14 = vpop.f32.mrf.mxu3 }
  0x9b   :  { %v139_v15 = vpop.f32.mrf.mxu0  ;;  %v158_v16 = vpop.f32.mrf.mxu1  ;;  %v4427_v17 = vsel %vm27_vm2, %v194_v14, -1e+09  ;;  %v4431_v18 = vsel %vm27_vm2, %v175_v13, -1e+09  ;;  %v3418_v14 = vld [vmem:[%s6645_s2 + $0x140] sm:$0xff] }
  0x9c   :  { %222 = vmax.xlane.f32.xlu1 %v4427_v17  ;;  %220 = vmax.xlane.f32.xlu0 %v4431_v18 }
  0x9d   :  { %218 = vmax.xlane.f32.xlu2 %v4437_v19 }
  0xa2   :  { %v177_v20 = vpop.f32.mrf.mxu2  ;;  %v196_v21 = vpop.f32.mrf.mxu3 }
  0xa3   :  { %v500_v22 = vpop.f32.mrf.mxu0  ;;  %v616_v23 = vpop.f32.mrf.mxu1 }
  0xa4   :  { %v4442_v24 = vsel %vm27_vm2, %v616_v23, -1e+09  ;;  %v4446_v25 = vsel %vm27_vm2, %v500_v22, -1e+09 }
  0xa5   :  { %1512 = vmax.xlane.f32.xlu2 %v4442_v24  ;;  %1480 = vmax.xlane.f32.xlu1 %v4446_v25 }
  0xa6   :  { %3250 = vmatmul.msk.bf16.vlgmr.msrb.gmra.mxu0 %vm44_vm1, %v3410_v58  ;;  %3290 = vmatmul.msk.bf16.vlgmr.msrb.gmra.mxu1 %vm44_vm1, %v3418_v14 }
  0xa7   :  { %3330 = vmatmul.msk.bf16.vlgmr.msrb.gmra.mxu2 %vm44_vm1, %v3426_v59  ;;  %3370 = vmatmul.msk.bf16.vlgmr.msrb.gmra.mxu3 %vm44_vm1, %v3434_v61  ;;  %v3428_v59 = vld [vmem:[%s6645_s2 + $0x190] sm:$0xff] }
  0xaa   :  { %v732_v33 = vpop.f32.mrf.mxu2  ;;  %v848_v34 = vpop.f32.mrf.mxu3 }
  0xab   :  { %v502_v35 = vpop.f32.mrf.mxu0  ;;  %v4468_v36 = vsel %vm27_vm2, %v732_v33, -1e+09  ;;  %v4472_v37 = vsel %vm27_vm2, %v848_v34, -1e+09  ;;  %v618_v40 = vpop.f32.mrf.mxu1 }
  0xac   :  { %6820 = vst [vmem:[#allocation8_spill] sm:$0xff] %v4468_v36  ;;  %1544 = vmax.xlane.f32.xlu0 %v4468_v36  ;;  %v4480_v39 = vsel %vm27_vm2, %v502_v35, -1e+09  ;;  %v4495_v45 = vsel %vm27_vm2, %v618_v40, -1e+09  ;;  %v3427_v35 = vld [vmem:[%s6645_s2 + $0x188] sm:$0xff] }
  0xad   :  { %6821 = vst [vmem:[#allocation9_spill] sm:$0xff] %v4472_v37  ;;  %1482 = vmax.xlane.f32.xlu2 %v4480_v39  ;;  %1576 = vmax.xlane.f32.xlu1 %v4472_v37 }
  0xb2   :  { %v734_v43 = vpop.f32.mrf.mxu2  ;;  %v850_v44 = vpop.f32.mrf.mxu3 }
  0xb3   :  { %v4500_v46 = vsel %vm27_vm2, %v850_v44, -1e+09  ;;  %v4504_v47 = vsel %vm27_vm2, %v734_v43, -1e+09  ;;  %v505_v48 = vpop.f32.mrf.mxu0  ;;  %v621_v51 = vpop.f32.mrf.mxu1 }
  0xb4   :  { %1514 = vmax.xlane.f32.xlu0 %v4495_v45  ;;  %6822 = vst [vmem:[#allocation10_spill] sm:$0xff] %v4500_v46  ;;  %v4514_v52 = vsel %vm27_vm2, %v505_v48, -1e+09  ;;  %v4518_v54 = vsel %vm27_vm2, %v621_v51, -1e+09 }
  0xb5   :  { %6823 = vst [vmem:[#allocation11_spill] sm:$0xff] %v4504_v47  ;;  %1578 = vmax.xlane.f32.xlu2 %v4500_v46  ;;  %1546 = vmax.xlane.f32.xlu1 %v4504_v47 }
  0xb6   :  { %3251 = vmatmul.msk.bf16.gmra.mxu0 %vm44_vm1, %v3411_v31  ;;  %3291 = vmatmul.msk.bf16.gmra.mxu1 %vm44_vm1, %v3419_v32 }
  0xb7   :  { %3331 = vmatmul.msk.bf16.gmra.mxu2 %vm44_vm1, %v3427_v35  ;;  %3371 = vmatmul.msk.bf16.gmra.mxu3 %vm44_vm1, %v3435_v38 }
  0xba   :  { %v737_v53 = vpop.f32.mrf.mxu2  ;;  %v853_v56 = vpop.f32.mrf.mxu3 }
  0xbb   :  { %v4522_v55 = vsel %vm27_vm2, %v737_v53, -1e+09  ;;  %v507_v62 = vpop.f32.mrf.mxu0  ;;  %v623_v63 = vpop.f32.mrf.mxu1  ;;  %v4541_v0 = vsel %vm27_vm2, %v853_v56, -1e+09 }
  0xbc   :  { %6824 = vst [vmem:[#allocation12_spill] sm:$0xff] %v4522_v55  ;;  %1484 = vmax.xlane.f32.xlu0 %v4514_v52  ;;  %v4546_v1 = vsel %vm27_vm2, %v623_v63, -1e+09  ;;  %v4550_v2 = vsel %vm27_vm2, %v507_v62, -1e+09 }
  0xbd   :  { %1548 = vmax.xlane.f32.xlu2 %v4522_v55  ;;  %1516 = vmax.xlane.f32.xlu1 %v4518_v54  ;;  %6825 = vst [vmem:[#allocation13_spill] sm:$0xff] %v4541_v0 }
  0xc2   :  { %v739_v5 = vpop.f32.mrf.mxu2  ;;  %v855_v6 = vpop.f32.mrf.mxu3 }
  0xc3   :  { %v510_v7 = vpop.f32.mrf.mxu0  ;;  %v4560_v9 = vsel %vm27_vm2, %v739_v5, -1e+09  ;;  %v4565_v10 = vsel %vm27_vm2, %v855_v6, -1e+09  ;;  %v626_v13 = vpop.f32.mrf.mxu1 }
  0xc4   :  { %1580 = vmax.xlane.f32.xlu0 %v4541_v0  ;;  %v4556_v8 = vsel %vm27_vm2, %v510_v7, -1e+09  ;;  %6826 = vst [vmem:[#allocation14_spill] sm:$0xff] %v4560_v9  ;;  %v4575_v20 = vsel %vm27_vm2, %v626_v13, -1e+09 }
  0xc5   :  { %1518 = vmax.xlane.f32.xlu2 %v4546_v1  ;;  %1486 = vmax.xlane.f32.xlu1 %v4550_v2  ;;  %6827 = vst [vmem:[#allocation15_spill] sm:$0xff] %v4565_v10 }
  0xc7   :  { %3332 = vmatmul.msk.bf16.gmra.mxu2 %vm44_vm1, %v3428_v59 }
  0xca   :  { %v742_v15 = vpop.f32.mrf.mxu2  ;;  %v858_v16 = vpop.f32.mrf.mxu3 }
  0xcb   :  { %v4579_v21 = vsel %vm27_vm2, %v858_v16, -1e+09  ;;  %v4583_v22 = vsel %vm27_vm2, %v742_v15, -1e+09  ;;  %v512_v23 = vpop.f32.mrf.mxu0  ;;  %v628_v26 = vpop.f32.mrf.mxu1 }
  0xcc   :  { %1550 = vmax.xlane.f32.xlu0 %v4560_v9  ;;  %6828 = vst [vmem:[#allocation16_spill] sm:$0xff] %v4579_v21  ;;  %v4590_v28 = vsel %vm27_vm2, %v512_v23, -1e+09  ;;  %v4599_v30 = vsel %vm27_vm2, %v628_v26, -1e+09  ;;  %v3412_v26 = vld [vmem:[%s6645_s2 + $0x110] sm:$0xff] }
  0xcd   :  { %1488 = vmax.xlane.f32.xlu2 %v4556_v8  ;;  %1582 = vmax.xlane.f32.xlu1 %v4565_v10  ;;  %6829 = vst [vmem:[#allocation17_spill] sm:$0xff] %v4583_v22 }
  0xce   :  { %3252 = vmatmul.msk.bf16.gmra.mxu0 %vm44_vm1, %v3412_v26 }
  0xd2   :  { %v744_v27 = vpop.f32.mrf.mxu2  ;;  %v860_v33 = vpop.f32.mrf.mxu3 }
  0xd3   :  { %v4595_v29 = vsel %vm27_vm2, %v744_v27, -1e+09  ;;  %v515_v34 = vpop.f32.mrf.mxu0  ;;  %v631_v40 = vpop.f32.mrf.mxu1  ;;  %v4629_v43 = vsel %vm27_vm2, %v860_v33, -1e+09  ;;  %v3420_v27 = vld [vmem:[%s6645_s2 + $0x150] sm:$0xff] }
  0xd4   :  { %1520 = vmax.xlane.f32.xlu0 %v4575_v20  ;;  %6830 = vst [vmem:[#allocation18_spill] sm:$0xff] %v4595_v29  ;;  %v4621_v41 = vsel %vm27_vm2, %v631_v40, -1e+09  ;;  %v4625_v42 = vsel %vm27_vm2, %v515_v34, -1e+09  ;;  %3292 = vmatmul.msk.bf16.gmra.mxu1 %vm44_vm1, %v3420_v27  ;;  %v3436_v33 = vld [vmem:[%s6645_s2 + $0x1d0] sm:$0xff] }
  0xd5   :  { %1584 = vmax.xlane.f32.xlu2 %v4579_v21  ;;  %1552 = vmax.xlane.f32.xlu1 %v4583_v22  ;;  %6831 = vst [vmem:[#allocation19_spill] sm:$0xff] %v4629_v43  ;;  %v3438_v21 = vld [vmem:[%s6645_s2 + $0x1e0] sm:$0xff] }
  0xd6   :  { %3372 = vmatmul.msk.bf16.gmra.mxu3 %vm44_vm1, %v3436_v33 }
  0xda   :  { %v747_v44 = vpop.f32.mrf.mxu2  ;;  %v863_v48 = vpop.f32.mrf.mxu3 }
  0xdb   :  { %v517_v49 = vpop.f32.mrf.mxu0  ;;  %v4636_v50 = vsel %vm27_vm2, %v747_v44, -1e+09  ;;  %v4640_v51 = vsel %vm27_vm2, %v863_v48, -1e+09  ;;  %v633_v56 = vpop.f32.mrf.mxu1 }
  0xdc   :  { %1490 = vmax.xlane.f32.xlu0 %v4590_v28  ;;  %6832 = vst [vmem:[#allocation20_spill] sm:$0xff] %v4636_v50  ;;  %v4645_v53 = vsel %vm27_vm2, %v517_v49, -1e+09  ;;  %v4655_v62 = vsel %vm27_vm2, %v633_v56, -1e+09 }
  0xdd   :  { %1554 = vmax.xlane.f32.xlu2 %v4595_v29  ;;  %1522 = vmax.xlane.f32.xlu1 %v4599_v30  ;;  %6833 = vst [vmem:[#allocation21_spill] sm:$0xff] %v4640_v51 }
  0xe2   :  { %v749_v58 = vpop.f32.mrf.mxu2  ;;  %v865_v61 = vpop.f32.mrf.mxu3 }
  0xe3   :  { %v4660_v63 = vsel %vm27_vm2, %v865_v61, -1e+09  ;;  %v4664_v5 = vsel %vm27_vm2, %v749_v58, -1e+09  ;;  %v520_v6 = vpop.f32.mrf.mxu0  ;;  %v636_v7 = vpop.f32.mrf.mxu1 }
  0xe4   :  { %1586 = vmax.xlane.f32.xlu0 %v4629_v43  ;;  %6834 = vst [vmem:[#allocation22_spill] sm:$0xff] %v4660_v63  ;;  %v4670_v14 = vsel %vm27_vm2, %v520_v6, -1e+09  ;;  %v4678_v16 = vsel %vm27_vm2, %v636_v7, -1e+09 }
  0xe5   :  { %1524 = vmax.xlane.f32.xlu2 %v4621_v41  ;;  %1492 = vmax.xlane.f32.xlu1 %v4625_v42  ;;  %6835 = vst [vmem:[#allocation23_spill] sm:$0xff] %v4664_v5 }
  0xea   :  { %v752_v13 = vpop.f32.mrf.mxu2  ;;  %v868_v23 = vpop.f32.mrf.mxu3 }
  0xeb   :  { %v4674_v15 = vsel %vm27_vm2, %v752_v13, -1e+09  ;;  %v522_v31 = vpop.f32.mrf.mxu0  ;;  %v638_v34 = vpop.f32.mrf.mxu1  ;;  %v4698_v35 = vsel %vm27_vm2, %v868_v23, -1e+09  ;;  %v3413_v23 = vld [vmem:[%s6645_s2 + $0x118] sm:$0xff] }
  0xec   :  { %1556 = vmax.xlane.f32.xlu0 %v4636_v50  ;;  %6836 = vst [vmem:[#allocation24_spill] sm:$0xff] %v4674_v15  ;;  %v4704_v38 = vsel %vm27_vm2, %v638_v34, -1e+09  ;;  %v4708_v40 = vsel %vm27_vm2, %v522_v31, -1e+09  ;;  %3253 = vmatmul.msk.bf16.gmra.mxu0 %vm44_vm1, %v3413_v23  ;;  %v3429_v34 = vld [vmem:[%s6645_s2 + $0x198] sm:$0xff] }
  0xed   :  { %1494 = vmax.xlane.f32.xlu2 %v4645_v53  ;;  %1588 = vmax.xlane.f32.xlu1 %v4640_v51  ;;  %6837 = vst [vmem:[#allocation25_spill] sm:$0xff] %v4698_v35 }
  0xee   :  { %3333 = vmatmul.msk.bf16.gmra.mxu2 %vm44_vm1, %v3429_v34 }
  0xf2   :  { %v754_v48 = vpop.f32.mrf.mxu2  ;;  %v870_v49 = vpop.f32.mrf.mxu3 }
  0xf3   :  { %v525_v59 = vpop.f32.mrf.mxu0  ;;  %v4722_v6 = vsel %vm27_vm2, %v754_v48, -1e+09  ;;  %v4727_v7 = vsel %vm27_vm2, %v870_v49, -1e+09  ;;  %v641_v13 = vpop.f32.mrf.mxu1  ;;  %v3437_v48 = vld [vmem:[%s6645_s2 + $0x1d8] sm:$0xff] }
  0xf4   :  { %1526 = vmax.xlane.f32.xlu0 %v4655_v62  ;;  %v4718_v61 = vsel %vm27_vm2, %v525_v59, -1e+09  ;;  %6838 = vst [vmem:[#allocation26_spill] sm:$0xff] %v4722_v6  ;;  %v4747_v59 = vsel %vm27_vm2, %v641_v13, -1e+09  ;;  %3373 = vmatmul.msk.bf16.gmra.mxu3 %vm44_vm1, %v3437_v48 }
  0xf5   :  { %1590 = vmax.xlane.f32.xlu2 %v4660_v63  ;;  %1558 = vmax.xlane.f32.xlu1 %v4664_v5  ;;  %6839 = vst [vmem:[#allocation27_spill] sm:$0xff] %v4727_v7 }
  0xf8   :  { %v209_v44 = vpop.xlane.xlu0 %208 }
  0xf9   :  { %v224_v13 = vsub.f32 %v4386_v60, %v209_v44 }
  0xfa   :  { %v757_v27 = vpop.f32.mrf.mxu2  ;;  %v873_v49 = vpop.f32.mrf.mxu3 }
  0xfb   :  { %v4755_v23 = vsel %vm27_vm2, %v757_v27, -1e+09  ;;  %v232_v34 = vmul.f32 1.442695, %v224_v13 }
  0xfc   :  { %1496 = vmax.xlane.f32.xlu0 %v4670_v14  ;;  %6841 = vst [vmem:[#allocation29_spill] sm:$0xff] %v4755_v23 }
  0xfd   :  { %1560 = vmax.xlane.f32.xlu2 %v4674_v15  ;;  %1528 = vmax.xlane.f32.xlu1 %v4678_v16  ;;  %3559 = vpow2.f32 %v232_v34 }
  0xff   :  { %v4689_v32 = vpop.xlane.xlu1 %212 }
 0x100   :  { %v211_v26 = vpop.xlane.xlu0 %210  ;;  %v226_v13 = vsub.f32 %v4399_v3, %v4689_v32 }
 0x101   :  { %v225_v44 = vsub.f32 %v4404_v4, %v211_v26 }
 0x102   :  { %v759_v5 = vpop.f32.mrf.mxu2  ;;  %v236_v26 = vmul.f32 1.442695, %v226_v13 }
 0x103   :  { %v4780_v60 = vsel %vm27_vm2, %v759_v5, -1e+09  ;;  %v234_v4 = vmul.f32 1.442695, %v225_v44  ;;  %v4805_v32 = vpop.eup %3559 }
 0x104   :  { %1592 = vmax.xlane.f32.xlu0 %v4698_v35  ;;  %6843 = vst [vmem:[#allocation31_spill] sm:$0xff] %v4780_v60  ;;  %3374 = vmatmul.msk.bf16.gmra.mxu3 %vm44_vm1, %v3438_v21 }
 0x105   :  { %1530 = vmax.xlane.f32.xlu2 %v4704_v38  ;;  %1498 = vmax.xlane.f32.xlu1 %v4708_v40  ;;  %3561 = vpow2.f32 %v234_v4 }
 0x106   :  { %3563 = vpow2.f32 %v236_v26  ;;  %v3422_v26 = vld [vmem:[%s6645_s2 + $0x160] sm:$0xff] }
 0x107   :  { %v4712_v56 = vpop.xlane.xlu1 %214 }
 0x108   :  { %v4714_v58 = vpop.xlane.xlu2 %216  ;;  %v227_v44 = vsub.f32 %v4417_v11, %v4712_v56  ;;  %v3414_v56 = vld [vmem:[%s6645_s2 + $0x120] sm:$0xff] }
 0x109   :  { %3254 = vmatmul.msk.bf16.gmra.mxu0 %vm44_vm1, %v3414_v56 }
 0x10a   :  { %v762_v11 = vpop.f32.mrf.mxu2 }
 0x10b   :  { %v4822_v4 = vpop.eup %3561  ;;  %v4851_v10 = vsel %vm27_vm2, %v762_v11, -1e+09 }
 0x10c   :  { %1562 = vmax.xlane.f32.xlu0 %v4722_v6  ;;  %v527_v6 = vpop.f32.mrf.mxu0  ;;  %v4824_v50 = vpop.eup %3563  ;;  %6851 = vst [vmem:[#allocation39_spill] sm:$0xff] %v4851_v10 }
 0x10d   :  { %1500 = vmax.xlane.f32.xlu2 %v4718_v61  ;;  %1594 = vmax.xlane.f32.xlu1 %v4727_v7  ;;  %v4751_v7 = vsel %vm27_vm2, %v873_v49, -1e+09  ;;  %v643_v49 = vpop.f32.mrf.mxu1 }
 0x10e   :  { %6840 = vst [vmem:[#allocation28_spill] sm:$0xff] %v4751_v7  ;;  %v4771_v48 = vsel %vm27_vm2, %v643_v49, -1e+09  ;;  %v875_v49 = vpop.f32.mrf.mxu3 }
 0x10f   :  { %v4734_v31 = vpop.xlane.xlu1 %222  ;;  %v4763_v35 = vpop.xlane.xlu0 %220  ;;  %6842 = vst [vmem:[#allocation30_spill] sm:$0xff] %v4771_v48  ;;  %v4803_v3 = vsel %vm27_vm2, %v875_v49, -1e+09 }
 0x110   :  { %v4736_v33 = vpop.xlane.xlu2 %218  ;;  %6846 = vst [vmem:[#allocation34_spill] sm:$0xff] %v4803_v3 }
 0x111   :  { %v229_v11 = vsub.f32 %v4437_v19, %v4736_v33  ;;  %v230_v33 = vsub.f32 %v4431_v18, %v4763_v35 }
 0x114   :  { %1532 = vmax.xlane.f32.xlu0 %v4747_v59  ;;  %v530_v63 = vpop.f32.mrf.mxu0 }
 0x115   :  { %1596 = vmax.xlane.f32.xlu2 %v4751_v7  ;;  %1564 = vmax.xlane.f32.xlu1 %v4755_v23  ;;  %v4775_v7 = vsel %vm27_vm2, %v527_v6, -1e+09  ;;  %v3421_v6 = vld [vmem:[%s6645_s2 + $0x158] sm:$0xff]  ;;  %v4799_v34 = vsel %vm27_vm2, %v530_v63, -1e+09  ;;  %v646_v49 = vpop.f32.mrf.mxu1 }
 0x116   :  { %3293 = vmatmul.msk.bf16.gmra.mxu1 %vm44_vm1, %v3421_v6 }
 0x118   :  { %v4765_v15 = vpop.xlane.xlu2 %1512  ;;  %v4767_v27 = vpop.xlane.xlu1 %1480 }
 0x11c   :  { %1502 = vmax.xlane.f32.xlu0 %v4775_v7 }
 0x11d   :  { %1566 = vmax.xlane.f32.xlu2 %v4780_v60  ;;  %1534 = vmax.xlane.f32.xlu1 %v4771_v48  ;;  %v238_v60 = vmul.f32 1.442695, %v227_v44 }
 0x11f   :  { %v4790_v23 = vpop.xlane.xlu0 %1544  ;;  %3565 = vpow2.f32 %v238_v60  ;;  %v3430_v60 = vld [vmem:[%s6645_s2 + $0x1a0] sm:$0xff] }
 0x120   :  { %6844 = vst [vmem:[#allocation32_spill] sm:$0xff] %v4790_v23  ;;  %v4792_v5 = vpop.xlane.xlu2 %1482  ;;  %v4794_v51 = vpop.xlane.xlu1 %1576  ;;  %3334 = vmatmul.msk.bf16.gmra.mxu2 %vm44_vm1, %v3430_v60 }
 0x121   :  { %6845 = vst [vmem:[#allocation33_spill] sm:$0xff] %v4794_v51  ;;  %v764_v60 = vpop.f32.mrf.mxu2  ;;  %v242_v51 = vmul.f32 1.442695, %v229_v11 }
 0x124   :  { %1598 = vmax.xlane.f32.xlu0 %v4803_v3  ;;  %v4820_v3 = vsel %vm27_vm2, %v646_v49, -1e+09  ;;  %v878_v49 = vpop.f32.mrf.mxu3 }
 0x125   :  { %1504 = vmax.xlane.f32.xlu1 %v4799_v34  ;;  %248 = vadd.xlane.f32.xlu2 %v4805_v32  ;;  %6849 = vst [vmem:[#allocation37_spill] sm:$0xff] %v4820_v3  ;;  %v4855_v0 = vsel %vm27_vm2, %v878_v49, -1e+09  ;;  %v4859_v56 = vpop.eup %3565  ;;  %v648_v49 = vpop.f32.mrf.mxu1 }
 0x126   :  { %3294 = vmatmul.msk.bf16.gmra.mxu1 %vm44_vm1, %v3422_v26  ;;  %6852 = vst [vmem:[#allocation40_spill] sm:$0xff] %v4855_v0  ;;  %v228_v26 = vsub.f32 %v4422_v12, %v4714_v58  ;;  %v4876_v12 = vsel %vm27_vm2, %v764_v60, -1e+09  ;;  %v4880_v58 = vsel %vm27_vm2, %v648_v49, -1e+09 }
 0x127   :  { %v4812_v13 = vpop.xlane.xlu0 %1514  ;;  %6854 = vst [vmem:[#allocation42_spill] sm:$0xff] %v4876_v12 }
 0x128   :  { %v4814_v63 = vpop.xlane.xlu2 %1578  ;;  %v4816_v6 = vpop.xlane.xlu1 %1546  ;;  %v240_v37 = vmul.f32 1.442695, %v228_v26  ;;  %6855 = vst [vmem:[#allocation43_spill] sm:$0xff] %v4880_v58 }
 0x129   :  { %6847 = vst [vmem:[#allocation35_spill] sm:$0xff] %v4814_v63 }
 0x12a   :  { %6848 = vst [vmem:[#allocation36_spill] sm:$0xff] %v4816_v6  ;;  %3567 = vpow2.f32 %v240_v37  ;;  %v244_v37 = vmul.f32 1.442695, %v230_v33 }
 0x12b   :  { %3569 = vpow2.f32 %v242_v51  ;;  %v231_v51 = vsub.f32 %v4427_v17, %v4734_v31 }
 0x12c   :  { %250 = vadd.xlane.f32.xlu0 %v4822_v4  ;;  %v880_v60 = vpop.f32.mrf.mxu3  ;;  %3571 = vpow2.f32 %v244_v37  ;;  %v767_v37 = vpop.f32.mrf.mxu2 }
 0x12d   :  { %252 = vadd.xlane.f32.xlu1 %v4824_v50  ;;  %1536 = vmax.xlane.f32.xlu2 %v4820_v3  ;;  %v4908_v18 = vsel %vm27_vm2, %v880_v60, -1e+09  ;;  %v246_v22 = vmul.f32 1.442695, %v231_v51  ;;  %v3415_v51 = vld [vmem:[%s6645_s2 + $0x128] sm:$0xff] }
 0x12e   :  { %6858 = vst [vmem:[#allocation46_spill] sm:$0xff] %v4908_v18  ;;  %3255 = vmatmul.msk.bf16.gmra.mxu0 %vm44_vm1, %v3415_v51  ;;  %v4956_v47 = vsel %vm27_vm2, %v767_v37, -1e+09 }
 0x12f   :  { %v4835_v44 = vpop.xlane.xlu0 %1484  ;;  %3573 = vpow2.f32 %v246_v22  ;;  %v3439_v22 = vld [vmem:[%s6645_s2 + $0x1e8] sm:$0xff]  ;;  %6863 = vst [vmem:[#allocation51_spill] sm:$0xff] %v4956_v47 }
 0x130   :  { %v4837_v43 = vpop.xlane.xlu2 %1548  ;;  %v4839_v29 = vpop.xlane.xlu1 %1516  ;;  %3375 = vmatmul.msk.bf16.gmra.mxu3 %vm44_vm1, %v3439_v22 }
 0x131   :  { %6850 = vst [vmem:[#allocation38_spill] sm:$0xff] %v4837_v43 }
 0x134   :  { %1568 = vmax.xlane.f32.xlu0 %v4851_v10  ;;  %v532_v10 = vpop.f32.mrf.mxu0  ;;  %v769_v51 = vpop.f32.mrf.mxu2 }
 0x135   :  { %1600 = vmax.xlane.f32.xlu1 %v4855_v0  ;;  %254 = vadd.xlane.f32.xlu2 %v4859_v56  ;;  %v4885_v19 = vsel %vm27_vm2, %v532_v10, -1e+09  ;;  %v3431_v10 = vld [vmem:[%s6645_s2 + $0x1a8] sm:$0xff] }
 0x136   :  { %3335 = vmatmul.msk.bf16.gmra.mxu2 %vm44_vm1, %v3431_v10  ;;  %v651_v10 = vpop.f32.mrf.mxu1 }
 0x137   :  { %v4868_v46 = vpop.xlane.xlu0 %1580  ;;  %v4926_v17 = vsel %vm27_vm2, %v651_v10, -1e+09 }
 0x138   :  { %6853 = vst [vmem:[#allocation41_spill] sm:$0xff] %v4868_v46  ;;  %v4870_v63 = vpop.xlane.xlu2 %1518  ;;  %v4872_v21 = vpop.xlane.xlu1 %1486 }
 0x139   :  { %6861 = vst [vmem:[#allocation49_spill] sm:$0xff] %v4926_v17 }
 0x13c   :  { %1538 = vmax.xlane.f32.xlu0 %v4880_v58  ;;  %v535_v35 = vpop.f32.mrf.mxu0 }
 0x13d   :  { %1570 = vmax.xlane.f32.xlu1 %v4876_v12  ;;  %1506 = vmax.xlane.f32.xlu2 %v4885_v19  ;;  %v4901_v12 = vpop.eup %3567  ;;  %v4922_v60 = vsel %vm27_vm2, %v535_v35, -1e+09  ;;  %v3423_v35 = vld [vmem:[%s6645_s2 + $0x168] sm:$0xff] }
 0x13e   :  { %v4903_v0 = vpop.eup %3569  ;;  %3295 = vmatmul.msk.bf16.gmra.mxu1 %vm44_vm1, %v3423_v35  ;;  %v653_v37 = vpop.f32.mrf.mxu1 }
 0x13f   :  { %v4891_v26 = vpop.xlane.xlu0 %1550  ;;  %v4928_v31 = vpop.eup %3571 }
 0x140   :  { %6856 = vst [vmem:[#allocation44_spill] sm:$0xff] %v4891_v26  ;;  %v4893_v11 = vpop.xlane.xlu2 %1488  ;;  %v4895_v49 = vpop.xlane.xlu1 %1582 }
 0x141   :  { %6857 = vst [vmem:[#allocation45_spill] sm:$0xff] %v4895_v49 }
 0x144   :  { %256 = vadd.xlane.f32.xlu0 %v4901_v12 }
 0x145   :  { %258 = vadd.xlane.f32.xlu1 %v4903_v0  ;;  %1602 = vmax.xlane.f32.xlu2 %v4908_v18  ;;  %v883_v18 = vpop.f32.mrf.mxu3 }
 0x146   :  { %v4972_v22 = vsel %vm27_vm2, %v883_v18, -1e+09  ;;  %v1737_v18 = vsub.f32 %v4480_v39, %v4792_v5  ;;  %v3440_v39 = vld [vmem:[%s6645_s2 + $0x1f0] sm:$0xff] }
 0x147   :  { %v4914_v33 = vpop.xlane.xlu0 %1520  ;;  %6865 = vst [vmem:[#allocation53_spill] sm:$0xff] %v4972_v22  ;;  %3376 = vmatmul.msk.bf16.gmra.mxu3 %vm44_vm1, %v3440_v39 }
 0x148   :  { %v4916_v49 = vpop.xlane.xlu2 %1584  ;;  %v4918_v46 = vpop.xlane.xlu1 %1552 }
 0x149   :  { %6859 = vst [vmem:[#allocation47_spill] sm:$0xff] %v4916_v49  ;;  %v537_v49 = vpop.f32.mrf.mxu0 }
 0x14a   :  { %6860 = vst [vmem:[#allocation48_spill] sm:$0xff] %v4918_v46  ;;  %v4952_v26 = vsel %vm27_vm2, %v537_v49, -1e+09 }
 0x14c   :  { %1508 = vmax.xlane.f32.xlu0 %v4922_v60 }
 0x14d   :  { %1540 = vmax.xlane.f32.xlu1 %v4926_v17  ;;  %260 = vadd.xlane.f32.xlu2 %v4928_v31  ;;  %v885_v6 = vpop.f32.mrf.mxu3 }
 0x14e   :  { %v4976_v43 = vsel %vm27_vm2, %v885_v6, -1e+09  ;;  %v3416_v6 = vld [vmem:[%s6645_s2 + $0x130] sm:$0xff] }
 0x14f   :  { %v4939_v10 = vpop.xlane.xlu0 %1490  ;;  %6866 = vst [vmem:[#allocation54_spill] sm:$0xff] %v4976_v43  ;;  %3256 = vmatmul.msk.bf16.gmra.mxu0 %vm44_vm1, %v3416_v6  ;;  %v5017_v6 = vsel %vm27_vm2, %v769_v51, -1e+09 }
 0x150   :  { %v4941_v46 = vpop.xlane.xlu2 %1554  ;;  %v4943_v9 = vpop.xlane.xlu1 %1522  ;;  %6872 = vst [vmem:[#allocation60_spill] sm:$0xff] %v5017_v6 }
 0x151   :  { %6862 = vst [vmem:[#allocation50_spill] sm:$0xff] %v4941_v46  ;;  %v4959_v46 = vpop.eup %3573  ;;  %v964_v5 = vpop.f32.mrf.mxu0 }
 0x154   :  { %262 = vadd.xlane.f32.xlu0 %v4959_v46 }
 0x155   :  { %1510 = vmax.xlane.f32.xlu1 %v4952_v26  ;;  %1572 = vmax.xlane.f32.xlu2 %v4956_v47  ;;  %v4981_v47 = vsel %vm27_vm2, %v653_v37, -1e+09  ;;  %v1312_v51 = vpop.f32.mrf.mxu3 }
 0x156   :  { %6867 = vst [vmem:[#allocation55_spill] sm:$0xff] %v4981_v47 }
 0x157   :  { %v4964_v35 = vpop.xlane.xlu0 %1586 }
 0x158   :  { %6864 = vst [vmem:[#allocation52_spill] sm:$0xff] %v4964_v35  ;;  %v4966_v49 = vpop.xlane.xlu2 %1524  ;;  %v4968_v55 = vpop.xlane.xlu1 %1492  ;;  %v1736_v35 = vsub.f32 %v4446_v25, %v4767_v27  ;;  %v3432_v25 = vld [vmem:[%s6645_s2 + $0x1b0] sm:$0xff] }
 0x159   :  { %3336 = vmatmul.msk.bf16.gmra.mxu2 %vm44_vm1, %v3432_v25 }
 0x15a   :  { %v1864_v27 = vmul.f32 1.442695, %v1736_v35  ;;  %v1080_v35 = vpop.f32.mrf.mxu1 }
 0x15b   :  { %v5053_v23 = vsel %vm27_vm2, %v1080_v35, -1e+09  ;;  %v3425_v35 = vld [vmem:[%s6645_s2 + $0x178] sm:$0xff] }
 0x15c   :  { %1604 = vmax.xlane.f32.xlu0 %v4972_v22  ;;  %v1196_v22 = vpop.f32.mrf.mxu2  ;;  %3575 = vpow2.f32 %v1864_v27  ;;  %v5034_v27 = vsel %vm27_vm2, %v1312_v51, -1e+09  ;;  %6879 = vst [vmem:[#allocation67_spill] sm:$0xff] %v5053_v23 }
 0x15d   :  { %1606 = vmax.xlane.f32.xlu1 %v4976_v43  ;;  %1542 = vmax.xlane.f32.xlu2 %v4981_v47  ;;  %v1866_v43 = vmul.f32 1.442695, %v1737_v18  ;;  %6875 = vst [vmem:[#allocation63_spill] sm:$0xff] %v5034_v27 }
 0x15f   :  { %v4992_v17 = vpop.xlane.xlu0 %1556  ;;  %3577 = vpow2.f32 %v1866_v43 }
 0x160   :  { %6868 = vst [vmem:[#allocation56_spill] sm:$0xff] %v4992_v17  ;;  %v4994_v36 = vpop.xlane.xlu2 %1494  ;;  %v4996_v37 = vpop.xlane.xlu1 %1588  ;;  %v5007_v17 = vsel %vm27_vm2, %v1196_v22, -1e+09  ;;  %v3424_v22 = vld [vmem:[%s6645_s2 + $0x170] sm:$0xff] }
 0x161   :  { %6869 = vst [vmem:[#allocation57_spill] sm:$0xff] %v4996_v37  ;;  %v5011_v37 = vsel %vm27_vm2, %v964_v5, -1e+09  ;;  %3296 = vmatmul.msk.bf16.gmra.mxu1 %vm44_vm1, %v3424_v22 }
 0x162   :  { %6870 = vst [vmem:[#allocation58_spill] sm:$0xff] %v5007_v17  ;;  %v5036_v5 = vpop.eup %3575 }
 0x163   :  { %6871 = vst [vmem:[#allocation59_spill] sm:$0xff] %v5011_v37 }
 0x164   :  { %1574 = vmax.xlane.f32.xlu0 %v5017_v6  ;;  %6876 = vst [vmem:[#allocation64_spill] sm:$0xff] %v5036_v5  ;;  %v1738_v6 = vsub.f32 %v4514_v52, %v4835_v44  ;;  %v1314_v44 = vpop.f32.mrf.mxu3 }
 0x165   :  { %1672 = vmax.xlane.f32.xlu1 %v5007_v17  ;;  %1608 = vmax.xlane.f32.xlu2 %v5011_v37  ;;  %v5038_v43 = vpop.eup %3577  ;;  %v1198_v37 = vpop.f32.mrf.mxu2 }
 0x166   :  { %6877 = vst [vmem:[#allocation65_spill] sm:$0xff] %v5038_v43  ;;  %v5062_v52 = vsel %vm27_vm2, %v1198_v37, -1e+09 }
 0x167   :  { %v5025_v18 = vpop.xlane.xlu0 %1526  ;;  %6881 = vst [vmem:[#allocation69_spill] sm:$0xff] %v5062_v52 }
 0x168   :  { %v5027_v25 = vpop.xlane.xlu2 %1590  ;;  %v5029_v39 = vpop.xlane.xlu1 %1558 }
 0x169   :  { %6873 = vst [vmem:[#allocation61_spill] sm:$0xff] %v5027_v25  ;;  %v1082_v25 = vpop.f32.mrf.mxu1 }
 0x16a   :  { %6874 = vst [vmem:[#allocation62_spill] sm:$0xff] %v5029_v39  ;;  %v966_v39 = vpop.f32.mrf.mxu0 }
 0x16c   :  { %2120 = vadd.xlane.f32.xlu0 %v5036_v5  ;;  %v1868_v5 = vmul.f32 1.442695, %v1738_v6  ;;  %v3417_v6 = vld [vmem:[%s6645_s2 + $0x138] sm:$0xff] }
 0x16d   :  { %2122 = vadd.xlane.f32.xlu1 %v5038_v43  ;;  %1704 = vmax.xlane.f32.xlu2 %v5034_v27  ;;  %v5057_v43 = vsel %vm27_vm2, %v1082_v25, -1e+09 }
 0x16e   :  { %6880 = vst [vmem:[#allocation68_spill] sm:$0xff] %v5057_v43  ;;  %3579 = vpow2.f32 %v1868_v5  ;;  %3257 = vmatmul.msk.bf16.gmra.mxu0 %vm44_vm1, %v3417_v6  ;;  %v3441_v5 = vld [vmem:[%s6645_s2 + $0x1f8] sm:$0xff]  ;;  %v1201_v6 = vpop.f32.mrf.mxu2 }
 0x16f   :  { %v5045_v22 = vpop.xlane.xlu0 %1496  ;;  %3377 = vmatmul.msk.bf16.gmra.mxu3 %vm44_vm1, %v3441_v5  ;;  %v1317_v5 = vpop.f32.mrf.mxu3 }
 0x170   :  { %v5047_v17 = vpop.xlane.xlu2 %1560  ;;  %v5049_v51 = vpop.xlane.xlu1 %1528 }
 0x171   :  { %6878 = vst [vmem:[#allocation66_spill] sm:$0xff] %v5047_v17  ;;  %3297 = vmatmul.msk.bf16.gmra.mxu1 %vm44_vm1, %v3425_v35  ;;  %v1085_v47 = vpop.f32.mrf.mxu1 }
 0x172   :  { %v969_v17 = vpop.f32.mrf.mxu0 }
 0x174   :  { %1640 = vmax.xlane.f32.xlu0 %v5053_v23 }
 0x175   :  { %1642 = vmax.xlane.f32.xlu1 %v5057_v43  ;;  %1674 = vmax.xlane.f32.xlu2 %v5062_v52  ;;  %v5085_v52 = vsel %vm27_vm2, %v969_v17, -1e+09  ;;  %v5092_v43 = vpop.eup %3579  ;;  %v3433_v17 = vld [vmem:[%s6645_s2 + $0x1b8] sm:$0xff] }
 0x176   :  { %6883 = vst [vmem:[#allocation71_spill] sm:$0xff] %v5085_v52  ;;  %3337 = vmatmul.msk.bf16.gmra.mxu2 %vm44_vm1, %v3433_v17  ;;  %v1740_v17 = vsub.f32 %v4556_v8, %v4893_v11 }
 0x177   :  { %v5072_v25 = vpop.xlane.xlu0 %1592  ;;  %6885 = vst [vmem:[#allocation73_spill] sm:$0xff] %v5092_v43 }
 0x178   :  { %6882 = vst [vmem:[#allocation70_spill] sm:$0xff] %v5072_v25  ;;  %v5074_v27 = vpop.xlane.xlu2 %1530  ;;  %v5076_v37 = vpop.xlane.xlu1 %1498  ;;  %v5090_v25 = vsel %vm27_vm2, %v966_v39, -1e+09 }
 0x179   :  { %6884 = vst [vmem:[#allocation72_spill] sm:$0xff] %v5090_v25  ;;  %v1087_v11 = vpop.f32.mrf.mxu1 }
 0x17a   :  { %v971_v48 = vpop.f32.mrf.mxu0 }
 0x17b   :  { %v5143_v8 = vsel %vm27_vm2, %v971_v48, -1e+09 }
 0x17c   :  { %1610 = vmax.xlane.f32.xlu0 %v5090_v25  ;;  %v5117_v25 = vsel %vm27_vm2, %v1314_v44, -1e+09  ;;  %6895 = vst [vmem:[#allocation83_spill] sm:$0xff] %v5143_v8 }
 0x17d   :  { %1612 = vmax.xlane.f32.xlu1 %v5085_v52  ;;  %2124 = vadd.xlane.f32.xlu2 %v5092_v43  ;;  %v5109_v52 = vsel %vm27_vm2, %v1317_v5, -1e+09  ;;  %v5113_v43 = vsel %vm27_vm2, %v1085_v47, -1e+09  ;;  %6890 = vst [vmem:[#allocation78_spill] sm:$0xff] %v5117_v25  ;;  %v1203_v47 = vpop.f32.mrf.mxu2 }
 0x17e   :  { %6888 = vst [vmem:[#allocation76_spill] sm:$0xff] %v5109_v52 }
 0x17f   :  { %v5100_v35 = vpop.xlane.xlu0 %1562  ;;  %6889 = vst [vmem:[#allocation77_spill] sm:$0xff] %v5113_v43 }
 0x180   :  { %6886 = vst [vmem:[#allocation74_spill] sm:$0xff] %v5100_v35  ;;  %v5102_v23 = vpop.xlane.xlu2 %1500  ;;  %v5104_v39 = vpop.xlane.xlu1 %1594 }
 0x181   :  { %6887 = vst [vmem:[#allocation75_spill] sm:$0xff] %v5104_v39  ;;  %v1739_v39 = vsub.f32 %v4550_v2, %v4872_v21  ;;  %v1872_v2 = vmul.f32 1.442695, %v1740_v17  ;;  %v5138_v21 = vsel %vm27_vm2, %v1203_v47, -1e+09  ;;  %v1319_v47 = vpop.f32.mrf.mxu3 }
 0x182   :  { %6894 = vst [vmem:[#allocation82_spill] sm:$0xff] %v5138_v21  ;;  %v5160_v48 = vsel %vm27_vm2, %v1319_v47, -1e+09 }
 0x183   :  { %v1870_v44 = vmul.f32 1.442695, %v1739_v39  ;;  %6900 = vst [vmem:[#allocation88_spill] sm:$0xff] %v5160_v48 }
 0x184   :  { %1706 = vmax.xlane.f32.xlu0 %v5117_v25  ;;  %v5134_v25 = vsel %vm27_vm2, %v1201_v6, -1e+09 }
 0x185   :  { %1708 = vmax.xlane.f32.xlu1 %v5109_v52  ;;  %1644 = vmax.xlane.f32.xlu2 %v5113_v43  ;;  %6893 = vst [vmem:[#allocation81_spill] sm:$0xff] %v5134_v25  ;;  %3581 = vpow2.f32 %v1870_v44  ;;  %v974_v44 = vpop.f32.mrf.mxu0 }
 0x186   :  { %3583 = vpow2.f32 %v1872_v2  ;;  %v1741_v2 = vsub.f32 %v4590_v28, %v4939_v10 }
 0x187   :  { %v5126_v5 = vpop.xlane.xlu0 %1532 }
 0x188   :  { %v5128_v35 = vpop.xlane.xlu2 %1596  ;;  %v5130_v58 = vpop.xlane.xlu1 %1564 }
 0x189   :  { %6891 = vst [vmem:[#allocation79_spill] sm:$0xff] %v5128_v35  ;;  %v1322_v28 = vpop.f32.mrf.mxu3 }
 0x18a   :  { %6892 = vst [vmem:[#allocation80_spill] sm:$0xff] %v5130_v58 }
 0x18b   :  { %v5153_v35 = vpop.eup %3581 }
 0x18c   :  { %1676 = vmax.xlane.f32.xlu0 %v5134_v25  ;;  %6898 = vst [vmem:[#allocation86_spill] sm:$0xff] %v5153_v35  ;;  %v5155_v58 = vpop.eup %3583  ;;  %v1206_v25 = vpop.f32.mrf.mxu2 }
 0x18d   :  { %1678 = vmax.xlane.f32.xlu1 %v5138_v21  ;;  %1614 = vmax.xlane.f32.xlu2 %v5143_v8  ;;  %6899 = vst [vmem:[#allocation87_spill] sm:$0xff] %v5155_v58  ;;  %v1090_v21 = vpop.f32.mrf.mxu1 }
 0x18e   :  { %v5172_v47 = vsel %vm27_vm2, %v1090_v21, -1e+09 }
 0x18f   :  { %v5147_v6 = vpop.xlane.xlu0 %1502  ;;  %6902 = vst [vmem:[#allocation90_spill] sm:$0xff] %v5172_v47 }
 0x190   :  { %v5149_v39 = vpop.xlane.xlu2 %1566  ;;  %v5151_v17 = vpop.xlane.xlu1 %1534 }
 0x191   :  { %6896 = vst [vmem:[#allocation84_spill] sm:$0xff] %v5149_v39 }
 0x192   :  { %6897 = vst [vmem:[#allocation85_spill] sm:$0xff] %v5151_v17 }
 0x194   :  { %2126 = vadd.xlane.f32.xlu0 %v5153_v35  ;;  %v1874_v35 = vmul.f32 1.442695, %v1741_v2  ;;  %v976_v2 = vpop.f32.mrf.mxu0 }
 0x195   :  { %2128 = vadd.xlane.f32.xlu1 %v5155_v58  ;;  %1710 = vmax.xlane.f32.xlu2 %v5160_v48  ;;  %v5176_v58 = vsel %vm27_vm2, %v1206_v25, -1e+09  ;;  %v5180_v48 = vsel %vm27_vm2, %v1087_v11, -1e+09  ;;  %v5189_v25 = vsel %vm27_vm2, %v974_v44, -1e+09  ;;  %v1324_v44 = vpop.f32.mrf.mxu3  ;;  %v1092_v17 = vpop.f32.mrf.mxu1 }
 0x196   :  { %6903 = vst [vmem:[#allocation91_spill] sm:$0xff] %v5176_v58  ;;  %3585 = vpow2.f32 %v1874_v35  ;;  %v5193_v11 = vsel %vm27_vm2, %v976_v2, -1e+09 }
 0x197   :  { %v5166_v39 = vpop.xlane.xlu0 %1598  ;;  %6904 = vst [vmem:[#allocation92_spill] sm:$0xff] %v5180_v48 }
 0x198   :  { %6901 = vst [vmem:[#allocation89_spill] sm:$0xff] %v5166_v39  ;;  %v5168_v52 = vpop.xlane.xlu1 %1504  ;;  %v249_v8 = vpop.xlane.xlu2 %248 }
 0x199   :  { %6905 = vst [vmem:[#allocation93_spill] sm:$0xff] %v5189_v25 }
 0x19a   :  { %6906 = vst [vmem:[#allocation94_spill] sm:$0xff] %v5193_v11 }
 0x19c   :  { %1646 = vmax.xlane.f32.xlu0 %v5180_v48 }
 0x19d   :  { %1648 = vmax.xlane.f32.xlu1 %v5172_v47  ;;  %1680 = vmax.xlane.f32.xlu2 %v5176_v58  ;;  %v5195_v47 = vpop.eup %3585 }
 0x19e   :  { %6907 = vst [vmem:[#allocation95_spill] sm:$0xff] %v5195_v47 }
 0x19f   :  { %v251_v10 = vpop.xlane.xlu0 %250 }
 0x1a0   :  { %3587 = vrcp.f32 %v251_v10  ;;  %v253_v21 = vpop.xlane.xlu1 %252  ;;  %v5185_v39 = vpop.xlane.xlu2 %1536 }
 0x1a1   :  { %3589 = vrcp.f32 %v249_v8  ;;  %v1208_v10 = vpop.f32.mrf.mxu2 }
 0x1a2   :  { %3591 = vrcp.f32 %v253_v21 }
 0x1a4   :  { %1616 = vmax.xlane.f32.xlu0 %v5189_v25  ;;  %v5207_v25 = vsel %vm27_vm2, %v1322_v28, -1e+09 }
 0x1a5   :  { %1618 = vmax.xlane.f32.xlu1 %v5193_v11  ;;  %2130 = vadd.xlane.f32.xlu2 %v5195_v47  ;;  %6910 = vst [vmem:[#allocation98_spill] sm:$0xff] %v5207_v25  ;;  %v5212_v11 = vsel %vm27_vm2, %v1324_v44, -1e+09 }
 0x1a6   :  { %v3588_v35 = vpop.eup %3587  ;;  %6911 = vst [vmem:[#allocation99_spill] sm:$0xff] %v5212_v11 }
 0x1a7   :  { %v3590_v8 = vpop.eup %3589  ;;  %v5200_v58 = vpop.xlane.xlu0 %1568  ;;  %v273_v48 = vmul.f32 %v3588_v35, %v4822_v4  ;;  %v5218_v4 = vsel %vm27_vm2, %v1092_v17, -1e+09  ;;  %v1742_v35 = vsub.f32 %v4625_v42, %v4968_v55 }
 0x1a8   :  { %6908 = vst [vmem:[#allocation96_spill] sm:$0xff] %v5200_v58  ;;  %v5203_v43 = vpop.xlane.xlu1 %1600  ;;  %v255_v2 = vpop.xlane.xlu2 %254  ;;  %v272_v47 = vmul.f32 %v3590_v8, %v4805_v32  ;;  %v1743_v32 = vsub.f32 %v4645_v53, %v4994_v36  ;;  %v5243_v53 = vsel %vm27_vm2, %v1208_v10, -1e+09 }
 0x1a9   :  { %6909 = vst [vmem:[#allocation97_spill] sm:$0xff] %v5203_v43  ;;  %v3592_v21 = vpop.eup %3591  ;;  %3593 = vrcp.f32 %v255_v2  ;;  %v1876_v2 = vmul.f32 1.442695, %v1742_v35  ;;  %v979_v55 = vpop.f32.mrf.mxu0 }
 0x1aa   :  { %v280_v58 = vadd.f32 %v273_v48, %v272_v47  ;;  %v274_v3 = vmul.f32 %v3592_v21, %v4824_v50  ;;  %6912 = vst [vmem:[#allocation100_spill] sm:$0xff] %v5218_v4  ;;  %v1211_v50 = vpop.f32.mrf.mxu2  ;;  %v1878_v42 = vmul.f32 1.442695, %v1743_v32  ;;  %v5239_v36 = vsel %vm27_vm2, %v979_v55, -1e+09 }
 0x1ab   :  { %v5235_v43 = vsel %vm27_vm2, %v1211_v50, -1e+09  ;;  %6915 = vst [vmem:[#allocation103_spill] sm:$0xff] %v5239_v36  ;;  %3595 = vpow2.f32 %v1876_v2 }
 0x1ac   :  { %1712 = vmax.xlane.f32.xlu0 %v5207_v25  ;;  %v281_v47 = vadd.f32 %v280_v58, %v274_v3  ;;  %6914 = vst [vmem:[#allocation102_spill] sm:$0xff] %v5235_v43  ;;  %3597 = vpow2.f32 %v1878_v42 }
 0x1ad   :  { %1714 = vmax.xlane.f32.xlu1 %v5212_v11  ;;  %1650 = vmax.xlane.f32.xlu2 %v5218_v4  ;;  %6916 = vst [vmem:[#allocation104_spill] sm:$0xff] %v5243_v53 }
 0x1af   :  { %v3594_v28 = vpop.eup %3593  ;;  %v5226_v48 = vpop.xlane.xlu0 %1538 }
 0x1b0   :  { %v275_v8 = vmul.f32 %v3594_v28, %v4859_v56  ;;  %v5229_v44 = vpop.xlane.xlu1 %1570  ;;  %v5231_v17 = vpop.xlane.xlu2 %1506 }
 0x1b1   :  { %6913 = vst [vmem:[#allocation101_spill] sm:$0xff] %v5229_v44  ;;  %v1095_v56 = vpop.f32.mrf.mxu1  ;;  %v1327_v28 = vpop.f32.mrf.mxu3 }
 0x1b2   :  { %v282_v21 = vadd.f32 %v281_v47, %v275_v8  ;;  %v5252_v10 = vsel %vm27_vm2, %v1327_v28, -1e+09  ;;  %v5254_v50 = vpop.eup %3595  ;;  %v1744_v8 = vsub.f32 %v4670_v14, %v5045_v22  ;;  %v981_v2 = vpop.f32.mrf.mxu0 }
 0x1b3   :  { %6918 = vst [vmem:[#allocation106_spill] sm:$0xff] %v5252_v10  ;;  %v5256_v47 = vpop.eup %3597  ;;  %v1213_v28 = vpop.f32.mrf.mxu2 }
 0x1b4   :  { %v286_v3 = vmul.f32 0.25, %v282_v21  ;;  %1682 = vmax.xlane.f32.xlu0 %v5243_v53  ;;  %6919 = vst [vmem:[#allocation107_spill] sm:$0xff] %v5254_v50  ;;  %v5278_v14 = vsel %vm27_vm2, %v1213_v28, -1e+09 }
 0x1b5   :  { %1684 = vmax.xlane.f32.xlu1 %v5235_v43  ;;  %1620 = vmax.xlane.f32.xlu2 %v5239_v36  ;;  %6920 = vst [vmem:[#allocation108_spill] sm:$0xff] %v5256_v47 }
 0x1b6   :  { %3012 = vst [vmem:[#allocation4] sm:$0xff] %v286_v3 }
 0x1b7   :  { %v257_v58 = vpop.xlane.xlu0 %256  ;;  %6923 = vst [vmem:[#allocation111_spill] sm:$0xff] %v5278_v14 }
 0x1b8   :  { %v259_v35 = vpop.xlane.xlu1 %258  ;;  %v5248_v32 = vpop.xlane.xlu2 %1602 }
 0x1b9   :  { %6917 = vst [vmem:[#allocation105_spill] sm:$0xff] %v5248_v32  ;;  %v1097_v42 = vpop.f32.mrf.mxu1  ;;  %3599 = vrcp.f32 %v259_v35 }
 0x1ba   :  { %3601 = vrcp.f32 %v257_v58  ;;  %v5273_v32 = vsel %vm27_vm2, %v1097_v42, -1e+09 }
 0x1bb   :  { %6922 = vst [vmem:[#allocation110_spill] sm:$0xff] %v5273_v32 }
 0x1bc   :  { %2132 = vadd.xlane.f32.xlu0 %v5254_v50  ;;  %v5269_v50 = vsel %vm27_vm2, %v1095_v56, -1e+09  ;;  %v1329_v56 = vpop.f32.mrf.mxu3 }
 0x1bd   :  { %2134 = vadd.xlane.f32.xlu1 %v5256_v47  ;;  %1716 = vmax.xlane.f32.xlu2 %v5252_v10  ;;  %6921 = vst [vmem:[#allocation109_spill] sm:$0xff] %v5269_v50  ;;  %v1880_v47 = vmul.f32 1.442695, %v1744_v8  ;;  %v984_v8 = vpop.f32.mrf.mxu0 }
 0x1be   :  { %v5289_v28 = vsel %vm27_vm2, %v984_v8, -1e+09 }
 0x1bf   :  { %v5263_v55 = vpop.xlane.xlu0 %1508  ;;  %v3600_v22 = vpop.eup %3599  ;;  %6925 = vst [vmem:[#allocation113_spill] sm:$0xff] %v5289_v28 }
 0x1c0   :  { %v5265_v21 = vpop.xlane.xlu1 %1540  ;;  %v261_v3 = vpop.xlane.xlu2 %260  ;;  %v277_v10 = vmul.f32 %v3600_v22, %v4903_v0 }
 0x1c1   :  { %3603 = vrcp.f32 %v261_v3  ;;  %v3602_v58 = vpop.eup %3601  ;;  %v1216_v0 = vpop.f32.mrf.mxu2 }
 0x1c2   :  { %3605 = vpow2.f32 %v1880_v47  ;;  %v1100_v11 = vpop.f32.mrf.mxu1 }
 0x1c4   :  { %1652 = vmax.xlane.f32.xlu0 %v5269_v50 }
 0x1c5   :  { %1654 = vmax.xlane.f32.xlu1 %v5273_v32  ;;  %1686 = vmax.xlane.f32.xlu2 %v5278_v14  ;;  %v276_v14 = vmul.f32 %v3602_v58, %v4901_v12  ;;  %v5295_v32 = vsel %vm27_vm2, %v981_v2, -1e+09 }
 0x1c6   :  { %6926 = vst [vmem:[#allocation114_spill] sm:$0xff] %v5295_v32 }
 0x1c7   :  { %v263_v35 = vpop.xlane.xlu0 %262  ;;  %v3604_v3 = vpop.eup %3603 }
 0x1c8   :  { %3607 = vrcp.f32 %v263_v35  ;;  %v5282_v42 = vpop.xlane.xlu1 %1510  ;;  %v5284_v44 = vpop.xlane.xlu2 %1572  ;;  %v278_v47 = vmul.f32 %v3604_v3, %v4928_v31  ;;  %v283_v35 = vadd.f32 %v277_v10, %v276_v14  ;;  %v5315_v14 = vsel %vm27_vm2, %v1100_v11, -1e+09 }
 0x1c9   :  { %6924 = vst [vmem:[#allocation112_spill] sm:$0xff] %v5284_v44  ;;  %v5297_v43 = vpop.eup %3605  ;;  %v1332_v31 = vpop.f32.mrf.mxu3 }
 0x1ca   :  { %6927 = vst [vmem:[#allocation115_spill] sm:$0xff] %v5297_v43  ;;  %v284_v8 = vadd.f32 %v283_v35, %v278_v47  ;;  %v5311_v10 = vsel %vm27_vm2, %v1332_v31, -1e+09  ;;  %v1745_v35 = vsub.f32 %v4708_v40, %v5076_v37  ;;  %v986_v31 = vpop.f32.mrf.mxu0  ;;  %v5336_v40 = vsel %vm27_vm2, %v1216_v0, -1e+09 }
 0x1cb   :  { %6930 = vst [vmem:[#allocation118_spill] sm:$0xff] %v5311_v10 }
 0x1cc   :  { %1622 = vmax.xlane.f32.xlu0 %v5295_v32  ;;  %6931 = vst [vmem:[#allocation119_spill] sm:$0xff] %v5315_v14 }
 0x1cd   :  { %1624 = vmax.xlane.f32.xlu1 %v5289_v28  ;;  %2136 = vadd.xlane.f32.xlu2 %v5297_v43  ;;  %6934 = vst [vmem:[#allocation122_spill] sm:$0xff] %v5336_v40 }
 0x1ce   :  { %v3608_v22 = vpop.eup %3607 }
 0x1cf   :  { %v279_v12 = vmul.f32 %v3608_v22, %v4959_v46  ;;  %v5303_v58 = vpop.xlane.xlu0 %1604  ;;  %v5319_v46 = vsel %vm27_vm2, %v1329_v56, -1e+09  ;;  %v1746_v22 = vsub.f32 %v4718_v61, %v5102_v23  ;;  %v5345_v61 = vsel %vm27_vm2, %v986_v31, -1e+09  ;;  %v1102_v23 = vpop.f32.mrf.mxu1 }
 0x1d0   :  { %6928 = vst [vmem:[#allocation116_spill] sm:$0xff] %v5303_v58  ;;  %v5305_v3 = vpop.xlane.xlu1 %1606  ;;  %v5307_v2 = vpop.xlane.xlu2 %1542 }
 0x1d1   :  { %6929 = vst [vmem:[#allocation117_spill] sm:$0xff] %v5305_v3  ;;  %v285_v44 = vadd.f32 %v284_v8, %v279_v12  ;;  %v1882_v12 = vmul.f32 1.442695, %v1745_v35  ;;  %v1884_v37 = vmul.f32 1.442695, %v1746_v22 }
 0x1d2   :  { %6932 = vst [vmem:[#allocation120_spill] sm:$0xff] %v5319_v46  ;;  %v989_v31 = vpop.f32.mrf.mxu0 }
 0x1d3   :  { %v287_v47 = vmul.f32 0.25, %v285_v44  ;;  %v1218_v44 = vpop.f32.mrf.mxu2  ;;  %6936 = vst [vmem:[#allocation124_spill] sm:$0xff] %v5345_v61  ;;  %3609 = vpow2.f32 %v1882_v12 }
 0x1d4   :  { %1718 = vmax.xlane.f32.xlu0 %v5319_v46  ;;  %3611 = vpow2.f32 %v1884_v37  ;;  %v1747_v37 = vsub.f32 %v4775_v7, %v5147_v6  ;;  %v5384_v7 = vsel %vm27_vm2, %v1102_v23, -1e+09 }
 0x1d5   :  { %3013 = vst [vmem:[#allocation4 + $0x8] sm:$0xff] %v287_v47  ;;  %1720 = vmax.xlane.f32.xlu1 %v5311_v10  ;;  %1656 = vmax.xlane.f32.xlu2 %v5315_v14  ;;  %v5340_v47 = vsel %vm27_vm2, %v1218_v44, -1e+09  ;;  %v1334_v44 = vpop.f32.mrf.mxu3 }
 0x1d6   :  { %6935 = vst [vmem:[#allocation123_spill] sm:$0xff] %v5340_v47  ;;  %v5362_v12 = vsel %vm27_vm2, %v1334_v44, -1e+09 }
 0x1d7   :  { %v5328_v11 = vpop.xlane.xlu0 %1574  ;;  %6941 = vst [vmem:[#allocation129_spill] sm:$0xff] %v5362_v12  ;;  %v1105_v58 = vpop.f32.mrf.mxu1 }
 0x1d8   :  { %6933 = vst [vmem:[#allocation121_spill] sm:$0xff] %v5328_v11  ;;  %v5330_v8 = vpop.xlane.xlu1 %1672  ;;  %v5332_v56 = vpop.xlane.xlu2 %1608  ;;  %v5376_v44 = vsel %vm27_vm2, %v1105_v58, -1e+09 }
 0x1d9   :  { %v5355_v43 = vpop.eup %3609  ;;  %6942 = vst [vmem:[#allocation130_spill] sm:$0xff] %v5376_v44 }
 0x1da   :  { %6939 = vst [vmem:[#allocation127_spill] sm:$0xff] %v5355_v43  ;;  %v5357_v3 = vpop.eup %3611  ;;  %v991_v58 = vpop.f32.mrf.mxu0 }
 0x1db   :  { %6940 = vst [vmem:[#allocation128_spill] sm:$0xff] %v5357_v3  ;;  %v5401_v23 = vsel %vm27_vm2, %v991_v58, -1e+09 }
 0x1dc   :  { %1688 = vmax.xlane.f32.xlu0 %v5336_v40  ;;  %6944 = vst [vmem:[#allocation132_spill] sm:$0xff] %v5384_v7 }
 0x1dd   :  { %1690 = vmax.xlane.f32.xlu1 %v5340_v47  ;;  %1626 = vmax.xlane.f32.xlu2 %v5345_v61  ;;  %v1886_v61 = vmul.f32 1.442695, %v1747_v37  ;;  %v1337_v6 = vpop.f32.mrf.mxu3  ;;  %6947 = vst [vmem:[#allocation135_spill] sm:$0xff] %v5401_v23 }
 0x1de   :  { %v5416_v58 = vsel %vm27_vm2, %v1337_v6, -1e+09 }
 0x1df   :  { %v5349_v0 = vpop.xlane.xlu0 %2120  ;;  %3613 = vpow2.f32 %v1886_v61  ;;  %v1107_v61 = vpop.f32.mrf.mxu1  ;;  %6949 = vst [vmem:[#allocation137_spill] sm:$0xff] %v5416_v58 }
 0x1e0   :  { %6937 = vst [vmem:[#allocation125_spill] sm:$0xff] %v5349_v0  ;;  %v5351_v35 = vpop.xlane.xlu1 %2122  ;;  %v5353_v22 = vpop.xlane.xlu2 %1704 }
 0x1e1   :  { %6938 = vst [vmem:[#allocation126_spill] sm:$0xff] %v5351_v35 }
 0x1e2   :  { %v994_v28 = vpop.f32.mrf.mxu0 }
 0x1e4   :  { %2138 = vadd.xlane.f32.xlu0 %v5355_v43  ;;  %v1221_v43 = vpop.f32.mrf.mxu2 }
 0x1e5   :  { %2140 = vadd.xlane.f32.xlu1 %v5357_v3  ;;  %1722 = vmax.xlane.f32.xlu2 %v5362_v12  ;;  %v5380_v3 = vsel %vm27_vm2, %v1221_v43, -1e+09  ;;  %v5397_v43 = vsel %vm27_vm2, %v989_v31, -1e+09  ;;  %v1339_v46 = vpop.f32.mrf.mxu3 }
 0x1e6   :  { %6943 = vst [vmem:[#allocation131_spill] sm:$0xff] %v5380_v3 }
 0x1e7   :  { %v5368_v11 = vpop.xlane.xlu0 %1640  ;;  %6946 = vst [vmem:[#allocation134_spill] sm:$0xff] %v5397_v43 }
 0x1e8   :  { %v5370_v47 = vpop.xlane.xlu1 %1642  ;;  %v5372_v10 = vpop.xlane.xlu2 %1674 }
 0x1ec   :  { %1658 = vmax.xlane.f32.xlu0 %v5384_v7 }
 0x1ed   :  { %1660 = vmax.xlane.f32.xlu1 %v5376_v44  ;;  %1692 = vmax.xlane.f32.xlu2 %v5380_v3  ;;  %v5403_v44 = vpop.eup %3613  ;;  %v1223_v3 = vpop.f32.mrf.mxu2 }
 0x1ee   :  { %6948 = vst [vmem:[#allocation136_spill] sm:$0xff] %v5403_v44 }
 0x1ef   :  { %v5389_v37 = vpop.xlane.xlu0 %1610 }
 0x1f0   :  { %v5391_v12 = vpop.xlane.xlu1 %1612  ;;  %v5393_v40 = vpop.xlane.xlu2 %2124 }
 0x1f1   :  { %6945 = vst [vmem:[#allocation133_spill] sm:$0xff] %v5393_v40 }
 0x1f4   :  { %1628 = vmax.xlane.f32.xlu0 %v5397_v43  ;;  %v5420_v43 = vsel %vm27_vm2, %v1339_v46, -1e+09 }
 0x1f5   :  { %1630 = vmax.xlane.f32.xlu1 %v5401_v23  ;;  %2142 = vadd.xlane.f32.xlu2 %v5403_v44  ;;  %6950 = vst [vmem:[#allocation138_spill] sm:$0xff] %v5420_v43  ;;  %v5425_v23 = vsel %vm27_vm2, %v1107_v61, -1e+09  ;;  %v1110_v44 = vpop.f32.mrf.mxu1  ;;  %v1226_v6 = vpop.f32.mrf.mxu2  ;;  %v5441_v61 = vsel %vm27_vm2, %v994_v28, -1e+09 }
 0x1f6   :  { %6951 = vst [vmem:[#allocation139_spill] sm:$0xff] %v5425_v23  ;;  %v5437_v46 = vsel %vm27_vm2, %v1226_v6, -1e+09  ;;  %v5458_v28 = vsel %vm27_vm2, %v1110_v44, -1e+09 }
 0x1f7   :  { %v5408_v7 = vpop.xlane.xlu0 %1706  ;;  %6952 = vst [vmem:[#allocation140_spill] sm:$0xff] %v5437_v46 }
 0x1f8   :  { %v5410_v35 = vpop.xlane.xlu1 %1708  ;;  %v5412_v31 = vpop.xlane.xlu2 %1644  ;;  %6953 = vst [vmem:[#allocation141_spill] sm:$0xff] %v5441_v61 }
 0x1f9   :  { %6957 = vst [vmem:[#allocation145_spill] sm:$0xff] %v5458_v28 }
 0x1fc   :  { %1724 = vmax.xlane.f32.xlu0 %v5416_v58  ;;  %v1342_v58 = vpop.f32.mrf.mxu3 }
 0x1fd   :  { %1726 = vmax.xlane.f32.xlu1 %v5420_v43  ;;  %1662 = vmax.xlane.f32.xlu2 %v5425_v23  ;;  %v5445_v43 = vsel %vm27_vm2, %v1223_v3, -1e+09  ;;  %v996_v23 = vpop.f32.mrf.mxu0  ;;  %v1112_v6 = vpop.f32.mrf.mxu1 }
 0x1fe   :  { %6954 = vst [vmem:[#allocation142_spill] sm:$0xff] %v5445_v43  ;;  %v5462_v3 = vsel %vm27_vm2, %v1112_v6, -1e+09  ;;  %v1228_v6 = vpop.f32.mrf.mxu2 }
 0x1ff   :  { %v5429_v14 = vpop.xlane.xlu0 %1676  ;;  %6958 = vst [vmem:[#allocation146_spill] sm:$0xff] %v5462_v3 }
 0x200   :  { %v5431_v40 = vpop.xlane.xlu1 %1678  ;;  %v5433_v32 = vpop.xlane.xlu2 %1614 }
 0x204   :  { %1694 = vmax.xlane.f32.xlu0 %v5445_v43 }
 0x205   :  { %1696 = vmax.xlane.f32.xlu1 %v5437_v46  ;;  %1632 = vmax.xlane.f32.xlu2 %v5441_v61  ;;  %v5466_v46 = vsel %vm27_vm2, %v1342_v58, -1e+09  ;;  %v1344_v61 = vpop.f32.mrf.mxu3  ;;  %v5483_v58 = vsel %vm27_vm2, %v996_v23, -1e+09  ;;  %v1115_v4 = vpop.f32.mrf.mxu1 }
 0x206   :  { %6959 = vst [vmem:[#allocation147_spill] sm:$0xff] %v5466_v46 }
 0x207   :  { %v5450_v0 = vpop.xlane.xlu0 %2126  ;;  %6961 = vst [vmem:[#allocation149_spill] sm:$0xff] %v5483_v58 }
 0x208   :  { %6955 = vst [vmem:[#allocation143_spill] sm:$0xff] %v5450_v0  ;;  %v5452_v36 = vpop.xlane.xlu1 %2128  ;;  %v5454_v50 = vpop.xlane.xlu2 %1710 }
 0x209   :  { %6956 = vst [vmem:[#allocation144_spill] sm:$0xff] %v5452_v36  ;;  %v999_v36 = vpop.f32.mrf.mxu0 }
 0x20a   :  { %v5479_v53 = vsel %vm27_vm2, %v999_v36, -1e+09 }
 0x20b   :  { %6960 = vst [vmem:[#allocation148_spill] sm:$0xff] %v5479_v53 }
 0x20c   :  { %1664 = vmax.xlane.f32.xlu0 %v5458_v28 }
 0x20d   :  { %1666 = vmax.xlane.f32.xlu1 %v5462_v3  ;;  %1728 = vmax.xlane.f32.xlu2 %v5466_v46  ;;  %v5488_v46 = vsel %vm27_vm2, %v1228_v6, -1e+09  ;;  %v1749_v3 = vsub.f32 %v4885_v19, %v5231_v17  ;;  %v1347_v36 = vpop.f32.mrf.mxu3  ;;  %v5502_v6 = vsel %vm27_vm2, %v1115_v4, -1e+09  ;;  %v5510_v19 = vsel %vm27_vm2, %v1344_v61, -1e+09  ;;  %v1231_v4 = vpop.f32.mrf.mxu2 }
 0x20e   :  { %6962 = vst [vmem:[#allocation150_spill] sm:$0xff] %v5488_v46  ;;  %v1750_v17 = vsub.f32 %v4922_v60, %v5263_v55  ;;  %v5525_v61 = vsel %vm27_vm2, %v1231_v4, -1e+09  ;;  %v1748_v60 = vsub.f32 %v4799_v34, %v5168_v52  ;;  %v1752_v55 = vsub.f32 %v4442_v24, %v4765_v15 }
 0x20f   :  { %v5471_v43 = vpop.xlane.xlu0 %1646  ;;  %6964 = vst [vmem:[#allocation152_spill] sm:$0xff] %v5502_v6  ;;  %v1753_v15 = vsub.f32 %v4495_v45, %v4812_v13 }
 0x210   :  { %v5473_v44 = vpop.xlane.xlu1 %1648  ;;  %v5475_v0 = vpop.xlane.xlu2 %1680  ;;  %6966 = vst [vmem:[#allocation154_spill] sm:$0xff] %v5510_v19 }
 0x211   :  { %6969 = vst [vmem:[#allocation157_spill] sm:$0xff] %v5525_v61 }
 0x214   :  { %1634 = vmax.xlane.f32.xlu0 %v5483_v58  ;;  %v1890_v58 = vmul.f32 1.442695, %v1749_v3 }
 0x215   :  { %1636 = vmax.xlane.f32.xlu1 %v5479_v53  ;;  %1698 = vmax.xlane.f32.xlu2 %v5488_v46  ;;  %v5506_v53 = vsel %vm27_vm2, %v1347_v36, -1e+09 }
 0x216   :  { %6965 = vst [vmem:[#allocation153_spill] sm:$0xff] %v5506_v53  ;;  %3615 = vpow2.f32 %v1890_v58 }
 0x217   :  { %v5494_v28 = vpop.xlane.xlu0 %1616 }
 0x218   :  { %v5496_v25 = vpop.xlane.xlu1 %1618  ;;  %v5498_v23 = vpop.xlane.xlu2 %2130 }
 0x219   :  { %6963 = vst [vmem:[#allocation151_spill] sm:$0xff] %v5498_v23  ;;  %v1001_v23 = vpop.f32.mrf.mxu0 }
 0x21a   :  { %v5531_v58 = vsel %vm27_vm2, %v1001_v23, -1e+09 }
 0x21b   :  { %6970 = vst [vmem:[#allocation158_spill] sm:$0xff] %v5531_v58 }
 0x21c   :  { %1730 = vmax.xlane.f32.xlu0 %v5510_v19  ;;  %v1892_v19 = vmul.f32 1.442695, %v1750_v17  ;;  %v1117_v17 = vpop.f32.mrf.mxu1 }
 0x21d   :  { %1732 = vmax.xlane.f32.xlu1 %v5506_v53  ;;  %1668 = vmax.xlane.f32.xlu2 %v5502_v6  ;;  %v5527_v53 = vpop.eup %3615  ;;  %v1233_v6 = vpop.f32.mrf.mxu2  ;;  %v5552_v52 = vsel %vm27_vm2, %v1117_v17, -1e+09 }
 0x21e   :  { %3617 = vpow2.f32 %v1892_v19  ;;  %v5548_v34 = vsel %vm27_vm2, %v1233_v6, -1e+09  ;;  %6972 = vst [vmem:[#allocation160_spill] sm:$0xff] %v5552_v52  ;;  %v1751_v19 = vsub.f32 %v4952_v26, %v5282_v42  ;;  %v1755_v6 = vsub.f32 %v4546_v1, %v4870_v63 }
 0x21f   :  { %v5517_v3 = vpop.xlane.xlu0 %1712  ;;  %6971 = vst [vmem:[#allocation159_spill] sm:$0xff] %v5548_v34  ;;  %v1754_v42 = vsub.f32 %v4518_v54, %v4839_v29  ;;  %v1756_v63 = vsub.f32 %v4575_v20, %v4914_v33 }
 0x220   :  { %6967 = vst [vmem:[#allocation155_spill] sm:$0xff] %v5517_v3  ;;  %v5519_v46 = vpop.xlane.xlu1 %1714  ;;  %v5521_v36 = vpop.xlane.xlu2 %1650  ;;  %v1896_v3 = vmul.f32 1.442695, %v1752_v55  ;;  %v1898_v55 = vmul.f32 1.442695, %v1753_v15 }
 0x221   :  { %6968 = vst [vmem:[#allocation156_spill] sm:$0xff] %v5519_v46  ;;  %v1894_v13 = vmul.f32 1.442695, %v1751_v19  ;;  %v1900_v54 = vmul.f32 1.442695, %v1754_v42 }
 0x222   :  { %v1904_v19 = vmul.f32 1.442695, %v1756_v63 }
 0x224   :  { %1700 = vmax.xlane.f32.xlu0 %v5525_v61  ;;  %v1888_v61 = vmul.f32 1.442695, %v1748_v60  ;;  %v5554_v24 = vpop.eup %3617 }
 0x225   :  { %2146 = vadd.xlane.f32.xlu1 %v5527_v53  ;;  %1638 = vmax.xlane.f32.xlu2 %v5531_v58  ;;  %v1902_v58 = vmul.f32 1.442695, %v1755_v6 }
 0x226   :  { %3619 = vpow2.f32 %v1888_v61  ;;  %v1349_v61 = vpop.f32.mrf.mxu3 }
 0x227   :  { %v5540_v4 = vpop.xlane.xlu0 %1682  ;;  %3621 = vpow2.f32 %v1896_v3  ;;  %v5579_v1 = vsel %vm27_vm2, %v1349_v61, -1e+09  ;;  %v1758_v3 = vsub.f32 %v4621_v41, %v4966_v49  ;;  %v1759_v41 = vsub.f32 %v4655_v62, %v5025_v18 }
 0x228   :  { %v5542_v46 = vpop.xlane.xlu1 %1684  ;;  %v5544_v23 = vpop.xlane.xlu2 %1620  ;;  %3623 = vpow2.f32 %v1898_v55  ;;  %6975 = vst [vmem:[#allocation163_spill] sm:$0xff] %v5579_v1  ;;  %v1761_v49 = vsub.f32 %v4704_v38, %v5074_v27  ;;  %v1762_v38 = vsub.f32 %v4747_v59, %v5126_v5  ;;  %v6979_v27 = vld [vmem:[#allocation37_spill] sm:$0xff] }
 0x229   :  { %3625 = vpow2.f32 %v1894_v13  ;;  %v1908_v20 = vmul.f32 1.442695, %v1758_v3 }
 0x22a   :  { %3627 = vpow2.f32 %v1902_v58  ;;  %v1757_v58 = vsub.f32 %v4599_v30, %v4943_v9  ;;  %v1910_v30 = vmul.f32 1.442695, %v1759_v41  ;;  %v1914_v3 = vmul.f32 1.442695, %v1761_v49 }
 0x22b   :  { %3629 = vpow2.f32 %v1900_v54  ;;  %v1760_v54 = vsub.f32 %v4678_v16, %v5049_v51  ;;  %v1916_v51 = vmul.f32 1.442695, %v1762_v38  ;;  %v6987_v38 = vld [vmem:[#allocation55_spill] sm:$0xff] }
 0x22c   :  { %1670 = vmax.xlane.f32.xlu0 %v5552_v52  ;;  %v5571_v52 = vpop.eup %3619  ;;  %3631 = vpow2.f32 %v1904_v19  ;;  %v1906_v61 = vmul.f32 1.442695, %v1757_v58  ;;  %v1764_v19 = vsub.f32 %v6979_v27, %v5185_v39  ;;  %v6986_v39 = vld [vmem:[#allocation43_spill] sm:$0xff]  ;;  %v1767_v27 = vsub.f32 %v6987_v38, %v5307_v2  ;;  %v6993_v2 = vld [vmem:[#allocation49_spill] sm:$0xff]  ;;  %v6995_v38 = vld [vmem:[#allocation12_spill] sm:$0xff] }
 0x22d   :  { %1702 = vmax.xlane.f32.xlu1 %v5548_v34  ;;  %2148 = vadd.xlane.f32.xlu2 %v5554_v24  ;;  %v5573_v26 = vpop.eup %3621  ;;  %3633 = vpow2.f32 %v1908_v20  ;;  %v1912_v58 = vmul.f32 1.442695, %v1760_v54  ;;  %v1765_v54 = vsub.f32 %v6986_v39, %v5226_v48 }
 0x22e   :  { %v5594_v6 = vpop.eup %3623  ;;  %3635 = vpow2.f32 %v1906_v61  ;;  %v1920_v61 = vmul.f32 1.442695, %v1764_v19  ;;  %v1926_v34 = vmul.f32 1.442695, %v1767_v27 }
 0x22f   :  { %v5565_v60 = vpop.xlane.xlu0 %2132  ;;  %v5596_v33 = vpop.eup %3625  ;;  %3637 = vpow2.f32 %v1910_v30  ;;  %v6984_v30 = vld [vmem:[#allocation85_spill] sm:$0xff] }
 0x230   :  { %6973 = vst [vmem:[#allocation161_spill] sm:$0xff] %v5565_v60  ;;  %v5567_v17 = vpop.xlane.xlu1 %2134  ;;  %v5569_v45 = vpop.xlane.xlu2 %1716  ;;  %3639 = vpow2.f32 %v1914_v3  ;;  %v6985_v3 = vld [vmem:[#allocation30_spill] sm:$0xff] }
 0x231   :  { %6974 = vst [vmem:[#allocation162_spill] sm:$0xff] %v5567_v17  ;;  %v5598_v55 = vpop.eup %3627  ;;  %3641 = vpow2.f32 %v1912_v58 }
 0x232   :  { %v5615_v63 = vpop.eup %3629  ;;  %3643 = vpow2.f32 %v1916_v51 }
 0x233   :  { %v5617_v62 = vpop.eup %3631  ;;  %3645 = vpow2.f32 %v1920_v61  ;;  %v6992_v61 = vld [vmem:[#allocation8_spill] sm:$0xff] }
 0x234   :  { %2144 = vadd.xlane.f32.xlu0 %v5571_v52  ;;  %6977 = vst [vmem:[#allocation165_spill] sm:$0xff] %v5617_v62  ;;  %v5619_v18 = vpop.eup %3633 }
 0x235   :  { %2152 = vadd.xlane.f32.xlu1 %v5573_v26  ;;  %1734 = vmax.xlane.f32.xlu2 %v5579_v1  ;;  %6978 = vst [vmem:[#allocation166_spill] sm:$0xff] %v5619_v18  ;;  %v5636_v49 = vpop.eup %3635 }
 0x236   :  { %6981 = vst [vmem:[#allocation167_spill] sm:$0xff] %v5636_v49  ;;  %v5638_v59 = vpop.eup %3637 }
 0x237   :  { %v5588_v15 = vpop.xlane.xlu0 %1652  ;;  %6982 = vst [vmem:[#allocation168_spill] sm:$0xff] %v5638_v59  ;;  %v5640_v5 = vpop.eup %3639 }
 0x238   :  { %v5590_v57 = vpop.xlane.xlu1 %1654  ;;  %v5592_v29 = vpop.xlane.xlu2 %1686  ;;  %6983 = vst [vmem:[#allocation169_spill] sm:$0xff] %v5640_v5 }
 0x239   :  { %v5657_v51 = vpop.eup %3641 }
 0x23a   :  { %6989 = vst [vmem:[#allocation30_spill] sm:$0xff] %v5657_v51  ;;  %v5659_v48 = vpop.eup %3643 }
 0x23b   :  { %6990 = vst [vmem:[#allocation43_spill] sm:$0xff] %v5659_v48  ;;  %v5661_v39 = vpop.eup %3645 }
 0x23c   :  { %2150 = vadd.xlane.f32.xlu0 %v5596_v33 }
 0x23d   :  { %2158 = vadd.xlane.f32.xlu1 %v5598_v55  ;;  %2154 = vadd.xlane.f32.xlu2 %v5594_v6 }
 0x23f   :  { %v5609_v13 = vpop.xlane.xlu0 %1622 }
 0x240   :  { %v5611_v42 = vpop.xlane.xlu1 %1624  ;;  %v5613_v9 = vpop.xlane.xlu2 %2136 }
 0x241   :  { %6976 = vst [vmem:[#allocation164_spill] sm:$0xff] %v5613_v9  ;;  %v1763_v9 = vsub.f32 %v6985_v3, %v6984_v30  ;;  %v1922_v3 = vmul.f32 1.442695, %v1765_v54  ;;  %v6994_v54 = vld [vmem:[#allocation38_spill] sm:$0xff] }
 0x242   :  { %v1770_v27 = vsub.f32 %v6995_v38, %v6994_v54 }
 0x243   :  { %v1918_v58 = vmul.f32 1.442695, %v1763_v9  ;;  %v1766_v9 = vsub.f32 %v6993_v2, %v5265_v21 }
 0x244   :  { %2156 = vadd.xlane.f32.xlu0 %v5615_v63 }
 0x245   :  { %2164 = vadd.xlane.f32.xlu1 %v5619_v18  ;;  %2160 = vadd.xlane.f32.xlu2 %v5617_v62  ;;  %3647 = vpow2.f32 %v1918_v58  ;;  %v1924_v58 = vmul.f32 1.442695, %v1766_v9  ;;  %v7003_v9 = vld [vmem:[#allocation59_spill] sm:$0xff]  ;;  %v7021_v62 = vld [vmem:[#allocation9_spill] sm:$0xff] }
 0x246   :  { %3649 = vpow2.f32 %v1922_v3 }
 0x247   :  { %v5630_v20 = vpop.xlane.xlu0 %1718  ;;  %3651 = vpow2.f32 %v1926_v34  ;;  %v7001_v34 = vld [vmem:[#allocation44_spill] sm:$0xff] }
 0x248   :  { %v5632_v41 = vpop.xlane.xlu1 %1720  ;;  %v5634_v16 = vpop.xlane.xlu2 %1656 }
 0x249   :  { %6980 = vst [vmem:[#allocation37_spill] sm:$0xff] %v5632_v41 }
 0x24b   :  { %v5678_v3 = vpop.eup %3647 }
 0x24c   :  { %2162 = vadd.xlane.f32.xlu0 %v5636_v49  ;;  %v5680_v21 = vpop.eup %3649 }
 0x24d   :  { %2170 = vadd.xlane.f32.xlu1 %v5640_v5  ;;  %2166 = vadd.xlane.f32.xlu2 %v5638_v59  ;;  %v6991_v5 = vld [vmem:[#allocation32_spill] sm:$0xff]  ;;  %v5682_v2 = vpop.eup %3651 }
 0x24e   :  { %v1768_v59 = vsub.f32 %v6992_v61, %v6991_v5  ;;  %v1932_v61 = vmul.f32 1.442695, %v1770_v27  ;;  %v1800_v27 = vsub.f32 %v7003_v9, %v5332_v56  ;;  %v7008_v56 = vld [vmem:[#allocation67_spill] sm:$0xff] }
 0x24f   :  { %v5651_v19 = vpop.xlane.xlu0 %1688 }
 0x250   :  { %v5653_v1 = vpop.xlane.xlu1 %1690  ;;  %v5655_v30 = vpop.xlane.xlu2 %1626  ;;  %v1928_v18 = vmul.f32 1.442695, %v1768_v59  ;;  %v7002_v59 = vld [vmem:[#allocation14_spill] sm:$0xff] }
 0x251   :  { %6988 = vst [vmem:[#allocation85_spill] sm:$0xff] %v5653_v1  ;;  %v1771_v38 = vsub.f32 %v7002_v59, %v7001_v34  ;;  %v1992_v34 = vmul.f32 1.442695, %v1800_v27 }
 0x252   :  { %3653 = vpow2.f32 %v1928_v18 }
 0x253   :  { %3655 = vpow2.f32 %v1924_v58 }
 0x254   :  { %2168 = vadd.xlane.f32.xlu0 %v5657_v51  ;;  %v7000_v51 = vld [vmem:[#allocation11_spill] sm:$0xff]  ;;  %3657 = vpow2.f32 %v1932_v61  ;;  %v7006_v61 = vld [vmem:[#allocation48_spill] sm:$0xff] }
 0x255   :  { %2176 = vadd.xlane.f32.xlu1 %v5661_v39  ;;  %2172 = vadd.xlane.f32.xlu2 %v5659_v48  ;;  %v6999_v48 = vld [vmem:[#allocation36_spill] sm:$0xff] }
 0x256   :  { %v1769_v54 = vsub.f32 %v7000_v51, %v6999_v48  ;;  %v1934_v48 = vmul.f32 1.442695, %v1771_v38  ;;  %v7009_v38 = vld [vmem:[#allocation72_spill] sm:$0xff] }
 0x257   :  { %v5672_v17 = vpop.xlane.xlu0 %2138  ;;  %v1801_v9 = vsub.f32 %v7009_v38, %v5389_v37  ;;  %v7015_v37 = vld [vmem:[#allocation63_spill] sm:$0xff] }
 0x258   :  { %6996 = vst [vmem:[#allocation55_spill] sm:$0xff] %v5672_v17  ;;  %v5674_v60 = vpop.xlane.xlu1 %2140  ;;  %v5676_v5 = vpop.xlane.xlu2 %1722  ;;  %v1930_v18 = vmul.f32 1.442695, %v1769_v54  ;;  %v1816_v54 = vsub.f32 %v7008_v56, %v5368_v11 }
 0x259   :  { %6997 = vst [vmem:[#allocation32_spill] sm:$0xff] %v5674_v60  ;;  %v5699_v49 = vpop.eup %3653 }
 0x25a   :  { %6998 = vst [vmem:[#allocation8_spill] sm:$0xff] %v5676_v5  ;;  %v5701_v58 = vpop.eup %3655  ;;  %3659 = vpow2.f32 %v1930_v18  ;;  %v7007_v5 = vld [vmem:[#allocation17_spill] sm:$0xff] }
 0x25b   :  { %v5703_v59 = vpop.eup %3657  ;;  %v1772_v1 = vsub.f32 %v7007_v5, %v7006_v61  ;;  %3661 = vpow2.f32 %v1934_v48  ;;  %v2024_v61 = vmul.f32 1.442695, %v1816_v54  ;;  %v7016_v54 = vld [vmem:[#allocation68_spill] sm:$0xff] }
 0x25c   :  { %2174 = vadd.xlane.f32.xlu0 %v5678_v3  ;;  %3663 = vpow2.f32 %v1992_v34  ;;  %v7014_v34 = vld [vmem:[#allocation58_spill] sm:$0xff]  ;;  %v1817_v38 = vsub.f32 %v7016_v54, %v5370_v47  ;;  %v7022_v47 = vld [vmem:[#allocation69_spill] sm:$0xff] }
 0x25d   :  { %2182 = vadd.xlane.f32.xlu1 %v5682_v2  ;;  %2178 = vadd.xlane.f32.xlu2 %v5680_v21  ;;  %v1936_v18 = vmul.f32 1.442695, %v1772_v1  ;;  %v1832_v41 = vsub.f32 %v7014_v34, %v5330_v8  ;;  %v1848_v1 = vsub.f32 %v7015_v37, %v5353_v22 }
 0x25e   :  { %v2026_v22 = vmul.f32 1.442695, %v1817_v38 }
 0x25f   :  { %v5693_v60 = vpop.xlane.xlu0 %1658  ;;  %3665 = vpow2.f32 %v1936_v18  ;;  %v2056_v18 = vmul.f32 1.442695, %v1832_v41  ;;  %v2088_v34 = vmul.f32 1.442695, %v1848_v1  ;;  %v7023_v41 = vld [vmem:[#allocation77_spill] sm:$0xff] }
 0x260   :  { %v5695_v17 = vpop.xlane.xlu1 %1660  ;;  %v5697_v51 = vpop.xlane.xlu2 %1692  ;;  %3667 = vpow2.f32 %v2024_v61  ;;  %v1818_v1 = vsub.f32 %v7023_v41, %v5412_v31  ;;  %v7030_v31 = vld [vmem:[#allocation71_spill] sm:$0xff] }
 0x261   :  { %7004 = vst [vmem:[#allocation49_spill] sm:$0xff] %v5695_v17  ;;  %v5720_v48 = vpop.eup %3659  ;;  %v1994_v17 = vmul.f32 1.442695, %v1801_v9 }
 0x262   :  { %7005 = vst [vmem:[#allocation38_spill] sm:$0xff] %v5697_v51  ;;  %v5722_v11 = vpop.eup %3661 }
 0x263   :  { %7012 = vst [vmem:[#allocation11_spill] sm:$0xff] %v5722_v11  ;;  %v5724_v56 = vpop.eup %3663  ;;  %3669 = vpow2.f32 %v1994_v17  ;;  %v1833_v17 = vsub.f32 %v7022_v47, %v5372_v10 }
 0x264   :  { %2180 = vadd.xlane.f32.xlu0 %v5701_v58  ;;  %7013 = vst [vmem:[#allocation44_spill] sm:$0xff] %v5724_v56  ;;  %3671 = vpow2.f32 %v2056_v18 }
 0x265   :  { %2188 = vadd.xlane.f32.xlu1 %v5703_v59  ;;  %2184 = vadd.xlane.f32.xlu2 %v5699_v49  ;;  %3673 = vpow2.f32 %v2088_v34  ;;  %v2028_v34 = vmul.f32 1.442695, %v1818_v1 }
 0x266   :  { %3675 = vpow2.f32 %v2026_v22  ;;  %v7028_v22 = vld [vmem:[#allocation35_spill] sm:$0xff] }
 0x267   :  { %v5714_v27 = vpop.xlane.xlu0 %1628 }
 0x268   :  { %7010 = vst [vmem:[#allocation12_spill] sm:$0xff] %v5714_v27  ;;  %v5716_v51 = vpop.xlane.xlu1 %1630  ;;  %v5718_v5 = vpop.xlane.xlu2 %2142 }
 0x269   :  { %7011 = vst [vmem:[#allocation36_spill] sm:$0xff] %v5716_v51  ;;  %v5741_v27 = vpop.eup %3665 }
 0x26a   :  { %v5743_v61 = vpop.eup %3667 }
 0x26b   :  { %v5745_v37 = vpop.eup %3669 }
 0x26c   :  { %2186 = vadd.xlane.f32.xlu0 %v5720_v48  ;;  %v5762_v18 = vpop.eup %3671 }
 0x26d   :  { %2248 = vadd.xlane.f32.xlu1 %v5724_v56  ;;  %2190 = vadd.xlane.f32.xlu2 %v5722_v11  ;;  %v7020_v56 = vld [vmem:[#allocation33_spill] sm:$0xff]  ;;  %v5764_v10 = vpop.eup %3673 }
 0x26e   :  { %v1784_v11 = vsub.f32 %v7021_v62, %v7020_v56  ;;  %v2058_v56 = vmul.f32 1.442695, %v1833_v17  ;;  %7027 = vst [vmem:[#allocation58_spill] sm:$0xff] %v5764_v10  ;;  %v5766_v47 = vpop.eup %3675  ;;  %v7031_v17 = vld [vmem:[#allocation81_spill] sm:$0xff] }
 0x26f   :  { %v5735_v9 = vpop.xlane.xlu0 %1724  ;;  %v1834_v41 = vsub.f32 %v7031_v17, %v5429_v14  ;;  %v7039_v14 = vld [vmem:[#allocation78_spill] sm:$0xff] }
 0x270   :  { %7017 = vst [vmem:[#allocation14_spill] sm:$0xff] %v5735_v9  ;;  %v5737_v51 = vpop.xlane.xlu1 %1726  ;;  %v5739_v8 = vpop.xlane.xlu2 %1662  ;;  %v1960_v38 = vmul.f32 1.442695, %v1784_v11  ;;  %v7029_v9 = vld [vmem:[#allocation10_spill] sm:$0xff]  ;;  %v1802_v11 = vsub.f32 %v7030_v31, %v5391_v12 }
 0x271   :  { %7018 = vst [vmem:[#allocation59_spill] sm:$0xff] %v5737_v51 }
 0x272   :  { %7019 = vst [vmem:[#allocation48_spill] sm:$0xff] %v5739_v8  ;;  %3677 = vpow2.f32 %v1960_v38  ;;  %v1785_v8 = vsub.f32 %v7029_v9, %v7028_v22  ;;  %v1996_v22 = vmul.f32 1.442695, %v1802_v11  ;;  %v7040_v11 = vld [vmem:[#allocation83_spill] sm:$0xff] }
 0x273   :  { %3679 = vpow2.f32 %v2058_v56  ;;  %v1803_v17 = vsub.f32 %v7040_v11, %v5433_v32  ;;  %v7048_v32 = vld [vmem:[#allocation92_spill] sm:$0xff] }
 0x274   :  { %2192 = vadd.xlane.f32.xlu0 %v5741_v27  ;;  %3681 = vpow2.f32 %v2028_v34  ;;  %v1962_v38 = vmul.f32 1.442695, %v1785_v8  ;;  %v7037_v34 = vld [vmem:[#allocation41_spill] sm:$0xff]  ;;  %v1849_v8 = vsub.f32 %v7039_v14, %v5408_v7 }
 0x275   :  { %2280 = vadd.xlane.f32.xlu2 %v5743_v61  ;;  %2250 = vadd.xlane.f32.xlu1 %v5745_v37 }
 0x276   :  { %3683 = vpow2.f32 %v1962_v38 }
 0x277   :  { %v5756_v54 = vpop.xlane.xlu0 %1694  ;;  %3685 = vpow2.f32 %v1996_v22 }
 0x278   :  { %7024 = vst [vmem:[#allocation17_spill] sm:$0xff] %v5756_v54  ;;  %v5758_v51 = vpop.xlane.xlu1 %1696  ;;  %v5760_v62 = vpop.xlane.xlu2 %1632  ;;  %v7038_v54 = vld [vmem:[#allocation13_spill] sm:$0xff] }
 0x279   :  { %7025 = vst [vmem:[#allocation67_spill] sm:$0xff] %v5758_v51  ;;  %v5783_v56 = vpop.eup %3677 }
 0x27a   :  { %7026 = vst [vmem:[#allocation72_spill] sm:$0xff] %v5760_v62  ;;  %v2060_v62 = vmul.f32 1.442695, %v1834_v41  ;;  %v5785_v12 = vpop.eup %3679 }
 0x27b   :  { %7035 = vst [vmem:[#allocation9_spill] sm:$0xff] %v5785_v12  ;;  %v5787_v31 = vpop.eup %3681 }
 0x27c   :  { %2312 = vadd.xlane.f32.xlu0 %v5762_v18  ;;  %7036 = vst [vmem:[#allocation69_spill] sm:$0xff] %v5787_v31  ;;  %3687 = vpow2.f32 %v2060_v62  ;;  %v5804_v22 = vpop.eup %3683  ;;  %v7047_v62 = vld [vmem:[#allocation76_spill] sm:$0xff] }
 0x27d   :  { %2282 = vadd.xlane.f32.xlu2 %v5766_v47  ;;  %2344 = vadd.xlane.f32.xlu1 %v5764_v10  ;;  %v1786_v10 = vsub.f32 %v7038_v54, %v7037_v34  ;;  %v2090_v34 = vmul.f32 1.442695, %v1849_v8  ;;  %7044 = vst [vmem:[#allocation71_spill] sm:$0xff] %v5804_v22  ;;  %v5806_v7 = vpop.eup %3685  ;;  %v7049_v8 = vld [vmem:[#allocation93_spill] sm:$0xff] }
 0x27e   :  { %7045 = vst [vmem:[#allocation81_spill] sm:$0xff] %v5806_v7  ;;  %v1804_v11 = vsub.f32 %v7049_v8, %v5494_v28  ;;  %v7057_v28 = vld [vmem:[#allocation88_spill] sm:$0xff] }
 0x27f   :  { %v5777_v1 = vpop.xlane.xlu0 %1664  ;;  %v1964_v38 = vmul.f32 1.442695, %v1786_v10  ;;  %v1819_v10 = vsub.f32 %v7048_v32, %v5471_v43 }
 0x280   :  { %7032 = vst [vmem:[#allocation63_spill] sm:$0xff] %v5777_v1  ;;  %v5779_v51 = vpop.xlane.xlu1 %1666  ;;  %v5781_v9 = vpop.xlane.xlu2 %1728  ;;  %v1850_v1 = vsub.f32 %v7047_v62, %v5410_v35 }
 0x281   :  { %7033 = vst [vmem:[#allocation68_spill] sm:$0xff] %v5779_v51  ;;  %v1998_v51 = vmul.f32 1.442695, %v1803_v17  ;;  %3689 = vpow2.f32 %v1964_v38  ;;  %v2030_v62 = vmul.f32 1.442695, %v1819_v10  ;;  %v7058_v10 = vld [vmem:[#allocation90_spill] sm:$0xff] }
 0x282   :  { %7034 = vst [vmem:[#allocation33_spill] sm:$0xff] %v5781_v9  ;;  %v5808_v14 = vpop.eup %3687  ;;  %3691 = vpow2.f32 %v2090_v34  ;;  %v2092_v38 = vmul.f32 1.442695, %v1850_v1  ;;  %v1851_v1 = vsub.f32 %v7057_v28, %v5454_v50  ;;  %v1820_v8 = vsub.f32 %v7058_v10, %v5473_v44  ;;  %v7066_v44 = vld [vmem:[#allocation91_spill] sm:$0xff] }
 0x283   :  { %7046 = vst [vmem:[#allocation41_spill] sm:$0xff] %v5808_v14  ;;  %3693 = vpow2.f32 %v1998_v51  ;;  %v7056_v51 = vld [vmem:[#allocation82_spill] sm:$0xff] }
 0x284   :  { %2216 = vadd.xlane.f32.xlu0 %v5783_v56  ;;  %3695 = vpow2.f32 %v2092_v38  ;;  %v2032_v50 = vmul.f32 1.442695, %v1820_v8 }
 0x285   :  { %2314 = vadd.xlane.f32.xlu2 %v5785_v12  ;;  %2284 = vadd.xlane.f32.xlu1 %v5787_v31  ;;  %3697 = vpow2.f32 %v2030_v62 }
 0x287   :  { %v5798_v41 = vpop.xlane.xlu0 %1634  ;;  %v5825_v34 = vpop.eup %3689 }
 0x288   :  { %7041 = vst [vmem:[#allocation77_spill] sm:$0xff] %v5798_v41  ;;  %v5800_v9 = vpop.xlane.xlu1 %1636  ;;  %v5802_v54 = vpop.xlane.xlu2 %1698  ;;  %v1835_v41 = vsub.f32 %v7056_v51, %v5431_v40  ;;  %v2094_v51 = vmul.f32 1.442695, %v1851_v1 }
 0x289   :  { %7042 = vst [vmem:[#allocation35_spill] sm:$0xff] %v5800_v9  ;;  %v5827_v43 = vpop.eup %3691 }
 0x28a   :  { %7043 = vst [vmem:[#allocation10_spill] sm:$0xff] %v5802_v54  ;;  %v2000_v54 = vmul.f32 1.442695, %v1804_v11  ;;  %v5829_v32 = vpop.eup %3693  ;;  %v2062_v38 = vmul.f32 1.442695, %v1835_v41  ;;  %v1836_v41 = vsub.f32 %v7066_v44, %v5475_v0 }
 0x28b   :  { %7053 = vst [vmem:[#allocation76_spill] sm:$0xff] %v5825_v34 }
 0x28c   :  { %2252 = vadd.xlane.f32.xlu0 %v5806_v7  ;;  %7054 = vst [vmem:[#allocation92_spill] sm:$0xff] %v5827_v43  ;;  %3699 = vpow2.f32 %v2000_v54  ;;  %v7067_v54 = vld [vmem:[#allocation100_spill] sm:$0xff] }
 0x28d   :  { %2218 = vadd.xlane.f32.xlu2 %v5804_v22  ;;  %2316 = vadd.xlane.f32.xlu1 %v5808_v14  ;;  %7055 = vst [vmem:[#allocation93_spill] sm:$0xff] %v5829_v32  ;;  %3701 = vpow2.f32 %v2062_v38  ;;  %v1821_v1 = vsub.f32 %v7067_v54, %v5521_v36  ;;  %v7075_v36 = vld [vmem:[#allocation94_spill] sm:$0xff] }
 0x28e   :  { %3703 = vpow2.f32 %v2094_v51  ;;  %v7077_v54 = vld [vmem:[#allocation18_spill] sm:$0xff] }
 0x28f   :  { %v5819_v17 = vpop.xlane.xlu0 %1730  ;;  %3705 = vpow2.f32 %v2032_v50  ;;  %v2034_v51 = vmul.f32 1.442695, %v1821_v1  ;;  %v7073_v50 = vld [vmem:[#allocation47_spill] sm:$0xff] }
 0x290   :  { %7050 = vst [vmem:[#allocation13_spill] sm:$0xff] %v5819_v17  ;;  %v5821_v9 = vpop.xlane.xlu1 %1732  ;;  %v5823_v35 = vpop.xlane.xlu2 %1668 }
 0x291   :  { %7051 = vst [vmem:[#allocation78_spill] sm:$0xff] %v5821_v9  ;;  %v5846_v17 = vpop.eup %3695 }
 0x292   :  { %7052 = vst [vmem:[#allocation83_spill] sm:$0xff] %v5823_v35  ;;  %v5848_v62 = vpop.eup %3697  ;;  %v7064_v35 = vld [vmem:[#allocation45_spill] sm:$0xff] }
 0x293   :  { %7061 = vst [vmem:[#allocation90_spill] sm:$0xff] %v5846_v17  ;;  %v5850_v28 = vpop.eup %3699 }
 0x294   :  { %2346 = vadd.xlane.f32.xlu0 %v5827_v43  ;;  %7062 = vst [vmem:[#allocation170_spill] sm:$0xff] %v5848_v62  ;;  %v5867_v38 = vpop.eup %3701 }
 0x295   :  { %2254 = vadd.xlane.f32.xlu2 %v5829_v32  ;;  %2220 = vadd.xlane.f32.xlu1 %v5825_v34  ;;  %7063 = vst [vmem:[#allocation171_spill] sm:$0xff] %v5850_v28  ;;  %v7065_v32 = vld [vmem:[#allocation15_spill] sm:$0xff]  ;;  %v5869_v0 = vpop.eup %3703 }
 0x296   :  { %v1787_v34 = vsub.f32 %v7065_v32, %v7064_v35  ;;  %v2064_v32 = vmul.f32 1.442695, %v1836_v41  ;;  %7070 = vst [vmem:[#allocation91_spill] sm:$0xff] %v5867_v38  ;;  %v5871_v44 = vpop.eup %3705  ;;  %v7076_v41 = vld [vmem:[#allocation50_spill] sm:$0xff] }
 0x297   :  { %v5840_v11 = vpop.xlane.xlu0 %1700  ;;  %7071 = vst [vmem:[#allocation100_spill] sm:$0xff] %v5869_v0  ;;  %v1773_v1 = vsub.f32 %v7077_v54, %v7076_v41 }
 0x298   :  { %7059 = vst [vmem:[#allocation82_spill] sm:$0xff] %v5840_v11  ;;  %v5842_v9 = vpop.xlane.xlu1 %2146  ;;  %v5844_v40 = vpop.xlane.xlu2 %1638  ;;  %v1966_v8 = vmul.f32 1.442695, %v1787_v34  ;;  %v7074_v11 = vld [vmem:[#allocation16_spill] sm:$0xff]  ;;  %v1805_v34 = vsub.f32 %v7075_v36, %v5496_v25 }
 0x299   :  { %7060 = vst [vmem:[#allocation88_spill] sm:$0xff] %v5844_v40 }
 0x29a   :  { %7072 = vst [vmem:[#allocation172_spill] sm:$0xff] %v5871_v44  ;;  %3707 = vpow2.f32 %v1966_v8 }
 0x29b   :  { %3709 = vpow2.f32 %v2064_v32 }
 0x29c   :  { %2286 = vadd.xlane.f32.xlu0 %v5848_v62  ;;  %3711 = vpow2.f32 %v2034_v51  ;;  %v7095_v62 = vld [vmem:[#allocation21_spill] sm:$0xff] }
 0x29d   :  { %2348 = vadd.xlane.f32.xlu2 %v5846_v17  ;;  %2256 = vadd.xlane.f32.xlu1 %v5850_v28  ;;  %v1788_v28 = vsub.f32 %v7074_v11, %v7073_v50  ;;  %v2002_v50 = vmul.f32 1.442695, %v1805_v34  ;;  %v7085_v34 = vld [vmem:[#allocation109_spill] sm:$0xff] }
 0x29e   :  { %v1822_v54 = vsub.f32 %v7085_v34, %v5588_v15  ;;  %v7091_v15 = vld [vmem:[#allocation103_spill] sm:$0xff]  ;;  %v7093_v34 = vld [vmem:[#allocation20_spill] sm:$0xff]  ;;  %v7094_v17 = vld [vmem:[#allocation57_spill] sm:$0xff] }
 0x29f   :  { %v5861_v10 = vpop.xlane.xlu0 %1670  ;;  %v1968_v8 = vmul.f32 1.442695, %v1788_v28  ;;  %v7084_v28 = vld [vmem:[#allocation104_spill] sm:$0xff]  ;;  %v1790_v43 = vsub.f32 %v7095_v62, %v7094_v17 }
 0x2a0   :  { %7068 = vst [vmem:[#allocation45_spill] sm:$0xff] %v5861_v10  ;;  %v5863_v40 = vpop.xlane.xlu1 %1702  ;;  %v5865_v35 = vpop.xlane.xlu2 %2148  ;;  %v1837_v51 = vsub.f32 %v7084_v28, %v5540_v4 }
 0x2a1   :  { %7069 = vst [vmem:[#allocation15_spill] sm:$0xff] %v5863_v40  ;;  %v5888_v32 = vpop.eup %3707  ;;  %3713 = vpow2.f32 %v1968_v8 }
 0x2a2   :  { %7079 = vst [vmem:[#allocation16_spill] sm:$0xff] %v5888_v32  ;;  %v5890_v25 = vpop.eup %3709  ;;  %3715 = vpow2.f32 %v2002_v50 }
 0x2a3   :  { %7080 = vst [vmem:[#allocation94_spill] sm:$0xff] %v5890_v25  ;;  %v5892_v36 = vpop.eup %3711 }
 0x2a4   :  { %2318 = vadd.xlane.f32.xlu0 %v5867_v38  ;;  %v1938_v38 = vmul.f32 1.442695, %v1773_v1  ;;  %7081 = vst [vmem:[#allocation50_spill] sm:$0xff] %v5892_v36 }
 0x2a5   :  { %2288 = vadd.xlane.f32.xlu2 %v5871_v44  ;;  %2350 = vadd.xlane.f32.xlu1 %v5869_v0  ;;  %v7082_v0 = vld [vmem:[#allocation155_spill] sm:$0xff]  ;;  %v7083_v44 = vld [vmem:[#allocation98_spill] sm:$0xff] }
 0x2a6   :  { %v1852_v41 = vsub.f32 %v7083_v44, %v7082_v0  ;;  %3717 = vpow2.f32 %v1938_v38  ;;  %v2066_v44 = vmul.f32 1.442695, %v1837_v51  ;;  %v7090_v38 = vld [vmem:[#allocation19_spill] sm:$0xff]  ;;  %v7092_v51 = vld [vmem:[#allocation56_spill] sm:$0xff] }
 0x2a7   :  { %v5882_v40 = vpop.xlane.xlu0 %2144  ;;  %v5909_v50 = vpop.eup %3713 }
 0x2a8   :  { %v5884_v10 = vpop.xlane.xlu1 %2152  ;;  %v5886_v11 = vpop.xlane.xlu2 %1734  ;;  %v2096_v8 = vmul.f32 1.442695, %v1852_v41  ;;  %7086 = vst [vmem:[#allocation18_spill] sm:$0xff] %v5909_v50  ;;  %v1806_v41 = vsub.f32 %v7091_v15, %v5544_v23  ;;  %v7099_v15 = vld [vmem:[#allocation62_spill] sm:$0xff] }
 0x2a9   :  { %7078 = vst [vmem:[#allocation47_spill] sm:$0xff] %v5886_v11  ;;  %v5911_v4 = vpop.eup %3715 }
 0x2aa   :  { %7087 = vst [vmem:[#allocation155_spill] sm:$0xff] %v5911_v4  ;;  %3719 = vpow2.f32 %v2096_v8  ;;  %v7096_v8 = vld [vmem:[#allocation61_spill] sm:$0xff]  ;;  %v2004_v22 = vmul.f32 1.442695, %v1806_v41  ;;  %v7105_v41 = vld [vmem:[#allocation102_spill] sm:$0xff] }
 0x2ab   :  { %3721 = vpow2.f32 %v2066_v44 }
 0x2ac   :  { %2222 = vadd.xlane.f32.xlu0 %v5888_v32  ;;  %v2036_v32 = vmul.f32 1.442695, %v1822_v54  ;;  %v5913_v28 = vpop.eup %3717  ;;  %v1774_v54 = vsub.f32 %v7093_v34, %v7092_v51  ;;  %v7101_v51 = vld [vmem:[#allocation66_spill] sm:$0xff]  ;;  %v7102_v34 = vld [vmem:[#allocation24_spill] sm:$0xff] }
 0x2ad   :  { %2320 = vadd.xlane.f32.xlu2 %v5890_v25  ;;  %2290 = vadd.xlane.f32.xlu1 %v5892_v36  ;;  %7088 = vst [vmem:[#allocation98_spill] sm:$0xff] %v5913_v28  ;;  %v7089_v36 = vld [vmem:[#allocation52_spill] sm:$0xff]  ;;  %v1776_v17 = vsub.f32 %v7102_v34, %v7101_v51 }
 0x2ae   :  { %v1789_v25 = vsub.f32 %v7090_v38, %v7089_v36  ;;  %3723 = vpow2.f32 %v2036_v32  ;;  %v7097_v38 = vld [vmem:[#allocation22_spill] sm:$0xff]  ;;  %v1940_v32 = vmul.f32 1.442695, %v1774_v54 }
 0x2af   :  { %v5903_v1 = vpop.xlane.xlu0 %2150  ;;  %v1791_v44 = vsub.f32 %v7097_v38, %v7096_v8  ;;  %v7103_v38 = vld [vmem:[#allocation156_spill] sm:$0xff]  ;;  %v7106_v54 = vld [vmem:[#allocation110_spill] sm:$0xff] }
 0x2b0   :  { %v5905_v11 = vpop.xlane.xlu1 %2158  ;;  %v5907_v0 = vpop.xlane.xlu2 %2154  ;;  %v1970_v36 = vmul.f32 1.442695, %v1789_v25  ;;  %v1972_v25 = vmul.f32 1.442695, %v1790_v43  ;;  %v1944_v43 = vmul.f32 1.442695, %v1776_v17 }
 0x2b1   :  { %v5936_v7 = vpop.eup %3719  ;;  %v1974_v8 = vmul.f32 1.442695, %v1791_v44 }
 0x2b2   :  { %v5940_v62 = vpop.eup %3721  ;;  %3725 = vpow2.f32 %v1970_v36  ;;  %v1823_v36 = vsub.f32 %v7106_v54, %v5590_v57  ;;  %v7109_v57 = vld [vmem:[#allocation125_spill] sm:$0xff] }
 0x2b3   :  { %3727 = vpow2.f32 %v2004_v22 }
 0x2b4   :  { %2258 = vadd.xlane.f32.xlu0 %v5911_v4  ;;  %v5942_v31 = vpop.eup %3723  ;;  %3729 = vpow2.f32 %v1940_v32  ;;  %v7108_v32 = vld [vmem:[#allocation106_spill] sm:$0xff]  ;;  %v2038_v17 = vmul.f32 1.442695, %v1823_v36 }
 0x2b5   :  { %2224 = vadd.xlane.f32.xlu2 %v5909_v50  ;;  %2194 = vadd.xlane.f32.xlu1 %v5913_v28  ;;  %v7100_v50 = vld [vmem:[#allocation23_spill] sm:$0xff]  ;;  %3731 = vpow2.f32 %v1972_v25  ;;  %v1854_v34 = vsub.f32 %v7108_v32, %v5569_v45 }
 0x2b6   :  { %v1775_v28 = vsub.f32 %v7100_v50, %v7099_v15  ;;  %v1838_v15 = vsub.f32 %v7105_v41, %v5542_v46  ;;  %3733 = vpow2.f32 %v1974_v8  ;;  %v7110_v25 = vld [vmem:[#allocation111_spill] sm:$0xff] }
 0x2b7   :  { %v5926_v14 = vpop.xlane.xlu0 %2156 }
 0x2b8   :  { %v5930_v4 = vpop.xlane.xlu1 %2164  ;;  %v5932_v23 = vpop.xlane.xlu2 %2160  ;;  %v1942_v50 = vmul.f32 1.442695, %v1775_v28  ;;  %v2068_v46 = vmul.f32 1.442695, %v1838_v15 }
 0x2b9   :  { %7098 = vst [vmem:[#allocation104_spill] sm:$0xff] %v5930_v4  ;;  %v7104_v4 = vld [vmem:[#allocation99_spill] sm:$0xff]  ;;  %v5959_v22 = vpop.eup %3725 }
 0x2ba   :  { %v1853_v12 = vsub.f32 %v7104_v4, %v7103_v38  ;;  %3735 = vpow2.f32 %v1942_v50  ;;  %v5963_v38 = vpop.eup %3727  ;;  %v7111_v50 = vld [vmem:[#allocation114_spill] sm:$0xff] }
 0x2bb   :  { %3737 = vpow2.f32 %v1944_v43  ;;  %v5968_v8 = vpop.eup %3729  ;;  %v1807_v41 = vsub.f32 %v7111_v50, %v5609_v13  ;;  %v2100_v43 = vmul.f32 1.442695, %v1854_v34  ;;  %v7117_v50 = vld [vmem:[#allocation119_spill] sm:$0xff] }
 0x2bc   :  { %2352 = vadd.xlane.f32.xlu0 %v5936_v7  ;;  %v2098_v4 = vmul.f32 1.442695, %v1853_v12  ;;  %3739 = vrcp.f32 %v7109_v57  ;;  %v1839_v12 = vsub.f32 %v7110_v25, %v5592_v29  ;;  %v5973_v15 = vpop.eup %3731 }
 0x2bd   :  { %2322 = vadd.xlane.f32.xlu2 %v5940_v62  ;;  %2292 = vadd.xlane.f32.xlu1 %v5942_v31  ;;  %v5977_v45 = vpop.eup %3733 }
 0x2be   :  { %3741 = vpow2.f32 %v2098_v4  ;;  %v2070_v54 = vmul.f32 1.442695, %v1839_v12  ;;  %v7114_v4 = vld [vmem:[#allocation133_spill] sm:$0xff] }
 0x2bf   :  { %v5953_v44 = vpop.xlane.xlu0 %2162  ;;  %3743 = vpow2.f32 %v2068_v46  ;;  %v2006_v46 = vmul.f32 1.442695, %v1807_v41  ;;  %v1824_v41 = vsub.f32 %v7117_v50, %v5634_v16 }
 0x2c0   :  { %v5955_v51 = vpop.xlane.xlu1 %2170  ;;  %v5957_v28 = vpop.xlane.xlu2 %2166  ;;  %3745 = vpow2.f32 %v2038_v17 }
 0x2c1   :  { %7107 = vst [vmem:[#allocation109_spill] sm:$0xff] %v5955_v51  ;;  %v5979_v29 = vpop.eup %3735  ;;  %3747 = vrcp.f32 %v5882_v40  ;;  %v2040_v51 = vmul.f32 1.442695, %v1824_v41 }
 0x2c2   :  { %7112 = vst [vmem:[#allocation52_spill] sm:$0xff] %v5979_v29  ;;  %v5984_v13 = vpop.eup %3737  ;;  %3749 = vrcp.f32 %v7114_v4 }
 0x2c3   :  { %v5989_v25 = vpop.eup %3739 }
 0x2c4   :  { %2260 = vadd.xlane.f32.xlu0 %v5963_v38  ;;  %v5991_v34 = vpop.eup %3741 }
 0x2c5   :  { %2226 = vadd.xlane.f32.xlu2 %v5959_v22  ;;  %2196 = vadd.xlane.f32.xlu1 %v5968_v8  ;;  %v5993_v17 = vpop.eup %3743 }
 0x2c6   :  { %v5995_v40 = vpop.eup %3745 }
 0x2c7   :  { %v5982_v36 = vpop.xlane.xlu0 %2168  ;;  %7116 = vst [vmem:[#allocation56_spill] sm:$0xff] %v5995_v40  ;;  %v3748_v12 = vpop.eup %3747 }
 0x2c8   :  { %7113 = vst [vmem:[#allocation19_spill] sm:$0xff] %v5982_v36  ;;  %v2177_v32 = vpop.xlane.xlu1 %2176  ;;  %v5987_v57 = vpop.xlane.xlu2 %2172 }
 0x2c9   :  { %7115 = vst [vmem:[#allocation103_spill] sm:$0xff] %v5987_v57  ;;  %3751 = vrcp.f32 %v2177_v32  ;;  %v6003_v4 = vpop.eup %3749  ;;  %v2516_v32 = vmul.f32 %v3748_v12, %v5571_v52  ;;  %v7119_v52 = vld [vmem:[#allocation113_spill] sm:$0xff] }
 0x2ca   :  { %3753 = vpow2.f32 %v2100_v43  ;;  %v1808_v12 = vsub.f32 %v7119_v52, %v5611_v42 }
 0x2cb   :  { %3755 = vpow2.f32 %v2070_v54 }
 0x2cc   :  { %3757 = vpow2.f32 %v2006_v46  ;;  %2354 = vadd.xlane.f32.xlu0 %v5991_v34 }
 0x2cd   :  { %3759 = vrcp.f32 %v5718_v5  ;;  %2324 = vadd.xlane.f32.xlu2 %v5993_v17  ;;  %2294 = vadd.xlane.f32.xlu1 %v5995_v40 }
 0x2ce   :  { %3761 = vrcp.f32 %v5842_v9 }
 0x2cf   :  { %v3752_v43 = vpop.eup %3751  ;;  %3763 = vrcp.f32 %v5903_v1  ;;  %v2175_v54 = vpop.xlane.xlu0 %2174 }
 0x2d0   :  { %v6007_v46 = vpop.eup %3753  ;;  %v2532_v16 = vmul.f32 %v3752_v43, %v5661_v39  ;;  %3765 = vrcp.f32 %v2175_v54  ;;  %v2183_v5 = vpop.xlane.xlu1 %2182  ;;  %v7120_v54 = vld [vmem:[#allocation136_spill] sm:$0xff] }
 0x2d1   :  { %v2179_v50 = vpop.xlane.xlu2 %2178  ;;  %v6011_v57 = vpop.eup %3755  ;;  %3767 = vrcp.f32 %v2183_v5 }
 0x2d2   :  { %v6013_v36 = vpop.eup %3757  ;;  %v6015_v9 = vadd.f32 %v2532_v16, %v2516_v32  ;;  %3769 = vrcp.f32 %v2179_v50  ;;  %v2008_v16 = vmul.f32 1.442695, %v1808_v12 }
 0x2d3   :  { %v3760_v1 = vpop.eup %3759  ;;  %3771 = vrcp.f32 %v5926_v14 }
 0x2d4   :  { %7118 = vst [vmem:[#allocation20_spill] sm:$0xff] %v6015_v9  ;;  %v3762_v40 = vpop.eup %3761  ;;  %3773 = vrcp.f32 %v5884_v10  ;;  %2262 = vadd.xlane.f32.xlu0 %v6013_v36  ;;  %v2515_v14 = vmul.f32 %v3760_v1, %v7120_v54 }
 0x2d5   :  { %v3764_v39 = vpop.eup %3763  ;;  %3775 = vpow2.f32 %v2040_v51  ;;  %2228 = vadd.xlane.f32.xlu2 %v5973_v15  ;;  %2198 = vadd.xlane.f32.xlu1 %v5979_v29 }
 0x2d6   :  { %v3766_v41 = vpop.eup %3765  ;;  %3777 = vrcp.f32 %v5865_v35  ;;  %v2519_v5 = vmul.f32 %v3764_v39, %v5596_v33  ;;  %v2517_v35 = vmul.f32 %v3762_v40, %v5527_v53  ;;  %v7123_v33 = vld [vmem:[#allocation126_spill] sm:$0xff] }
 0x2d7   :  { %v3768_v43 = vpop.eup %3767  ;;  %3779 = vrcp.f32 %v5907_v0  ;;  %v2531_v42 = vmul.f32 %v3766_v41, %v5678_v3  ;;  %v2181_v32 = vpop.xlane.xlu0 %2180  ;;  %v7126_v53 = vld [vmem:[#allocation122_spill] sm:$0xff] }
 0x2d8   :  { %v3770_v10 = vpop.eup %3769  ;;  %v2535_v51 = vmul.f32 %v3768_v43, %v5682_v2  ;;  %3781 = vrcp.f32 %v2181_v32  ;;  %v2189_v50 = vpop.xlane.xlu1 %2188  ;;  %v7124_v2 = vld [vmem:[#allocation120_spill] sm:$0xff]  ;;  %v1840_v40 = vsub.f32 %v7126_v53, %v5651_v19 }
 0x2d9   :  { %v2185_v52 = vpop.xlane.xlu2 %2184  ;;  %v3772_v9 = vpop.eup %3771  ;;  %v6031_v29 = vadd.f32 %v2531_v42, %v2515_v14  ;;  %v2533_v1 = vmul.f32 %v3770_v10, %v5680_v21  ;;  %3783 = vrcp.f32 %v2189_v50  ;;  %v1855_v39 = vsub.f32 %v7124_v2, %v5630_v20  ;;  %v7127_v42 = vld [vmem:[#allocation73_spill] sm:$0xff]  ;;  %v7128_v10 = vld [vmem:[#allocation143_spill] sm:$0xff]  ;;  %v7129_v19 = vld [vmem:[#allocation132_spill] sm:$0xff] }
 0x2da   :  { %v3774_v0 = vpop.eup %3773  ;;  %v6034_v3 = vadd.f32 %v2535_v51, %v2519_v5  ;;  %3785 = vrcp.f32 %v2185_v52  ;;  %v2522_v21 = vmul.f32 %v3772_v9, %v5615_v63  ;;  %v2506_v32 = vmul.f32 %v6003_v4, %v7127_v42  ;;  %v7130_v9 = vld [vmem:[#allocation64_spill] sm:$0xff] }
 0x2db   :  { %7121 = vst [vmem:[#allocation57_spill] sm:$0xff] %v6031_v29  ;;  %v6036_v12 = vpop.eup %3775  ;;  %3787 = vrcp.f32 %v7123_v33  ;;  %v6041_v41 = vadd.f32 %v2533_v1, %v2517_v35  ;;  %v2520_v14 = vmul.f32 %v3774_v0, %v5573_v26  ;;  %v2504_v5 = vmul.f32 %v5989_v25, %v7130_v9 }
 0x2dc   :  { %7122 = vst [vmem:[#allocation21_spill] sm:$0xff] %v6034_v3  ;;  %v3778_v43 = vpop.eup %3777  ;;  %3789 = vrcp.f32 %v5905_v11  ;;  %2356 = vadd.xlane.f32.xlu0 %v6007_v46  ;;  %v1825_v11 = vsub.f32 %v7129_v19, %v5693_v60  ;;  %v2072_v35 = vmul.f32 1.442695, %v1840_v40  ;;  %v2638_v1 = vadd.f32 %v2522_v21, %v2506_v32  ;;  %v7132_v40 = vld [vmem:[#allocation144_spill] sm:$0xff] }
 0x2dd   :  { %7125 = vst [vmem:[#allocation61_spill] sm:$0xff] %v6041_v41  ;;  %v3780_v54 = vpop.eup %3779  ;;  %3791 = vpow2.f32 %v2008_v16  ;;  %2326 = vadd.xlane.f32.xlu2 %v6011_v57  ;;  %2296 = vadd.xlane.f32.xlu1 %v6036_v12  ;;  %v2102_v16 = vmul.f32 1.442695, %v1855_v39  ;;  %v2518_v26 = vmul.f32 %v3778_v43, %v5554_v24  ;;  %v2632_v60 = vadd.f32 %v2520_v14, %v2504_v5 }
 0x2de   :  { %v3782_v20 = vpop.eup %3781  ;;  %3793 = vrcp.f32 %v7128_v10  ;;  %v2042_v39 = vmul.f32 1.442695, %v1825_v11  ;;  %v7136_v10 = vld [vmem:[#allocation65_spill] sm:$0xff] }
 0x2df   :  { %v3784_v63 = vpop.eup %3783  ;;  %v2534_v51 = vmul.f32 %v3782_v20, %v5701_v58  ;;  %v2187_v50 = vpop.xlane.xlu0 %2186  ;;  %v7133_v20 = vld [vmem:[#allocation70_spill] sm:$0xff] }
 0x2e0   :  { %v3786_v52 = vpop.eup %3785  ;;  %v2538_v4 = vmul.f32 %v3784_v63, %v5703_v59  ;;  %3795 = vrcp.f32 %v2187_v50  ;;  %v2249_v0 = vpop.xlane.xlu1 %2248  ;;  %v2521_v59 = vmul.f32 %v3780_v54, %v5594_v6  ;;  %v7137_v54 = vld [vmem:[#allocation74_spill] sm:$0xff] }
 0x2e1   :  { %v2191_v33 = vpop.xlane.xlu2 %2190  ;;  %v3788_v2 = vpop.eup %3787  ;;  %3797 = vrcp.f32 %v5932_v23  ;;  %v6062_v53 = vadd.f32 %v2534_v51, %v2518_v26  ;;  %v2536_v25 = vmul.f32 %v3786_v52, %v5699_v49  ;;  %v7134_v23 = vld [vmem:[#allocation25_spill] sm:$0xff]  ;;  %v7135_v49 = vld [vmem:[#allocation124_spill] sm:$0xff]  ;;  %v7138_v63 = vld [vmem:[#allocation26_spill] sm:$0xff] }
 0x2e2   :  { %v3790_v24 = vpop.eup %3789  ;;  %3799 = vrcp.f32 %v2191_v33  ;;  %v6065_v58 = vadd.f32 %v2638_v1, %v2538_v4  ;;  %v1792_v42 = vsub.f32 %v7134_v23, %v7133_v20  ;;  %v1809_v32 = vsub.f32 %v7135_v49, %v5655_v30  ;;  %v7142_v23 = vld [vmem:[#allocation37_spill] sm:$0xff] }
 0x2e3   :  { %7131 = vst [vmem:[#allocation22_spill] sm:$0xff] %v6062_v53  ;;  %v6067_v43 = vpop.eup %3791  ;;  %3801 = vrcp.f32 %v7132_v40  ;;  %v6071_v21 = vadd.f32 %v2632_v60, %v2536_v25  ;;  %v2505_v19 = vmul.f32 %v3788_v2, %v7136_v10  ;;  %v2523_v11 = vmul.f32 %v3790_v24, %v5598_v55  ;;  %v7140_v60 = vld [vmem:[#allocation11_spill] sm:$0xff] }
 0x2e4   :  { %v3794_v14 = vpop.eup %3793  ;;  %3803 = vpow2.f32 %v2102_v16  ;;  %2264 = vadd.xlane.f32.xlu0 %v6067_v43  ;;  %v1777_v9 = vsub.f32 %v7138_v63, %v7137_v54  ;;  %v7139_v16 = vld [vmem:[#allocation86_spill] sm:$0xff]  ;;  %v2010_v55 = vmul.f32 1.442695, %v1809_v32  ;;  %v7144_v10 = vld [vmem:[#allocation87_spill] sm:$0xff] }
 0x2e5   :  { %3805 = vpow2.f32 %v2072_v35  ;;  %2230 = vadd.xlane.f32.xlu2 %v5977_v45  ;;  %2200 = vadd.xlane.f32.xlu1 %v5984_v13  ;;  %v2507_v26 = vmul.f32 %v3794_v14, %v7139_v16  ;;  %v2635_v30 = vadd.f32 %v2521_v59, %v2505_v19  ;;  %v1976_v35 = vmul.f32 1.442695, %v1792_v42  ;;  %v7143_v42 = vld [vmem:[#allocation118_spill] sm:$0xff] }
 0x2e6   :  { %v3796_v6 = vpop.eup %3795  ;;  %3807 = vpow2.f32 %v2042_v39  ;;  %v1946_v40 = vmul.f32 1.442695, %v1777_v9  ;;  %v1856_v49 = vsub.f32 %v7143_v42, %v7142_v23  ;;  %v7147_v9 = vld [vmem:[#allocation49_spill] sm:$0xff]  ;;  %v7151_v23 = vld [vmem:[#allocation27_spill] sm:$0xff] }
 0x2e7   :  { %v3798_v5 = vpop.eup %3797  ;;  %v2537_v51 = vmul.f32 %v3796_v6, %v5720_v48  ;;  %3809 = vrcp.f32 %v2249_v0  ;;  %v2193_v50 = vpop.xlane.xlu0 %2192  ;;  %v2641_v2 = vadd.f32 %v2523_v11, %v2507_v26  ;;  %v7141_v48 = vld [vmem:[#allocation165_spill] sm:$0xff]  ;;  %v7146_v6 = vld [vmem:[#allocation123_spill] sm:$0xff] }
 0x2e8   :  { %v3800_v52 = vpop.eup %3799  ;;  %3811 = vrcp.f32 %v2193_v50  ;;  %v2251_v4 = vpop.xlane.xlu1 %2250  ;;  %v2524_v0 = vmul.f32 %v3798_v5, %v7141_v48  ;;  %v7145_v11 = vld [vmem:[#allocation85_spill] sm:$0xff]  ;;  %v7148_v5 = vld [vmem:[#allocation130_spill] sm:$0xff] }
 0x2e9   :  { %v2281_v1 = vpop.xlane.xlu2 %2280  ;;  %v3802_v33 = vpop.eup %3801  ;;  %v2539_v25 = vmul.f32 %v3800_v52, %v7140_v60  ;;  %v6087_v24 = vadd.f32 %v2635_v30, %v2537_v51  ;;  %v1841_v54 = vsub.f32 %v7146_v6, %v7145_v11  ;;  %v1826_v16 = vsub.f32 %v7148_v5, %v7147_v9  ;;  %v7154_v11 = vld [vmem:[#allocation12_spill] sm:$0xff]  ;;  %v7155_v6 = vld [vmem:[#allocation134_spill] sm:$0xff] }
 0x2ea   :  { %3813 = vrcp.f32 %v2281_v1  ;;  %v6089_v39 = vpop.eup %3803  ;;  %v2508_v19 = vmul.f32 %v3802_v33, %v7144_v10  ;;  %v2104_v52 = vmul.f32 1.442695, %v1856_v49 }
 0x2eb   :  { %v6091_v59 = vpop.eup %3805  ;;  %v6094_v14 = vadd.f32 %v2641_v2, %v2539_v25  ;;  %3815 = vpow2.f32 %v1976_v35  ;;  %v7149_v35 = vld [vmem:[#allocation44_spill] sm:$0xff]  ;;  %v2074_v60 = vmul.f32 1.442695, %v1841_v54  ;;  %v2044_v48 = vmul.f32 1.442695, %v1826_v16 }
 0x2ec   :  { %v6096_v20 = vpop.eup %3807  ;;  %2358 = vadd.xlane.f32.xlu0 %v6089_v39  ;;  %3817 = vpow2.f32 %v2010_v55  ;;  %v2644_v30 = vadd.f32 %v2524_v0, %v2508_v19  ;;  %v1810_v54 = vsub.f32 %v7155_v6, %v7154_v11  ;;  %v7162_v11 = vld [vmem:[#allocation48_spill] sm:$0xff]  ;;  %v7163_v6 = vld [vmem:[#allocation139_spill] sm:$0xff] }
 0x2ed   :  { %v3810_v32 = vpop.eup %3809  ;;  %2328 = vadd.xlane.f32.xlu2 %v6091_v59  ;;  %2298 = vadd.xlane.f32.xlu1 %v6096_v20  ;;  %3819 = vpow2.f32 %v1946_v40 }
 0x2ee   :  { %v3812_v63 = vpop.eup %3811  ;;  %3821 = vrcp.f32 %v2251_v4  ;;  %v2568_v1 = vmul.f32 %v3810_v32, %v7149_v35  ;;  %v7150_v4 = vld [vmem:[#allocation75_spill] sm:$0xff]  ;;  %v7153_v32 = vld [vmem:[#allocation29_spill] sm:$0xff] }
 0x2ef   :  { %v2540_v51 = vmul.f32 %v3812_v63, %v5741_v27  ;;  %v2313_v50 = vpop.xlane.xlu0 %2312  ;;  %v1793_v42 = vsub.f32 %v7151_v23, %v7150_v4 }
 0x2f0   :  { %v3814_v26 = vpop.eup %3813  ;;  %3823 = vrcp.f32 %v2313_v50  ;;  %v2345_v2 = vpop.xlane.xlu1 %2344 }
 0x2f1   :  { %v2584_v55 = vmul.f32 %v3814_v26, %v5743_v61  ;;  %v2283_v33 = vpop.xlane.xlu2 %2282  ;;  %v6111_v25 = vadd.f32 %v2644_v30, %v2540_v51  ;;  %v6113_v40 = vpop.eup %3815  ;;  %v7152_v61 = vld [vmem:[#allocation80_spill] sm:$0xff]  ;;  %v1978_v5 = vmul.f32 1.442695, %v1793_v42 }
 0x2f2   :  { %3825 = vrcp.f32 %v2283_v33  ;;  %v6115_v27 = vpop.eup %3817  ;;  %v1778_v10 = vsub.f32 %v7153_v32, %v7152_v61  ;;  %v7156_v33 = vld [vmem:[#allocation58_spill] sm:$0xff] }
 0x2f3   :  { %v2680_v0 = vadd.f32 %v2584_v55, %v2568_v1  ;;  %3827 = vrcp.f32 %v2345_v2  ;;  %v6119_v49 = vpop.eup %3819  ;;  %v2012_v55 = vmul.f32 1.442695, %v1810_v54  ;;  %v7160_v32 = vld [vmem:[#allocation38_spill] sm:$0xff]  ;;  %v1827_v54 = vsub.f32 %v7163_v6, %v7162_v11  ;;  %v7171_v6 = vld [vmem:[#allocation135_spill] sm:$0xff] }
 0x2f4   :  { %3829 = vpow2.f32 %v2104_v52  ;;  %2266 = vadd.xlane.f32.xlu0 %v6115_v27  ;;  %v3822_v19 = vpop.eup %3821  ;;  %v1948_v51 = vmul.f32 1.442695, %v1778_v10  ;;  %v7161_v10 = vld [vmem:[#allocation131_spill] sm:$0xff] }
 0x2f5   :  { %3831 = vpow2.f32 %v2074_v60  ;;  %2232 = vadd.xlane.f32.xlu2 %v6113_v40  ;;  %2202 = vadd.xlane.f32.xlu1 %v6119_v49  ;;  %v2569_v50 = vmul.f32 %v3822_v19, %v5745_v37  ;;  %v7158_v37 = vld [vmem:[#allocation8_spill] sm:$0xff]  ;;  %v1842_v19 = vsub.f32 %v7161_v10, %v7160_v32 }
 0x2f6   :  { %v3824_v63 = vpop.eup %3823  ;;  %3833 = vpow2.f32 %v2044_v48 }
 0x2f7   :  { %v2600_v16 = vmul.f32 %v3824_v63, %v5762_v18  ;;  %v2217_v26 = vpop.xlane.xlu0 %2216 }
 0x2f8   :  { %v3826_v9 = vpop.eup %3825  ;;  %3835 = vrcp.f32 %v2217_v26  ;;  %v2285_v1 = vpop.xlane.xlu1 %2284  ;;  %v7164_v26 = vld [vmem:[#allocation9_spill] sm:$0xff] }
 0x2f9   :  { %v3828_v30 = vpop.eup %3827  ;;  %v2585_v52 = vmul.f32 %v3826_v9, %v5766_v47  ;;  %v2315_v35 = vpop.xlane.xlu2 %2314  ;;  %v2681_v60 = vadd.f32 %v2680_v0, %v2600_v16  ;;  %v7159_v47 = vld [vmem:[#allocation129_spill] sm:$0xff] }
 0x2fa   :  { %v2616_v2 = vmul.f32 %v3828_v30, %v7156_v33  ;;  %3837 = vrcp.f32 %v2315_v35  ;;  %v6132_v48 = vpop.eup %3829  ;;  %v1857_v61 = vsub.f32 %v7159_v47, %v7158_v37  ;;  %v2076_v35 = vmul.f32 1.442695, %v1842_v19  ;;  %v7167_v37 = vld [vmem:[#allocation28_spill] sm:$0xff]  ;;  %v7169_v19 = vld [vmem:[#allocation31_spill] sm:$0xff] }
 0x2fb   :  { %v2683_v4 = vadd.f32 %v2585_v52, %v2569_v50  ;;  %v6134_v23 = vpop.eup %3831  ;;  %3839 = vpow2.f32 %v1978_v5 }
 0x2fc   :  { %v2682_v18 = vadd.f32 %v2681_v60, %v2616_v2  ;;  %v6136_v42 = vpop.eup %3833  ;;  %3841 = vpow2.f32 %v1948_v51  ;;  %2360 = vadd.xlane.f32.xlu0 %v6132_v48  ;;  %v2106_v16 = vmul.f32 1.442695, %v1857_v61  ;;  %v2046_v2 = vmul.f32 1.442695, %v1827_v54 }
 0x2fd   :  { %7157 = vst [vmem:[#allocation62_spill] sm:$0xff] %v6136_v42  ;;  %3843 = vpow2.f32 %v2012_v55  ;;  %2330 = vadd.xlane.f32.xlu2 %v6134_v23  ;;  %2300 = vadd.xlane.f32.xlu1 %v6136_v42 }
 0x2fe   :  { %v3836_v0 = vpop.eup %3835  ;;  %3845 = vrcp.f32 %v2285_v1  ;;  %v6160_v32 = vmul.f32 0.25, %v2682_v18 }
 0x2ff   :  { %v2552_v9 = vmul.f32 %v3836_v0, %v5783_v56  ;;  %v2253_v5 = vpop.xlane.xlu0 %2252  ;;  %v7166_v56 = vld [vmem:[#allocation79_spill] sm:$0xff]  ;;  %v7168_v0 = vld [vmem:[#allocation84_spill] sm:$0xff] }
 0x300   :  { %v3838_v63 = vpop.eup %3837  ;;  %3847 = vrcp.f32 %v2253_v5  ;;  %v2317_v50 = vpop.xlane.xlu1 %2316  ;;  %v1794_v47 = vsub.f32 %v7167_v37, %v7166_v56  ;;  %v1779_v11 = vsub.f32 %v7169_v19, %v7168_v0  ;;  %v7172_v5 = vld [vmem:[#allocation69_spill] sm:$0xff] }
 0x301   :  { %v2601_v30 = vmul.f32 %v3838_v63, %v7164_v26  ;;  %v2219_v51 = vpop.xlane.xlu2 %2218  ;;  %v6149_v52 = vpop.eup %3839  ;;  %v2634_v55 = vadd.f32 %v6071_v21, %v2552_v9  ;;  %v7170_v21 = vld [vmem:[#allocation36_spill] sm:$0xff] }
 0x302   :  { %3849 = vrcp.f32 %v2219_v51  ;;  %v6152_v33 = vpop.eup %3841  ;;  %v1980_v9 = vmul.f32 1.442695, %v1794_v47 }
 0x303   :  { %7165 = vst [vmem:[#allocation23_spill] sm:$0xff] %v6152_v33  ;;  %3851 = vrcp.f32 %v2317_v50  ;;  %v2684_v1 = vadd.f32 %v2683_v4, %v2601_v30  ;;  %v6154_v60 = vpop.eup %3843  ;;  %v6158_v61 = vmul.f32 0.25, %v2634_v55  ;;  %v1811_v4 = vsub.f32 %v7171_v6, %v7170_v21  ;;  %v7174_v55 = vld [vmem:[#allocation71_spill] sm:$0xff]  ;;  %v7175_v6 = vld [vmem:[#allocation41_spill] sm:$0xff] }
 0x304   :  { %v3846_v10 = vpop.eup %3845  ;;  %3853 = vpow2.f32 %v2106_v16  ;;  %2268 = vadd.xlane.f32.xlu0 %v6154_v60  ;;  %v7173_v16 = vld [vmem:[#allocation81_spill] sm:$0xff] }
 0x305   :  { %3855 = vpow2.f32 %v2076_v35  ;;  %2234 = vadd.xlane.f32.xlu2 %v6149_v52  ;;  %2204 = vadd.xlane.f32.xlu1 %v6152_v33  ;;  %v2586_v26 = vmul.f32 %v3846_v10, %v7172_v5  ;;  %v1950_v35 = vmul.f32 1.442695, %v1779_v11  ;;  %v2014_v19 = vmul.f32 1.442695, %v1811_v4  ;;  %v7178_v11 = vld [vmem:[#allocation14_spill] sm:$0xff]  ;;  %v7180_v4 = vld [vmem:[#allocation17_spill] sm:$0xff] }
 0x306   :  { %v3848_v18 = vpop.eup %3847  ;;  %3857 = vpow2.f32 %v2046_v2 }
 0x307   :  { %v2570_v30 = vmul.f32 %v3848_v18, %v7173_v16  ;;  %v2347_v51 = vpop.xlane.xlu0 %2346 }
 0x308   :  { %v3850_v63 = vpop.eup %3849  ;;  %3859 = vrcp.f32 %v2347_v51  ;;  %v2221_v0 = vpop.xlane.xlu1 %2220  ;;  %v7184_v51 = vld [vmem:[#allocation92_spill] sm:$0xff] }
 0x309   :  { %v3852_v50 = vpop.eup %3851  ;;  %v2553_v56 = vmul.f32 %v3850_v63, %v7174_v55  ;;  %v2255_v37 = vpop.xlane.xlu2 %2254  ;;  %v2686_v21 = vadd.f32 %v2586_v26, %v2570_v30  ;;  %3861 = vrcp.f32 %v2221_v0  ;;  %v7179_v63 = vld [vmem:[#allocation137_spill] sm:$0xff]  ;;  %v7181_v26 = vld [vmem:[#allocation142_spill] sm:$0xff]  ;;  %v7182_v30 = vld [vmem:[#allocation63_spill] sm:$0xff] }
 0x30a   :  { %v2602_v54 = vmul.f32 %v3852_v50, %v7175_v6  ;;  %v6175_v3 = vpop.eup %3853  ;;  %3863 = vpow2.f32 %v1980_v9  ;;  %v1858_v5 = vsub.f32 %v7179_v63, %v7178_v11  ;;  %v1843_v16 = vsub.f32 %v7181_v26, %v7180_v4  ;;  %v7183_v9 = vld [vmem:[#allocation145_spill] sm:$0xff]  ;;  %v7186_v11 = vld [vmem:[#allocation76_spill] sm:$0xff] }
 0x30b   :  { %v2637_v2 = vadd.f32 %v6087_v24, %v2553_v56  ;;  %v6178_v47 = vpop.eup %3855  ;;  %3865 = vpow2.f32 %v1950_v35 }
 0x30c   :  { %7176 = vst [vmem:[#allocation66_spill] sm:$0xff] %v6178_v47  ;;  %v2687_v10 = vadd.f32 %v2686_v21, %v2602_v54  ;;  %v6180_v18 = vpop.eup %3857  ;;  %2362 = vadd.xlane.f32.xlu0 %v6175_v3  ;;  %3867 = vpow2.f32 %v2014_v19  ;;  %v1828_v54 = vsub.f32 %v7183_v9, %v7182_v30  ;;  %v2108_v56 = vmul.f32 1.442695, %v1858_v5 }
 0x30d   :  { %7177 = vst [vmem:[#allocation24_spill] sm:$0xff] %v6180_v18  ;;  %2332 = vadd.xlane.f32.xlu2 %v6178_v47  ;;  %2302 = vadd.xlane.f32.xlu1 %v6180_v18  ;;  %3869 = vrcp.f32 %v2255_v37  ;;  %v2078_v6 = vmul.f32 1.442695, %v1843_v16  ;;  %v6199_v37 = vmul.f32 0.25, %v2637_v2  ;;  %v7192_v16 = vld [vmem:[#allocation141_spill] sm:$0xff] }
 0x30e   :  { %v3860_v24 = vpop.eup %3859  ;;  %v2048_v53 = vmul.f32 1.442695, %v1828_v54 }
 0x30f   :  { %v2617_v50 = vmul.f32 %v3860_v24, %v7184_v51  ;;  %v2287_v35 = vpop.xlane.xlu0 %2286  ;;  %v3862_v55 = vpop.eup %3861  ;;  %v7189_v51 = vld [vmem:[#allocation89_spill] sm:$0xff] }
 0x310   :  { %3871 = vrcp.f32 %v2287_v35  ;;  %v2257_v19 = vpop.xlane.xlu1 %2256  ;;  %v6192_v21 = vpop.eup %3863  ;;  %v2554_v63 = vmul.f32 %v3862_v55, %v7186_v11  ;;  %v7190_v35 = vld [vmem:[#allocation34_spill] sm:$0xff]  ;;  %v7194_v55 = vld [vmem:[#allocation39_spill] sm:$0xff] }
 0x311   :  { %v2349_v0 = vpop.xlane.xlu2 %2348  ;;  %7185 = vst [vmem:[#allocation156_spill] sm:$0xff] %v6192_v21  ;;  %v2685_v4 = vadd.f32 %v2684_v1, %v2617_v50  ;;  %v6195_v26 = vpop.eup %3865  ;;  %v1795_v41 = vsub.f32 %v7190_v35, %v7189_v51  ;;  %v7191_v1 = vld [vmem:[#allocation72_spill] sm:$0xff] }
 0x312   :  { %3873 = vrcp.f32 %v2349_v0  ;;  %7187 = vst [vmem:[#allocation99_spill] sm:$0xff] %v6195_v26  ;;  %v6197_v30 = vpop.eup %3867  ;;  %v2640_v5 = vadd.f32 %v6065_v58, %v2554_v63  ;;  %v1812_v50 = vsub.f32 %v7192_v16, %v7191_v1  ;;  %v7193_v58 = vld [vmem:[#allocation96_spill] sm:$0xff]  ;;  %v7197_v1 = vld [vmem:[#allocation90_spill] sm:$0xff] }
 0x313   :  { %7188 = vst [vmem:[#allocation102_spill] sm:$0xff] %v6197_v30  ;;  %v6201_v24 = vmul.f32 0.25, %v2685_v4  ;;  %v3870_v9 = vpop.eup %3869  ;;  %3875 = vpow2.f32 %v2108_v56  ;;  %v1780_v0 = vsub.f32 %v7194_v55, %v7193_v58  ;;  %v7195_v56 = vld [vmem:[#allocation93_spill] sm:$0xff]  ;;  %v7196_v4 = vld [vmem:[#allocation170_spill] sm:$0xff]  ;;  %v1982_v35 = vmul.f32 1.442695, %v1795_v41 }
 0x314   :  { %2270 = vadd.xlane.f32.xlu0 %v6197_v30  ;;  %3877 = vpow2.f32 %v2078_v6  ;;  %v2571_v63 = vmul.f32 %v3870_v9, %v7195_v56  ;;  %v2016_v18 = vmul.f32 1.442695, %v1812_v50  ;;  %v7200_v55 = vld [vmem:[#allocation138_spill] sm:$0xff]  ;;  %v7203_v41 = vld [vmem:[#allocation140_spill] sm:$0xff]  ;;  %v6229_v50 = vmul.f32 0.25, %v2640_v5  ;;  %v7207_v5 = vld [vmem:[#allocation151_spill] sm:$0xff] }
 0x315   :  { %2236 = vadd.xlane.f32.xlu2 %v6192_v21  ;;  %2206 = vadd.xlane.f32.xlu1 %v6195_v26  ;;  %3879 = vpow2.f32 %v2048_v53  ;;  %v1952_v58 = vmul.f32 1.442695, %v1780_v0  ;;  %v7199_v53 = vld [vmem:[#allocation59_spill] sm:$0xff] }
 0x316   :  { %v3872_v54 = vpop.eup %3871  ;;  %3881 = vrcp.f32 %v2257_v19  ;;  %v1859_v21 = vsub.f32 %v7200_v55, %v7199_v53  ;;  %v7202_v19 = vld [vmem:[#allocation67_spill] sm:$0xff] }
 0x317   :  { %v2587_v6 = vmul.f32 %v3872_v54, %v7196_v4  ;;  %v2319_v51 = vpop.xlane.xlu0 %2318  ;;  %v1844_v56 = vsub.f32 %v7203_v41, %v7202_v19  ;;  %v7206_v4 = vld [vmem:[#allocation146_spill] sm:$0xff]  ;;  %v7210_v41 = vld [vmem:[#allocation172_spill] sm:$0xff] }
 0x318   :  { %v3874_v11 = vpop.eup %3873  ;;  %3883 = vrcp.f32 %v2319_v51  ;;  %v2351_v26 = vpop.xlane.xlu1 %2350 }
 0x319   :  { %v2618_v16 = vmul.f32 %v3874_v11, %v7197_v1  ;;  %v2289_v29 = vpop.xlane.xlu2 %2288  ;;  %v2689_v2 = vadd.f32 %v2587_v6, %v2571_v63  ;;  %v6218_v30 = vpop.eup %3875  ;;  %v7205_v63 = vld [vmem:[#allocation68_spill] sm:$0xff]  ;;  %v2110_v6 = vmul.f32 1.442695, %v1859_v21  ;;  %v2080_v1 = vmul.f32 1.442695, %v1844_v56 }
 0x31a   :  { %3885 = vrcp.f32 %v2289_v29  ;;  %7198 = vst [vmem:[#allocation110_spill] sm:$0xff] %v6218_v30  ;;  %v6222_v54 = vpop.eup %3877  ;;  %v7211_v21 = vld [vmem:[#allocation100_spill] sm:$0xff] }
 0x31b   :  { %3887 = vrcp.f32 %v2351_v26  ;;  %v2688_v9 = vadd.f32 %v2687_v10, %v2618_v16  ;;  %7201 = vst [vmem:[#allocation106_spill] sm:$0xff] %v6222_v54  ;;  %v6226_v11 = vpop.eup %3879  ;;  %v1829_v26 = vsub.f32 %v7206_v4, %v7205_v63  ;;  %v7208_v16 = vld [vmem:[#allocation91_spill] sm:$0xff] }
 0x31c   :  { %7204 = vst [vmem:[#allocation125_spill] sm:$0xff] %v6226_v11  ;;  %3889 = vpow2.f32 %v1982_v35  ;;  %2364 = vadd.xlane.f32.xlu0 %v6218_v30  ;;  %v3882_v0 = vpop.eup %3881 }
 0x31d   :  { %v6231_v29 = vmul.f32 0.25, %v2688_v9  ;;  %3891 = vpow2.f32 %v2016_v18  ;;  %2334 = vadd.xlane.f32.xlu2 %v6222_v54  ;;  %2304 = vadd.xlane.f32.xlu1 %v6226_v11  ;;  %v7209_v9 = vld [vmem:[#allocation171_spill] sm:$0xff] }
 0x31e   :  { %v3884_v10 = vpop.eup %3883  ;;  %3893 = vpow2.f32 %v1952_v58  ;;  %v2572_v19 = vmul.f32 %v3882_v0, %v7209_v9  ;;  %v2050_v58 = vmul.f32 1.442695, %v1829_v26  ;;  %v7215_v0 = vld [vmem:[#allocation97_spill] sm:$0xff] }
 0x31f   :  { %3895 = vrcp.f32 %v7207_v5  ;;  %v2603_v53 = vmul.f32 %v3884_v10, %v7208_v16  ;;  %v2223_v18 = vpop.xlane.xlu0 %2222 }
 0x320   :  { %v3886_v35 = vpop.eup %3885  ;;  %3897 = vrcp.f32 %v2223_v18  ;;  %v2291_v11 = vpop.xlane.xlu1 %2290 }
 0x321   :  { %v3888_v55 = vpop.eup %3887  ;;  %v2588_v63 = vmul.f32 %v3886_v35, %v7210_v41  ;;  %v2321_v4 = vpop.xlane.xlu2 %2320  ;;  %v2690_v51 = vadd.f32 %v2689_v2, %v2603_v53  ;;  %v7216_v35 = vld [vmem:[#allocation40_spill] sm:$0xff]  ;;  %v7217_v2 = vld [vmem:[#allocation77_spill] sm:$0xff] }
 0x322   :  { %v2619_v54 = vmul.f32 %v3888_v55, %v7211_v21  ;;  %3899 = vrcp.f32 %v2321_v4  ;;  %v6244_v30 = vpop.eup %3889  ;;  %v1796_v18 = vsub.f32 %v7216_v35, %v7215_v0  ;;  %v7218_v53 = vld [vmem:[#allocation149_spill] sm:$0xff] }
 0x323   :  { %7212 = vst [vmem:[#allocation111_spill] sm:$0xff] %v6244_v30  ;;  %3901 = vpow2.f32 %v2110_v6  ;;  %v2692_v56 = vadd.f32 %v2588_v63, %v2572_v19  ;;  %v6246_v5 = vpop.eup %3891  ;;  %v1813_v55 = vsub.f32 %v7218_v53, %v7217_v2  ;;  %v7221_v19 = vld [vmem:[#allocation16_spill] sm:$0xff] }
 0x324   :  { %7213 = vst [vmem:[#allocation114_spill] sm:$0xff] %v6246_v5  ;;  %3903 = vpow2.f32 %v2080_v1  ;;  %v2691_v10 = vadd.f32 %v2690_v51, %v2619_v54  ;;  %v6248_v16 = vpop.eup %3893  ;;  %2272 = vadd.xlane.f32.xlu0 %v6246_v5  ;;  %v7219_v54 = vld [vmem:[#allocation101_spill] sm:$0xff]  ;;  %v7220_v51 = vld [vmem:[#allocation42_spill] sm:$0xff]  ;;  %v1984_v4 = vmul.f32 1.442695, %v1796_v18  ;;  %v7226_v5 = vld [vmem:[#allocation147_spill] sm:$0xff] }
 0x325   :  { %7214 = vst [vmem:[#allocation133_spill] sm:$0xff] %v6248_v16  ;;  %3905 = vrcp.f32 %v5953_v44  ;;  %v3896_v26 = vpop.eup %3895  ;;  %2238 = vadd.xlane.f32.xlu2 %v6244_v30  ;;  %2208 = vadd.xlane.f32.xlu1 %v6248_v16  ;;  %v1781_v1 = vsub.f32 %v7220_v51, %v7219_v54  ;;  %v2018_v53 = vmul.f32 1.442695, %v1813_v55  ;;  %v7225_v51 = vld [vmem:[#allocation33_spill] sm:$0xff] }
 0x326   :  { %3907 = vpow2.f32 %v2050_v58  ;;  %v3898_v6 = vpop.eup %3897  ;;  %v7223_v58 = vld [vmem:[#allocation94_spill] sm:$0xff]  ;;  %v6277_v33 = vmul.f32 0.25, %v2691_v10  ;;  %v7233_v10 = vld [vmem:[#allocation95_spill] sm:$0xff] }
 0x327   :  { %3909 = vrcp.f32 %v2291_v11  ;;  %v2555_v41 = vmul.f32 %v3898_v6, %v7221_v19  ;;  %v2259_v44 = vpop.xlane.xlu0 %2258  ;;  %v1954_v11 = vmul.f32 1.442695, %v1781_v1  ;;  %v1860_v6 = vsub.f32 %v7226_v5, %v7225_v51  ;;  %v7232_v5 = vld [vmem:[#allocation167_spill] sm:$0xff]  ;;  %v7234_v51 = vld [vmem:[#allocation161_spill] sm:$0xff] }
 0x328   :  { %v3900_v9 = vpop.eup %3899  ;;  %3911 = vrcp.f32 %v2259_v44  ;;  %v2195_v35 = vpop.xlane.xlu1 %2194  ;;  %v7229_v44 = vld [vmem:[#allocation150_spill] sm:$0xff] }
 0x329   :  { %v6261_v63 = vpop.eup %3901  ;;  %v2604_v21 = vmul.f32 %v3900_v9, %v7223_v58  ;;  %v2225_v0 = vpop.xlane.xlu2 %2224  ;;  %v2643_v16 = vadd.f32 %v6094_v14, %v2555_v41  ;;  %v7228_v9 = vld [vmem:[#allocation10_spill] sm:$0xff]  ;;  %v7230_v14 = vld [vmem:[#allocation83_spill] sm:$0xff]  ;;  %v7231_v41 = vld [vmem:[#allocation152_spill] sm:$0xff] }
 0x32a   :  { %7222 = vst [vmem:[#allocation119_spill] sm:$0xff] %v6261_v63  ;;  %v6264_v2 = vpop.eup %3903  ;;  %3913 = vrcp.f32 %v2225_v0  ;;  %v1845_v58 = vsub.f32 %v7229_v44, %v7228_v9  ;;  %v1830_v1 = vsub.f32 %v7231_v41, %v7230_v14  ;;  %v2509_v0 = vmul.f32 %v3896_v26, %v7233_v10  ;;  %v7235_v44 = vld [vmem:[#allocation50_spill] sm:$0xff]  ;;  %v7236_v14 = vld [vmem:[#allocation155_spill] sm:$0xff] }
 0x32b   :  { %7224 = vst [vmem:[#allocation113_spill] sm:$0xff] %v6264_v2  ;;  %v3906_v54 = vpop.eup %3905  ;;  %3915 = vrcp.f32 %v2195_v35  ;;  %v6269_v19 = vadd.f32 %v2692_v56, %v2604_v21  ;;  %v6275_v30 = vmul.f32 0.25, %v2643_v16  ;;  %v7238_v26 = vld [vmem:[#allocation98_spill] sm:$0xff] }
 0x32c   :  { %v6271_v18 = vpop.eup %3907  ;;  %3917 = vpow2.f32 %v1984_v4  ;;  %2366 = vadd.xlane.f32.xlu0 %v6261_v63  ;;  %v2525_v56 = vmul.f32 %v3906_v54, %v7232_v5  ;;  %v2112_v4 = vmul.f32 1.442695, %v1860_v6  ;;  %v2082_v9 = vmul.f32 1.442695, %v1845_v58 }
 0x32d   :  { %7227 = vst [vmem:[#allocation136_spill] sm:$0xff] %v6271_v18  ;;  %v3910_v55 = vpop.eup %3909  ;;  %3919 = vpow2.f32 %v2018_v53  ;;  %2336 = vadd.xlane.f32.xlu2 %v6264_v2  ;;  %2306 = vadd.xlane.f32.xlu1 %v6271_v18  ;;  %v2052_v2 = vmul.f32 1.442695, %v1830_v1  ;;  %v7237_v18 = vld [vmem:[#allocation18_spill] sm:$0xff] }
 0x32e   :  { %v3912_v21 = vpop.eup %3911  ;;  %3921 = vpow2.f32 %v1954_v11  ;;  %v2589_v53 = vmul.f32 %v3910_v55, %v7235_v44  ;;  %v2647_v11 = vadd.f32 %v2525_v56, %v2509_v0  ;;  %v7242_v56 = vld [vmem:[#allocation112_spill] sm:$0xff]  ;;  %v7243_v0 = vld [vmem:[#allocation51_spill] sm:$0xff] }
 0x32f   :  { %3923 = vrcp.f32 %v7234_v51  ;;  %v2573_v54 = vmul.f32 %v3912_v21, %v7236_v14  ;;  %v2353_v41 = vpop.xlane.xlu0 %2352  ;;  %v7239_v21 = vld [vmem:[#allocation105_spill] sm:$0xff]  ;;  %v7240_v51 = vld [vmem:[#allocation46_spill] sm:$0xff]  ;;  %v1782_v44 = vsub.f32 %v7243_v0, %v7242_v56 }
 0x330   :  { %v3914_v35 = vpop.eup %3913  ;;  %3925 = vrcp.f32 %v2353_v41  ;;  %v2293_v47 = vpop.xlane.xlu1 %2292  ;;  %v1797_v1 = vsub.f32 %v7240_v51, %v7239_v21 }
 0x331   :  { %v3916_v5 = vpop.eup %3915  ;;  %v2556_v63 = vmul.f32 %v3914_v35, %v7237_v18  ;;  %v2323_v16 = vpop.xlane.xlu2 %2322  ;;  %v2695_v42 = vadd.f32 %v2589_v53, %v2573_v54  ;;  %v7244_v53 = vld [vmem:[#allocation104_spill] sm:$0xff] }
 0x332   :  { %v2541_v6 = vmul.f32 %v3916_v5, %v7238_v26  ;;  %3927 = vrcp.f32 %v2323_v16  ;;  %v6293_v10 = vpop.eup %3917  ;;  %v1986_v54 = vmul.f32 1.442695, %v1797_v1  ;;  %v1956_v26 = vmul.f32 1.442695, %v1782_v44  ;;  %v7249_v1 = vld [vmem:[#allocation154_spill] sm:$0xff]  ;;  %v7252_v44 = vld [vmem:[#allocation157_spill] sm:$0xff] }
 0x333   :  { %3929 = vpow2.f32 %v2112_v4  ;;  %v2646_v58 = vadd.f32 %v6111_v25, %v2556_v63  ;;  %v6296_v55 = vpop.eup %3919  ;;  %v7245_v4 = vld [vmem:[#allocation35_spill] sm:$0xff]  ;;  %v7246_v25 = vld [vmem:[#allocation148_spill] sm:$0xff] }
 0x334   :  { %3931 = vpow2.f32 %v2082_v9  ;;  %v6300_v18 = vadd.f32 %v2647_v11, %v2541_v6  ;;  %v6302_v35 = vpop.eup %3921  ;;  %2274 = vadd.xlane.f32.xlu0 %v6296_v55  ;;  %v1814_v63 = vsub.f32 %v7246_v25, %v7245_v4 }
 0x335   :  { %7241 = vst [vmem:[#allocation126_spill] sm:$0xff] %v6302_v35  ;;  %3933 = vrcp.f32 %v7244_v53  ;;  %v3924_v16 = vpop.eup %3923  ;;  %2240 = vadd.xlane.f32.xlu2 %v6293_v10  ;;  %2210 = vadd.xlane.f32.xlu1 %v6302_v35  ;;  %v7248_v53 = vld [vmem:[#allocation13_spill] sm:$0xff] }
 0x336   :  { %3935 = vpow2.f32 %v2052_v2  ;;  %v3926_v9 = vpop.eup %3925  ;;  %v2020_v56 = vmul.f32 1.442695, %v1814_v63  ;;  %v1861_v4 = vsub.f32 %v7249_v1, %v7248_v53  ;;  %v7257_v53 = vld [vmem:[#allocation107_spill] sm:$0xff] }
 0x337   :  { %3937 = vrcp.f32 %v2293_v47  ;;  %v2620_v41 = vmul.f32 %v3926_v9, %v5936_v7  ;;  %v2261_v5 = vpop.xlane.xlu0 %2260  ;;  %v2510_v1 = vmul.f32 %v3924_v16, %v7257_v53 }
 0x338   :  { %v3928_v14 = vpop.eup %3927  ;;  %3939 = vrcp.f32 %v2261_v5  ;;  %v2197_v51 = vpop.xlane.xlu1 %2196 }
 0x339   :  { %v6313_v11 = vpop.eup %3929  ;;  %v2605_v6 = vmul.f32 %v3928_v14, %v5940_v62  ;;  %v2227_v21 = vpop.xlane.xlu2 %2226  ;;  %v2694_v0 = vadd.f32 %v6269_v19, %v2620_v41  ;;  %v7251_v62 = vld [vmem:[#allocation82_spill] sm:$0xff]  ;;  %v6327_v14 = vmul.f32 0.25, %v2646_v58  ;;  %v7253_v19 = vld [vmem:[#allocation45_spill] sm:$0xff]  ;;  %v7254_v41 = vld [vmem:[#allocation160_spill] sm:$0xff] }
 0x33a   :  { %v6316_v2 = vpop.eup %3931  ;;  %3941 = vrcp.f32 %v2227_v21  ;;  %v1846_v9 = vsub.f32 %v7252_v44, %v7251_v62  ;;  %v1831_v21 = vsub.f32 %v7254_v41, %v7253_v19 }
 0x33b   :  { %7247 = vst [vmem:[#allocation120_spill] sm:$0xff] %v6316_v2  ;;  %v3934_v47 = vpop.eup %3933  ;;  %3943 = vrcp.f32 %v2197_v51  ;;  %v6321_v7 = vadd.f32 %v2695_v42, %v2605_v6  ;;  %v6329_v5 = vmul.f32 0.25, %v2694_v0  ;;  %v7255_v42 = vld [vmem:[#allocation166_spill] sm:$0xff]  ;;  %v2114_v0 = vmul.f32 1.442695, %v1861_v4 }
 0x33c   :  { %v6323_v25 = vpop.eup %3935  ;;  %3945 = vpow2.f32 %v1986_v54  ;;  %2368 = vadd.xlane.f32.xlu0 %v6313_v11  ;;  %v2526_v6 = vmul.f32 %v3934_v47, %v7255_v42  ;;  %v7256_v51 = vld [vmem:[#allocation162_spill] sm:$0xff]  ;;  %v2084_v62 = vmul.f32 1.442695, %v1846_v9  ;;  %v2054_v41 = vmul.f32 1.442695, %v1831_v21  ;;  %v7260_v21 = vld [vmem:[#allocation53_spill] sm:$0xff] }
 0x33d   :  { %7250 = vst [vmem:[#allocation122_spill] sm:$0xff] %v6323_v25  ;;  %v3938_v63 = vpop.eup %3937  ;;  %3947 = vpow2.f32 %v1956_v26  ;;  %2338 = vadd.xlane.f32.xlu2 %v6316_v2  ;;  %2308 = vadd.xlane.f32.xlu1 %v6323_v25 }
 0x33e   :  { %3949 = vpow2.f32 %v2020_v56  ;;  %v3940_v54 = vpop.eup %3939  ;;  %v2590_v44 = vmul.f32 %v3938_v63, %v5942_v31  ;;  %v7259_v63 = vld [vmem:[#allocation116_spill] sm:$0xff] }
 0x33f   :  { %3951 = vrcp.f32 %v7256_v51  ;;  %v2574_v56 = vmul.f32 %v3940_v54, %v5963_v38  ;;  %v2355_v47 = vpop.xlane.xlu0 %2354  ;;  %v2650_v51 = vadd.f32 %v2526_v6, %v2510_v1  ;;  %v1798_v54 = vsub.f32 %v7260_v21, %v7259_v63 }
 0x340   :  { %v3942_v26 = vpop.eup %3941  ;;  %3953 = vrcp.f32 %v2355_v47  ;;  %v2295_v58 = vpop.xlane.xlu1 %2294 }
 0x341   :  { %v3944_v19 = vpop.eup %3943  ;;  %v2557_v42 = vmul.f32 %v3942_v26, %v5959_v22  ;;  %v2325_v25 = vpop.xlane.xlu2 %2324  ;;  %v2698_v4 = vadd.f32 %v2590_v44, %v2574_v56  ;;  %v1988_v44 = vmul.f32 1.442695, %v1798_v54 }
 0x342   :  { %v6344_v35 = vpop.eup %3945  ;;  %v2542_v2 = vmul.f32 %v3944_v19, %v5968_v8  ;;  %3955 = vrcp.f32 %v2325_v25  ;;  %v7261_v8 = vld [vmem:[#allocation88_spill] sm:$0xff]  ;;  %v7262_v25 = vld [vmem:[#allocation158_spill] sm:$0xff] }
 0x343   :  { %v6347_v16 = vpop.eup %3947  ;;  %3957 = vpow2.f32 %v2114_v0  ;;  %v2649_v31 = vadd.f32 %v6300_v18, %v2557_v42  ;;  %v1815_v6 = vsub.f32 %v7262_v25, %v7261_v8  ;;  %v7263_v0 = vld [vmem:[#allocation121_spill] sm:$0xff]  ;;  %v7267_v8 = vld [vmem:[#allocation78_spill] sm:$0xff] }
 0x344   :  { %7258 = vst [vmem:[#allocation73_spill] sm:$0xff] %v6347_v16  ;;  %v6350_v38 = vpop.eup %3949  ;;  %3959 = vpow2.f32 %v2084_v62  ;;  %v6352_v9 = vadd.f32 %v2650_v51, %v2542_v2  ;;  %v7264_v2 = vld [vmem:[#allocation60_spill] sm:$0xff]  ;;  %v7268_v25 = vld [vmem:[#allocation153_spill] sm:$0xff] }
 0x345   :  { %v3952_v22 = vpop.eup %3951  ;;  %3961 = vrcp.f32 %v5957_v28  ;;  %2276 = vadd.xlane.f32.xlu0 %v6350_v38  ;;  %2242 = vadd.xlane.f32.xlu2 %v6344_v35  ;;  %v1783_v26 = vsub.f32 %v7264_v2, %v7263_v0  ;;  %v2022_v42 = vmul.f32 1.442695, %v1815_v6  ;;  %v1862_v54 = vsub.f32 %v7268_v25, %v7267_v8  ;;  %v7269_v2 = vld [vmem:[#allocation15_spill] sm:$0xff]  ;;  %v7275_v8 = vld [vmem:[#allocation56_spill] sm:$0xff] }
 0x346   :  { %3963 = vpow2.f32 %v2054_v41  ;;  %2212 = vadd.xlane.f32.xlu1 %v6347_v16  ;;  %v3954_v18 = vpop.eup %3953  ;;  %v7270_v6 = vld [vmem:[#allocation159_spill] sm:$0xff] }
 0x347   :  { %3965 = vrcp.f32 %v2295_v58  ;;  %v2621_v1 = vmul.f32 %v3954_v18, %v5991_v34  ;;  %v2263_v62 = vpop.xlane.xlu0 %2262  ;;  %v1958_v58 = vmul.f32 1.442695, %v1783_v26  ;;  %v6375_v18 = vmul.f32 0.25, %v2649_v31 }
 0x348   :  { %v3956_v53 = vpop.eup %3955  ;;  %3967 = vrcp.f32 %v2263_v62  ;;  %v2199_v19 = vpop.xlane.xlu1 %2198  ;;  %v7271_v62 = vld [vmem:[#allocation47_spill] sm:$0xff] }
 0x349   :  { %v6365_v28 = vpop.eup %3957  ;;  %v2606_v56 = vmul.f32 %v3956_v53, %v5993_v17  ;;  %v2229_v47 = vpop.xlane.xlu2 %2228  ;;  %v2697_v51 = vadd.f32 %v6321_v7, %v2621_v1  ;;  %v1847_v53 = vsub.f32 %v7270_v6, %v7269_v2  ;;  %v7272_v7 = vld [vmem:[#allocation163_spill] sm:$0xff] }
 0x34a   :  { %v6368_v41 = vpop.eup %3959  ;;  %3969 = vrcp.f32 %v2229_v47  ;;  %v1863_v1 = vsub.f32 %v7272_v7, %v7271_v62  ;;  %v7274_v47 = vld [vmem:[#allocation108_spill] sm:$0xff] }
 0x34b   :  { %7265 = vst [vmem:[#allocation143_spill] sm:$0xff] %v6368_v41  ;;  %v3962_v63 = vpop.eup %3961  ;;  %3971 = vrcp.f32 %v2199_v19  ;;  %v2699_v21 = vadd.f32 %v2698_v4, %v2606_v56  ;;  %v6377_v17 = vmul.f32 0.25, %v2697_v51  ;;  %v7273_v4 = vld [vmem:[#allocation168_spill] sm:$0xff]  ;;  %v2511_v19 = vmul.f32 %v3952_v22, %v7274_v47 }
 0x34c   :  { %v6371_v34 = vpop.eup %3963  ;;  %3973 = vpow2.f32 %v1988_v44  ;;  %v2527_v26 = vmul.f32 %v3962_v63, %v7273_v4  ;;  %v2116_v51 = vmul.f32 1.442695, %v1862_v54  ;;  %v2086_v63 = vmul.f32 1.442695, %v1847_v53 }
 0x34d   :  { %7266 = vst [vmem:[#allocation132_spill] sm:$0xff] %v6371_v34  ;;  %v3966_v0 = vpop.eup %3965  ;;  %2370 = vadd.xlane.f32.xlu0 %v6365_v28  ;;  %3975 = vpow2.f32 %v2022_v42  ;;  %2340 = vadd.xlane.f32.xlu2 %v6368_v41  ;;  %v2118_v62 = vmul.f32 1.442695, %v1863_v1  ;;  %v7278_v1 = vld [vmem:[#allocation54_spill] sm:$0xff] }
 0x34e   :  { %2310 = vadd.xlane.f32.xlu1 %v6371_v34  ;;  %v3968_v56 = vpop.eup %3967  ;;  %3977 = vpow2.f32 %v1958_v58  ;;  %v2591_v25 = vmul.f32 %v3966_v0, %v7275_v8  ;;  %v2653_v31 = vadd.f32 %v2527_v26, %v2511_v19  ;;  %v7276_v58 = vld [vmem:[#allocation52_spill] sm:$0xff] }
 0x34f   :  { %v2575_v2 = vmul.f32 %v3968_v56, %v6013_v36  ;;  %v2357_v42 = vpop.xlane.xlu0 %2356 }
 0x350   :  { %v3970_v44 = vpop.eup %3969  ;;  %3979 = vrcp.f32 %v2357_v42  ;;  %v2297_v34 = vpop.xlane.xlu1 %2296 }
 0x351   :  { %v3972_v6 = vpop.eup %3971  ;;  %v2558_v7 = vmul.f32 %v3970_v44, %v5973_v15  ;;  %v2327_v4 = vpop.xlane.xlu2 %2326  ;;  %v2701_v16 = vadd.f32 %v2591_v25, %v2575_v2  ;;  %v7277_v15 = vld [vmem:[#allocation117_spill] sm:$0xff] }
 0x352   :  { %v2543_v41 = vmul.f32 %v3972_v6, %v7276_v58  ;;  %3981 = vrcp.f32 %v2327_v4  ;;  %v6394_v22 = vpop.eup %3973  ;;  %v1799_v26 = vsub.f32 %v7278_v1, %v7277_v15 }
 0x353   :  { %v2652_v54 = vadd.f32 %v6352_v9, %v2558_v7  ;;  %v6397_v0 = vpop.eup %3975  ;;  %3983 = vpow2.f32 %v2116_v51 }
 0x354   :  { %v2654_v36 = vadd.f32 %v2653_v31, %v2543_v41  ;;  %v6399_v53 = vpop.eup %3977  ;;  %3985 = vpow2.f32 %v2086_v63  ;;  %v1990_v8 = vmul.f32 1.442695, %v1799_v26 }
 0x355   :  { %2278 = vadd.xlane.f32.xlu0 %v6397_v0  ;;  %3987 = vpow2.f32 %v2118_v62  ;;  %2244 = vadd.xlane.f32.xlu2 %v6394_v22 }
 0x356   :  { %2214 = vadd.xlane.f32.xlu1 %v6399_v53  ;;  %v3980_v56 = vpop.eup %3979  ;;  %3989 = vrcp.f32 %v2297_v34  ;;  %v6414_v34 = vmul.f32 0.25, %v2652_v54 }
 0x357   :  { %v2622_v44 = vmul.f32 %v3980_v56, %v6007_v46  ;;  %v2265_v47 = vpop.xlane.xlu0 %2264 }
 0x358   :  { %v3982_v9 = vpop.eup %3981  ;;  %3991 = vrcp.f32 %v2265_v47  ;;  %v2201_v19 = vpop.xlane.xlu1 %2200 }
 0x359   :  { %v2607_v41 = vmul.f32 %v3982_v9, %v6011_v57  ;;  %v2231_v31 = vpop.xlane.xlu2 %2230  ;;  %v6408_v51 = vpop.eup %3983  ;;  %v2700_v25 = vadd.f32 %v2699_v21, %v2622_v44  ;;  %v7282_v9 = vld [vmem:[#allocation19_spill] sm:$0xff]  ;;  %v7283_v44 = vld [vmem:[#allocation164_spill] sm:$0xff] }
 0x35a   :  { %v6410_v2 = vpop.eup %3985  ;;  %3993 = vrcp.f32 %v2231_v31 }
 0x35b   :  { %7279 = vst [vmem:[#allocation64_spill] sm:$0xff] %v6410_v2  ;;  %v2702_v42 = vadd.f32 %v2701_v16, %v2607_v41  ;;  %v6412_v6 = vpop.eup %3987  ;;  %v6416_v63 = vmul.f32 0.25, %v2700_v25  ;;  %3995 = vpow2.f32 %v1990_v8 }
 0x35c   :  { %7280 = vst [vmem:[#allocation144_spill] sm:$0xff] %v6412_v6  ;;  %v3990_v46 = vpop.eup %3989 }
 0x35d   :  { %2372 = vadd.xlane.f32.xlu0 %v6408_v51  ;;  %2342 = vadd.xlane.f32.xlu2 %v6410_v2  ;;  %v2592_v16 = vmul.f32 %v3990_v46, %v6036_v12 }
 0x35e   :  { %2374 = vadd.xlane.f32.xlu1 %v6412_v6  ;;  %v3992_v21 = vpop.eup %3991 }
 0x35f   :  { %v2576_v62 = vmul.f32 %v3992_v21, %v6067_v43  ;;  %v2359_v7 = vpop.xlane.xlu0 %2358 }
 0x360   :  { %v3994_v4 = vpop.eup %3993  ;;  %3997 = vrcp.f32 %v2359_v7  ;;  %v6425_v54 = vpop.xlane.xlu1 %2298  ;;  %v7284_v7 = vld [vmem:[#allocation30_spill] sm:$0xff] }
 0x361   :  { %v2329_v58 = vpop.xlane.xlu2 %2328  ;;  %v2704_v15 = vadd.f32 %v2592_v16, %v2576_v62  ;;  %v6427_v1 = vpop.eup %3995  ;;  %v2559_v26 = vmul.f32 %v3994_v4, %v5977_v45  ;;  %3999 = vrcp.f32 %v7282_v9 }
 0x362   :  { %7281 = vst [vmem:[#allocation70_spill] sm:$0xff] %v6427_v1  ;;  %4001 = vrcp.f32 %v7283_v44 }
 0x363   :  { %v2655_v47 = vadd.f32 %v2654_v36, %v2559_v26  ;;  %4003 = vrcp.f32 %v2201_v19 }
 0x364   :  { %4005 = vrcp.f32 %v2329_v58 }
 0x365   :  { %2246 = vadd.xlane.f32.xlu0 %v6427_v1  ;;  %v6436_v25 = vmul.f32 0.25, %v2655_v47 }
 0x366   :  { %v3998_v56 = vpop.eup %3997 }
 0x367   :  { %v2623_v12 = vmul.f32 %v3998_v56, %v6089_v39  ;;  %v6434_v43 = vpop.xlane.xlu0 %2266  ;;  %v4000_v46 = vpop.eup %3999 }
 0x368   :  { %v2203_v31 = vpop.xlane.xlu1 %2202  ;;  %v4002_v21 = vpop.eup %4001  ;;  %v2528_v4 = vmul.f32 %v4000_v46, %v7284_v7 }
 0x369   :  { %v2233_v41 = vpop.xlane.xlu2 %2232  ;;  %v2703_v8 = vadd.f32 %v2702_v42, %v2623_v12  ;;  %v4004_v62 = vpop.eup %4003  ;;  %v7285_v42 = vld [vmem:[#allocation115_spill] sm:$0xff] }
 0x36a   :  { %4007 = vrcp.f32 %v2233_v41  ;;  %v4006_v39 = vpop.eup %4005  ;;  %v2512_v56 = vmul.f32 %v4002_v21, %v7285_v42  ;;  %v2544_v9 = vmul.f32 %v4004_v62, %v5984_v13 }
 0x36b   :  { %v6438_v45 = vmul.f32 0.25, %v2703_v8  ;;  %v2608_v12 = vmul.f32 %v4006_v39, %v6091_v59 }
 0x36c   :  { %v2656_v44 = vadd.f32 %v2528_v4, %v2512_v56  ;;  %v7289_v56 = vpack.i.bf16 %v6277_v33, %v6275_v30  ;;  %v7292_v30 = vld [vmem:[#allocation55_spill] sm:$0xff] }
 0x36d   :  { %v2705_v57 = vadd.f32 %v2704_v15, %v2608_v12  ;;  %v7291_v12 = vpack.i.bf16 %v6377_v17, %v6375_v18 }
 0x36e   :  { %v2657_v41 = vadd.f32 %v2656_v44, %v2544_v9 }
 0x36f   :  { %v2361_v36 = vpop.xlane.xlu0 %2360 }
 0x370   :  { %v4008_v19 = vpop.eup %4007  ;;  %4009 = vrcp.f32 %v2361_v36  ;;  %v6443_v58 = vpop.xlane.xlu1 %2300 }
 0x371   :  { %v2331_v26 = vpop.xlane.xlu2 %2330  ;;  %v2560_v47 = vmul.f32 %v4008_v19, %v6113_v40  ;;  %v7288_v19 = vpack.i.bf16 %v6231_v29, %v6229_v50  ;;  %v7290_v50 = vpack.i.bf16 %v6329_v5, %v6327_v14  ;;  %4011 = vrcp.f32 %v7292_v30 }
 0x372   :  { %v7294_v5 = vpack.i.bf16 %v6416_v63, %v6414_v34 }
 0x373   :  { %v2658_v7 = vadd.f32 %v2657_v41, %v2560_v47  ;;  %v7293_v47 = vld [vmem:[#allocation109_spill] sm:$0xff] }
 0x374   :  { %4013 = vrcp.f32 %v7293_v47 }
 0x375   :  { %v6450_v2 = vmul.f32 0.25, %v2658_v7  ;;  %4015 = vrcp.f32 %v6434_v43 }
 0x376   :  { %v4010_v8 = vpop.eup %4009  ;;  %4017 = vrcp.f32 %v6425_v54 }
 0x377   :  { %v2624_v16 = vmul.f32 %v4010_v8, %v6132_v48  ;;  %v2269_v46 = vpop.xlane.xlu0 %2268  ;;  %v7286_v48 = vpack.i.bf16 %v6160_v32, %v6158_v61  ;;  %4019 = vrcp.f32 %v2331_v26  ;;  %v4012_v18 = vpop.eup %4011  ;;  %v7295_v8 = vld [vmem:[#allocation32_spill] sm:$0xff] }
 0x378   :  { %v2205_v1 = vpop.xlane.xlu1 %2204  ;;  %4021 = vrcp.f32 %v2203_v31 }
 0x379   :  { %v2235_v36 = vpop.xlane.xlu2 %2234  ;;  %v2706_v6 = vadd.f32 %v2705_v57, %v2624_v16 }
 0x37a   :  { %v4014_v17 = vpop.eup %4013 }
 0x37b   :  { %v6452_v21 = vmul.f32 0.25, %v2706_v6  ;;  %v7287_v6 = vpack.i.bf16 %v6201_v24, %v6199_v37  ;;  %v4016_v7 = vpop.eup %4015 }
 0x37c   :  { %v2577_v26 = vmul.f32 %v4016_v7, %v6115_v27 }
 0x37d   :  { %v3463_v13 = vpack.i.bf16 %v6452_v21, %v6450_v2 }
 0x37f   :  { %v2363_v59 = vpop.xlane.xlu0 %2362 }
 0x380   :  { %v6456_v40 = vpop.xlane.xlu1 %2302  ;;  %4023 = vrcp.f32 %v2363_v59 }
 0x381   :  { %v2333_v62 = vpop.xlane.xlu2 %2332  ;;  %4025 = vrcp.f32 %v7295_v8 }
 0x382   :  { %4027 = vrcp.f32 %v2235_v36 }
 0x386   :  { %3448 = vxpose.xlu2.b32.start [1/16] %v7286_v48, 128  ;;  %v4018_v48 = vpop.eup %4017 }
 0x387   :  { %v6461_v39 = vpop.xlane.xlu0 %2270  ;;  %v4020_v54 = vpop.eup %4019  ;;  %v2593_v36 = vmul.f32 %v4018_v48, %v6096_v20 }
 0x388   :  { %v6463_v57 = vpop.xlane.xlu1 %2206  ;;  %v4022_v31 = vpop.eup %4021 }
 0x389   :  { %v2237_v15 = vpop.xlane.xlu2 %2236  ;;  %v4024_v63 = vpop.eup %4023  ;;  %v2707_v47 = vadd.f32 %v2593_v36, %v2577_v26 }
 0x38a   :  { %v4026_v59 = vpop.eup %4025 }
 0x38e   :  { %3450 = vxpose.xlu2.b32.cont [2/16] %v7287_v6, 128  ;;  %v7296_v6 = vld [vmem:[#allocation103_spill] sm:$0xff] }
 0x38f   :  { %v2365_v16 = vpop.xlane.xlu0 %2364  ;;  %4029 = vrcp.f32 %v7296_v6  ;;  %v7300_v6 = vld [vmem:[#allocation43_spill] sm:$0xff] }
 0x390   :  { %v6475_v61 = vpop.xlane.xlu1 %2304  ;;  %4031 = vrcp.f32 %v2269_v46  ;;  %v7298_v46 = vpack.i.bf16 %v6438_v45, %v6436_v25 }
 0x391   :  { %v6468_v4 = vpop.xlane.xlu2 %2334  ;;  %4033 = vrcp.f32 %v6443_v58  ;;  %v7299_v58 = vld [vmem:[#allocation127_spill] sm:$0xff] }
 0x392   :  { %4035 = vrcp.f32 %v2333_v62  ;;  %v2513_v30 = vmul.f32 %v4012_v18, %v7299_v58  ;;  %v2545_v62 = vmul.f32 %v4022_v31, %v6119_v49  ;;  %v7302_v31 = vld [vmem:[#allocation66_spill] sm:$0xff] }
 0x393   :  { %4037 = vrcp.f32 %v2205_v1 }
 0x394   :  { %4039 = vrcp.f32 %v2365_v16 }
 0x395   :  { %4041 = vrcp.f32 %v2237_v15 }
 0x396   :  { %3452 = vxpose.xlu2.b32.cont [3/16] %v7288_v19, 128  ;;  %v7297_v19 = vld [vmem:[#allocation169_spill] sm:$0xff]  ;;  %4043 = vrcp.f32 %v6461_v39 }
 0x397   :  { %v6473_v42 = vpop.xlane.xlu0 %2272  ;;  %4045 = vrcp.f32 %v6456_v40 }
 0x398   :  { %v6484_v37 = vpop.xlane.xlu1 %2208  ;;  %4047 = vrcp.f32 %v6468_v4 }
 0x399   :  { %v6477_v32 = vpop.xlane.xlu2 %2238  ;;  %4049 = vrcp.f32 %v6463_v57 }
 0x39e   :  { %3454 = vxpose.xlu2.b32.cont [4/16] %v7289_v56, 128  ;;  %v2529_v56 = vmul.f32 %v4014_v17, %v7297_v19 }
 0x39f   :  { %v6482_v9 = vpop.xlane.xlu0 %2366 }
 0x3a0   :  { %v6493_v44 = vpop.xlane.xlu1 %2306  ;;  %v2659_v1 = vadd.f32 %v2529_v56, %v2513_v30  ;;  %v7304_v56 = vld [vmem:[#allocation23_spill] sm:$0xff]  ;;  %4051 = vrcp.f32 %v6482_v9  ;;  %v7306_v30 = vld [vmem:[#allocation156_spill] sm:$0xff] }
 0x3a1   :  { %v6486_v24 = vpop.xlane.xlu2 %2336  ;;  %4053 = vrcp.f32 %v6477_v32 }
 0x3a2   :  { %4055 = vrcp.f32 %v6473_v42 }
 0x3a3   :  { %4057 = vrcp.f32 %v6475_v61 }
 0x3a6   :  { %3456 = vxpose.xlu2.b32.cont [5/16] %v7290_v50, 128  ;;  %v2609_v50 = vmul.f32 %v4020_v54, %v6134_v23  ;;  %v7301_v54 = vld [vmem:[#allocation62_spill] sm:$0xff] }
 0x3a7   :  { %v6491_v29 = vpop.xlane.xlu0 %2274 }
 0x3a8   :  { %v6506_v14 = vpop.xlane.xlu1 %2210  ;;  %v2708_v25 = vadd.f32 %v2707_v47, %v2609_v50  ;;  %v7305_v50 = vld [vmem:[#allocation110_spill] sm:$0xff] }
 0x3a9   :  { %v6498_v33 = vpop.xlane.xlu2 %2240 }
 0x3ae   :  { %3458 = vxpose.xlu2.b32.cont [6/16] %v7291_v12, 128  ;;  %v4028_v12 = vpop.eup %4027  ;;  %4059 = vrcp.f32 %v6486_v24 }
 0x3af   :  { %v6502_v41 = vpop.xlane.xlu0 %2368  ;;  %v4030_v27 = vpop.eup %4029  ;;  %v2561_v8 = vmul.f32 %v4028_v12, %v6149_v52  ;;  %4061 = vrcp.f32 %v6484_v37 }
 0x3b0   :  { %v6528_v17 = vpop.xlane.xlu1 %2308  ;;  %v4032_v20 = vpop.eup %4031  ;;  %v2530_v15 = vmul.f32 %v4030_v27, %v7300_v6  ;;  %4063 = vrcp.f32 %v6502_v41  ;;  %v7311_v6 = vld [vmem:[#allocation119_spill] sm:$0xff] }
 0x3b1   :  { %v6513_v43 = vpop.xlane.xlu2 %2338  ;;  %v4034_v23 = vpop.eup %4033  ;;  %v2578_v18 = vmul.f32 %v4032_v20, %v6154_v60  ;;  %4065 = vrcp.f32 %v6498_v33  ;;  %v7315_v33 = vld [vmem:[#allocation125_spill] sm:$0xff] }
 0x3b2   :  { %v4036_v45 = vpop.eup %4035  ;;  %v2594_v52 = vmul.f32 %v4034_v23, %v7301_v54  ;;  %4067 = vrcp.f32 %v6491_v29 }
 0x3b3   :  { %v4038_v16 = vpop.eup %4037  ;;  %v2610_v26 = vmul.f32 %v4036_v45, %v7302_v31  ;;  %v7309_v45 = vld [vmem:[#allocation106_spill] sm:$0xff]  ;;  %4069 = vrcp.f32 %v6493_v44 }
 0x3b4   :  { %v4040_v48 = vpop.eup %4039  ;;  %v2546_v36 = vmul.f32 %v4038_v16, %v7304_v56  ;;  %v2710_v4 = vadd.f32 %v2594_v52, %v2578_v18  ;;  %4071 = vrcp.f32 %v6513_v43 }
 0x3b5   :  { %v4042_v40 = vpop.eup %4041  ;;  %4073 = vrcp.f32 %v6506_v14 }
 0x3b6   :  { %3460 = vxpose.xlu2.b32.cont [7/16] %v7294_v5, 128  ;;  %v2625_v5 = vmul.f32 %v4024_v63, %v6175_v3  ;;  %v2660_v3 = vadd.f32 %v2659_v1, %v2545_v62  ;;  %v7303_v63 = vld [vmem:[#allocation128_spill] sm:$0xff]  ;;  %v4044_v27 = vpop.eup %4043  ;;  %v2562_v2 = vmul.f32 %v4042_v40, %v7306_v30  ;;  %v2711_v47 = vadd.f32 %v2710_v4, %v2610_v26  ;;  %v7312_v26 = vld [vmem:[#allocation111_spill] sm:$0xff] }
 0x3b7   :  { %v2514_v19 = vmul.f32 %v4026_v59, %v7303_v63  ;;  %v4046_v58 = vpop.eup %4045 }
 0x3b8   :  { %v6517_v34 = vpop.xlane.xlu0 %2276  ;;  %v2709_v7 = vadd.f32 %v2708_v25, %v2625_v5  ;;  %v2661_v60 = vadd.f32 %v2660_v3, %v2561_v8  ;;  %v4048_v59 = vpop.eup %4047  ;;  %v7307_v5 = vld [vmem:[#allocation102_spill] sm:$0xff]  ;;  %v7308_v8 = vld [vmem:[#allocation24_spill] sm:$0xff] }
 0x3b9   :  { %v6534_v49 = vpop.xlane.xlu2 %2242  ;;  %v2662_v57 = vadd.f32 %v2530_v15, %v2514_v19  ;;  %v6552_v21 = vpop.xlane.xlu1 %2212  ;;  %v2579_v20 = vmul.f32 %v4044_v27, %v7307_v5  ;;  %v2595_v25 = vmul.f32 %v4046_v58, %v7308_v8  ;;  %v2611_v16 = vmul.f32 %v4048_v59, %v7309_v45  ;;  %v7313_v19 = vld [vmem:[#allocation57_spill] sm:$0xff]  ;;  %v7318_v8 = vld [vmem:[#allocation20_spill] sm:$0xff] }
 0x3ba   :  { %v2753_v12 = vmul.f32 0.25, %v2709_v7  ;;  %v4050_v9 = vpop.eup %4049  ;;  %v7310_v7 = vld [vmem:[#allocation99_spill] sm:$0xff]  ;;  %v7316_v58 = vld [vmem:[#allocation113_spill] sm:$0xff] }
 0x3bb   :  { %v2663_v62 = vadd.f32 %v2662_v57, %v2546_v36  ;;  %v4052_v32 = vpop.eup %4051  ;;  %v2713_v61 = vadd.f32 %v2595_v25, %v2579_v20  ;;  %v7314_v36 = vld [vmem:[#allocation114_spill] sm:$0xff] }
 0x3bc   :  { %v4054_v3 = vpop.eup %4053  ;;  %v2627_v15 = vmul.f32 %v4052_v32, %v7311_v6  ;;  %v7321_v6 = vld [vmem:[#allocation126_spill] sm:$0xff] }
 0x3bd   :  { %v2664_v42 = vadd.f32 %v2663_v62, %v2562_v2  ;;  %v4056_v52 = vpop.eup %4055  ;;  %v2563_v37 = vmul.f32 %v4054_v3, %v7312_v26  ;;  %v2714_v40 = vadd.f32 %v2713_v61, %v2611_v16 }
 0x3be   :  { %3462 = vxpose.xlu2.b32.cont [8/16] %v7298_v46, 128  ;;  %v2626_v46 = vmul.f32 %v4040_v48, %v7305_v50  ;;  %v2547_v48 = vmul.f32 %v4050_v9, %v7310_v7  ;;  %v4058_v31 = vpop.eup %4057  ;;  %v2580_v4 = vmul.f32 %v4056_v52, %v7314_v36 }
 0x3bf   :  { %v4060_v63 = vpop.eup %4059  ;;  %v2596_v57 = vmul.f32 %v4058_v31, %v7315_v33 }
 0x3c0   :  { %v6541_v39 = vpop.xlane.xlu0 %2370  ;;  %v2712_v1 = vadd.f32 %v2711_v47, %v2626_v46  ;;  %v2666_v56 = vadd.f32 %v7313_v19, %v2547_v48  ;;  %v4062_v41 = vpop.eup %4061  ;;  %v2612_v30 = vmul.f32 %v4060_v63, %v7316_v58  ;;  %v7325_v58 = vld [vmem:[#allocation73_spill] sm:$0xff] }
 0x3c1   :  { %v2341_v18 = vpop.xlane.xlu2 %2340  ;;  %v2311_v50 = vpop.xlane.xlu1 %2310  ;;  %4075 = vrcp.f32 %v6541_v39  ;;  %v2716_v44 = vadd.f32 %v2596_v57, %v2580_v4 }
 0x3c2   :  { %v2754_v24 = vmul.f32 0.25, %v2712_v1  ;;  %v4064_v27 = vpop.eup %4063  ;;  %v2667_v29 = vadd.f32 %v2666_v56, %v2563_v37  ;;  %4077 = vrcp.f32 %v6534_v49  ;;  %v7319_v49 = vld [vmem:[#allocation136_spill] sm:$0xff] }
 0x3c3   :  { %v4066_v2 = vpop.eup %4065  ;;  %v2628_v59 = vmul.f32 %v4064_v27, %v6313_v11  ;;  %v2717_v1 = vadd.f32 %v2716_v44, %v2612_v30  ;;  %4079 = vrcp.f32 %v6517_v34 }
 0x3c4   :  { %v4068_v5 = vpop.eup %4067  ;;  %v2564_v20 = vmul.f32 %v4066_v2, %v6293_v10  ;;  %v2739_v14 = vmul.f32 0.25, %v2667_v29  ;;  %4081 = vrcp.f32 %v6528_v17  ;;  %v7320_v10 = vld [vmem:[#allocation120_spill] sm:$0xff] }
 0x3c5   :  { %v4070_v43 = vpop.eup %4069  ;;  %v2581_v45 = vmul.f32 %v4068_v5, %v6296_v55  ;;  %v2718_v16 = vadd.f32 %v2717_v1, %v2628_v59  ;;  %4083 = vrcp.f32 %v2341_v18 }
 0x3c6   :  { %3464 = vxpose.xlu2.b32.cont [9/16] %v3463_v13, 128  ;;  %v2737_v13 = vmul.f32 0.25, %v2661_v60  ;;  %v2738_v60 = vmul.f32 0.25, %v2664_v42  ;;  %v4072_v32 = vpop.eup %4071  ;;  %v2597_v3 = vmul.f32 %v4070_v43, %v7319_v49  ;;  %4085 = vrcp.f32 %v6552_v21 }
 0x3c7   :  { %v4074_v39 = vpop.eup %4073  ;;  %v2613_v7 = vmul.f32 %v4072_v32, %v7320_v10  ;;  %v7327_v32 = vld [vmem:[#allocation132_spill] sm:$0xff] }
 0x3c8   :  { %v3465_v23 = vpack.i.bf16 %v2753_v12, %v2737_v13  ;;  %v6564_v54 = vpop.xlane.xlu0 %2278  ;;  %v3467_v46 = vpack.i.bf16 %v2754_v24, %v2738_v60  ;;  %v2715_v12 = vadd.f32 %v2714_v40, %v2627_v15  ;;  %v7317_v13 = vld [vmem:[#allocation133_spill] sm:$0xff]  ;;  %v4076_v42 = vpop.eup %4075  ;;  %v2549_v15 = vmul.f32 %v4074_v39, %v7321_v6 }
 0x3c9   :  { %v2548_v47 = vmul.f32 %v4062_v41, %v7317_v13  ;;  %v2245_v62 = vpop.xlane.xlu2 %2244  ;;  %v2215_v48 = vpop.xlane.xlu1 %2214  ;;  %v2719_v55 = vadd.f32 %v2597_v3, %v2581_v45  ;;  %v2629_v17 = vmul.f32 %v4076_v42, %v6365_v28  ;;  %v2756_v24 = vmul.f32 0.25, %v2718_v16  ;;  %v7322_v40 = vld [vmem:[#allocation61_spill] sm:$0xff] }
 0x3ca   :  { %v2755_v9 = vmul.f32 0.25, %v2715_v12  ;;  %v4078_v61 = vpop.eup %4077  ;;  %v2672_v63 = vadd.f32 %v7322_v40, %v2549_v15 }
 0x3cb   :  { %v2669_v25 = vadd.f32 %v7318_v8, %v2548_v47  ;;  %v4080_v52 = vpop.eup %4079  ;;  %v2565_v31 = vmul.f32 %v4078_v61, %v6344_v35  ;;  %v2720_v21 = vadd.f32 %v2719_v55, %v2613_v7 }
 0x3cc   :  { %v3469_v11 = vpack.i.bf16 %v2755_v9, %v2739_v14  ;;  %v4082_v18 = vpop.eup %4081  ;;  %v2582_v56 = vmul.f32 %v4080_v52, %v6350_v38 }
 0x3cd   :  { %v2670_v34 = vadd.f32 %v2669_v25, %v2564_v20  ;;  %v4084_v60 = vpop.eup %4083  ;;  %v2721_v36 = vadd.f32 %v2720_v21, %v2629_v17  ;;  %v2673_v27 = vadd.f32 %v2672_v63, %v2565_v31  ;;  %v7326_v20 = vld [vmem:[#allocation22_spill] sm:$0xff]  ;;  %v7328_v25 = vld [vmem:[#allocation64_spill] sm:$0xff] }
 0x3ce   :  { %3466 = vxpose.xlu2.b32.cont [10/16] %v3465_v23, 128  ;;  %v4086_v19 = vpop.eup %4085 }
 0x3cf   :  { %v2740_v37 = vmul.f32 0.25, %v2670_v34  ;;  %v2550_v30 = vmul.f32 %v4086_v19, %v7325_v58  ;;  %v2757_v2 = vmul.f32 0.25, %v2721_v36  ;;  %v2741_v59 = vmul.f32 0.25, %v2673_v27 }
 0x3d0   :  { %v2373_v23 = vpop.xlane.xlu0 %2372 }
 0x3d1   :  { %4087 = vrcp.f32 %v2373_v23  ;;  %v2343_v26 = vpop.xlane.xlu2 %2342  ;;  %v3471_v41 = vpack.i.bf16 %v2756_v24, %v2740_v37  ;;  %v2375_v29 = vpop.xlane.xlu1 %2374  ;;  %v3473_v43 = vpack.i.bf16 %v2757_v2, %v2741_v59  ;;  %v2675_v23 = vadd.f32 %v7326_v20, %v2550_v30 }
 0x3d2   :  { %4089 = vrcp.f32 %v2245_v62 }
 0x3d3   :  { %4091 = vrcp.f32 %v2311_v50  ;;  %v7324_v50 = vld [vmem:[#allocation143_spill] sm:$0xff] }
 0x3d4   :  { %4093 = vrcp.f32 %v6564_v54  ;;  %v2614_v12 = vmul.f32 %v4084_v60, %v7324_v50 }
 0x3d5   :  { %4095 = vrcp.f32 %v2215_v48  ;;  %v7331_v48 = vld [vmem:[#allocation144_spill] sm:$0xff] }
 0x3d6   :  { %3468 = vxpose.xlu2.b32.cont [11/16] %v3467_v46, 128  ;;  %4097 = vrcp.f32 %v2343_v26  ;;  %v7323_v46 = vld [vmem:[#allocation122_spill] sm:$0xff] }
 0x3d7   :  { %v4088_v4 = vpop.eup %4087  ;;  %v2598_v35 = vmul.f32 %v4082_v18, %v7323_v46 }
 0x3d8   :  { %v2247_v28 = vpop.xlane.xlu0 %2246  ;;  %v4090_v33 = vpop.eup %4089  ;;  %v2630_v38 = vmul.f32 %v4088_v4, %v6408_v51 }
 0x3d9   :  { %4099 = vrcp.f32 %v2247_v28  ;;  %v4092_v54 = vpop.eup %4091  ;;  %v2722_v57 = vadd.f32 %v2598_v35, %v2582_v56  ;;  %v2566_v44 = vmul.f32 %v4090_v33, %v6394_v22 }
 0x3da   :  { %v4094_v13 = vpop.eup %4093  ;;  %4101 = vrcp.f32 %v2375_v29  ;;  %v2599_v8 = vmul.f32 %v4092_v54, %v7327_v32 }
 0x3db   :  { %v4096_v47 = vpop.eup %4095  ;;  %v2723_v62 = vadd.f32 %v2722_v57, %v2614_v12  ;;  %v2583_v5 = vmul.f32 %v4094_v13, %v6397_v0  ;;  %v2676_v45 = vadd.f32 %v2675_v23, %v2566_v44  ;;  %v7330_v0 = vld [vmem:[#allocation21_spill] sm:$0xff] }
 0x3dc   :  { %v4098_v9 = vpop.eup %4097  ;;  %v2551_v51 = vmul.f32 %v4096_v47, %v6399_v53 }
 0x3dd   :  { %v2724_v14 = vadd.f32 %v2723_v62, %v2630_v38  ;;  %v2615_v39 = vmul.f32 %v4098_v9, %v7328_v25  ;;  %v2725_v22 = vadd.f32 %v2599_v8, %v2583_v5  ;;  %v2742_v3 = vmul.f32 0.25, %v2676_v45 }
 0x3de   :  { %3470 = vxpose.xlu2.b32.cont [12/16] %v3469_v11, 128  ;;  %v7329_v11 = vld [vmem:[#allocation70_spill] sm:$0xff]  ;;  %v2678_v10 = vadd.f32 %v7330_v0, %v2551_v51 }
 0x3df   :  { %v4100_v1 = vpop.eup %4099  ;;  %v2758_v42 = vmul.f32 0.25, %v2724_v14  ;;  %v2726_v7 = vadd.f32 %v2725_v22, %v2615_v39 }
 0x3e0   :  { %v2567_v16 = vmul.f32 %v4100_v1, %v7329_v11  ;;  %v4102_v49 = vpop.eup %4101 }
 0x3e1   :  { %v2631_v34 = vmul.f32 %v4102_v49, %v7331_v48  ;;  %v3475_v61 = vpack.i.bf16 %v2758_v42, %v2742_v3 }
 0x3e2   :  { %v2679_v6 = vadd.f32 %v2678_v10, %v2567_v16 }
 0x3e3   :  { %v2727_v15 = vadd.f32 %v2726_v7, %v2631_v34 }
 0x3e4   :  { %v2743_v53 = vmul.f32 0.25, %v2679_v6 }
 0x3e5   :  { %v2759_v55 = vmul.f32 0.25, %v2727_v15 }
 0x3e6   :  { %3472 = vxpose.xlu2.b32.cont [13/16] %v3471_v41, 128 }
 0x3e7   :  { %v3477_v17 = vpack.i.bf16 %v2759_v55, %v2743_v53 }
 0x3ee   :  { %3474 = vxpose.xlu2.b32.cont [14/16] %v3473_v43, 128 }
 0x3f6   :  { %3476 = vxpose.xlu2.b32.cont [15/16] %v3475_v61, 128 }
 0x3fe   :  { %3478 = vxpose.xlu2.b32.end [16/16] %v3477_v17, 128 }
 0x41f   :  { %v3479_v24 = vpop.trf.xlu2 }
 0x420   :  { %v3483_v52 = vunpack.i.h.bf16 %v3479_v24  ;;  %v3480_v18 = vunpack.i.l.bf16 %v3479_v24 }
 0x422   :  { %v2842_v31 = vpack.c.bf16 %v3483_v52, %v3483_v52  ;;  %v2826_v26 = vpack.c.bf16 %v3480_v18, %v3480_v18 }
 0x424   :  { %v2874_v19 = vunpack.c.l.b16 %v2826_v26  ;;  %v2935_v28 = vunpack.c.l.b16 %v2842_v31 }
 0x427   :  { %v3484_v37 = vpop.trf.xlu2 }
 0x428   :  { %v3488_v21 = vunpack.i.h.bf16 %v3484_v37  ;;  %v3485_v60 = vunpack.i.l.bf16 %v3484_v37 }
 0x42a   :  { %v2843_v40 = vpack.c.bf16 %v3488_v21, %v3488_v21  ;;  %v2827_v63 = vpack.c.bf16 %v3485_v60, %v3485_v60 }
 0x42c   :  { %v2875_v56 = vunpack.c.l.b16 %v2827_v63  ;;  %v2936_v41 = vunpack.c.l.b16 %v2843_v40 }
 0x42e   :  { %v6607_v36 = vpack.c.b16 %v2875_v56, %v2874_v19  ;;  %v6609_v4 = vpack.c.b16 %v2936_v41, %v2935_v28 }
 0x42f   :  { %v3489_v46 = vpop.trf.xlu2 }
 0x430   :  { %v3493_v35 = vunpack.i.h.bf16 %v3489_v46  ;;  %v3490_v50 = vunpack.i.l.bf16 %v3489_v46 }
 0x432   :  { %v2844_v12 = vpack.c.bf16 %v3493_v35, %v3493_v35  ;;  %v2828_v27 = vpack.c.bf16 %v3490_v50, %v3490_v50 }
 0x434   :  { %v2876_v38 = vunpack.c.l.b16 %v2828_v27  ;;  %v2937_v2 = vunpack.c.l.b16 %v2844_v12 }
 0x437   :  { %v3494_v33 = vpop.trf.xlu2 }
 0x438   :  { %v3498_v54 = vunpack.i.h.bf16 %v3494_v33  ;;  %v3495_v57 = vunpack.i.l.bf16 %v3494_v33 }
 0x43a   :  { %v2845_v58 = vpack.c.bf16 %v3498_v54, %v3498_v54  ;;  %v2829_v30 = vpack.c.bf16 %v3495_v57, %v3495_v57 }
 0x43c   :  { %v2877_v29 = vunpack.c.l.b16 %v2829_v30  ;;  %v2938_v13 = vunpack.c.l.b16 %v2845_v58 }
 0x43e   :  { %v6611_v47 = vpack.c.b16 %v2877_v29, %v2876_v38  ;;  %v6613_v44 = vpack.c.b16 %v2938_v13, %v2937_v2 }
 0x43f   :  { %v3499_v59 = vpop.trf.xlu2 }
 0x440   :  { %v3503_v62 = vunpack.i.h.bf16 %v3499_v59  ;;  %v3500_v9 = vunpack.i.l.bf16 %v3499_v59 }
 0x442   :  { %v2846_v5 = vpack.c.bf16 %v3503_v62, %v3503_v62  ;;  %v2830_v43 = vpack.c.bf16 %v3500_v9, %v3500_v9 }
 0x444   :  { %v2878_v8 = vunpack.c.l.b16 %v2830_v43  ;;  %v2939_v25 = vunpack.c.l.b16 %v2846_v5 }
 0x447   :  { %v3504_v20 = vpop.trf.xlu2 }
 0x448   :  { %v3508_v23 = vunpack.i.h.bf16 %v3504_v20  ;;  %v3505_v14 = vunpack.i.l.bf16 %v3504_v20 }
 0x44a   :  { %v2847_v1 = vpack.c.bf16 %v3508_v23, %v3508_v23  ;;  %v2831_v32 = vpack.c.bf16 %v3505_v14, %v3505_v14 }
 0x44c   :  { %v2879_v51 = vunpack.c.l.b16 %v2831_v32  ;;  %v2940_v39 = vunpack.c.l.b16 %v2847_v1 }
 0x44e   :  { %v6615_v45 = vpack.c.b16 %v2879_v51, %v2878_v8  ;;  %v6617_v22 = vpack.c.b16 %v2940_v39, %v2939_v25 }
 0x44f   :  { %v3509_v11 = vpop.trf.xlu2 }
 0x450   :  { %v3513_v16 = vunpack.i.h.bf16 %v3509_v11  ;;  %v3510_v42 = vunpack.i.l.bf16 %v3509_v11 }
 0x452   :  { %v2848_v49 = vpack.c.bf16 %v3513_v16, %v3513_v16  ;;  %v2832_v3 = vpack.c.bf16 %v3510_v42, %v3510_v42 }
 0x454   :  { %v2880_v61 = vunpack.c.l.b16 %v2832_v3  ;;  %v2941_v15 = vunpack.c.l.b16 %v2848_v49 }
 0x457   :  { %v3514_v0 = vpop.trf.xlu2 }
 0x458   :  { %v3518_v10 = vunpack.i.h.bf16 %v3514_v0  ;;  %v3515_v7 = vunpack.i.l.bf16 %v3514_v0 }
 0x45a   :  { %v2849_v48 = vpack.c.bf16 %v3518_v10, %v3518_v10  ;;  %v2833_v34 = vpack.c.bf16 %v3515_v7, %v3515_v7 }
 0x45c   :  { %v2881_v6 = vunpack.c.l.b16 %v2833_v34  ;;  %v2942_v53 = vunpack.c.l.b16 %v2849_v48 }
 0x45e   :  { %v6619_v55 = vpack.c.b16 %v2881_v6, %v2880_v61  ;;  %v6621_v17 = vpack.c.b16 %v2942_v53, %v2941_v15 }
 0x45f   :  { %v3519_v24 = vpop.trf.xlu2 }
 0x460   :  { %v3523_v25 = vunpack.i.h.bf16 %v3519_v24  ;;  %v3520_v39 = vunpack.i.l.bf16 %v3519_v24 }
 0x462   :  { %v2850_v61 = vpack.c.bf16 %v3523_v25, %v3523_v25  ;;  %v2834_v6 = vpack.c.bf16 %v3520_v39, %v3520_v39 }
 0x467   :  { %v3524_v52 = vpop.trf.xlu2 }
 0x468   :  { %v3528_v43 = vunpack.i.h.bf16 %v3524_v52  ;;  %v3525_v20 = vunpack.i.l.bf16 %v3524_v52 }
 0x46a   :  { %v2851_v3 = vpack.c.bf16 %v3528_v43, %v3528_v43  ;;  %v2835_v0 = vpack.c.bf16 %v3525_v20, %v3525_v20 }
 0x46f   :  { %v3529_v18 = vpop.trf.xlu2 }
 0x470   :  { %v3533_v38 = vunpack.i.h.bf16 %v3529_v18  ;;  %v3530_v29 = vunpack.i.l.bf16 %v3529_v18  ;;  %v2883_v18 = vunpack.c.l.b16 %v2835_v0 }
 0x472   :  { %v2852_v11 = vpack.c.bf16 %v3533_v38, %v3533_v38  ;;  %v2836_v16 = vpack.c.bf16 %v3530_v29, %v3530_v29 }
 0x474   :  { %v2884_v15 = vunpack.c.l.b16 %v2836_v16  ;;  %v2945_v53 = vunpack.c.l.b16 %v2852_v11 }
 0x477   :  { %v3534_v31 = vpop.trf.xlu2 }
 0x478   :  { %v3538_v27 = vunpack.i.h.bf16 %v3534_v31  ;;  %v3535_v33 = vunpack.i.l.bf16 %v3534_v31  ;;  %v2944_v31 = vunpack.c.l.b16 %v2851_v3 }
 0x47a   :  { %v2853_v23 = vpack.c.bf16 %v3538_v27, %v3538_v27  ;;  %v2837_v14 = vpack.c.bf16 %v3535_v33, %v3535_v33 }
 0x47c   :  { %v2885_v48 = vunpack.c.l.b16 %v2837_v14  ;;  %v2946_v34 = vunpack.c.l.b16 %v2853_v23 }
 0x47e   :  { %v2895_v52 = vpack.c.b16 %v2885_v48, %v2884_v15  ;;  %v2956_v24 = vpack.c.b16 %v2946_v34, %v2945_v53 }
 0x47f   :  { %v3539_v26 = vpop.trf.xlu2 }
 0x480   :  { %v3543_v56 = vunpack.i.h.bf16 %v3539_v26  ;;  %v3540_v28 = vunpack.i.l.bf16 %v3539_v26  ;;  %v2882_v26 = vunpack.c.l.b16 %v2834_v6 }
 0x482   :  { %v2854_v2 = vpack.c.bf16 %v3543_v56, %v3543_v56  ;;  %v2838_v13 = vpack.c.bf16 %v3540_v28, %v3540_v28 }
 0x484   :  { %v2886_v42 = vunpack.c.l.b16 %v2838_v13  ;;  %v2947_v49 = vunpack.c.l.b16 %v2854_v2 }
 0x487   :  { %v3544_v37 = vpop.trf.xlu2 }
 0x488   :  { %v3548_v63 = vunpack.i.h.bf16 %v3544_v37  ;;  %v3545_v19 = vunpack.i.l.bf16 %v3544_v37  ;;  %v2943_v37 = vunpack.c.l.b16 %v2850_v61 }
 0x48a   :  { %v2855_v54 = vpack.c.bf16 %v3548_v63, %v3548_v63  ;;  %v2839_v57 = vpack.c.bf16 %v3545_v19, %v3545_v19  ;;  %v4112_v19 = vld [vmem:[#allocation4 + $0x8] sm:$0xff] }
 0x48b   :  { %v2825_v56 = vpack.c.bf16 %v4112_v19, %v4112_v19 }
 0x48c   :  { %v2887_v8 = vunpack.c.l.b16 %v2839_v57  ;;  %v2948_v51 = vunpack.c.l.b16 %v2855_v54 }
 0x48e   :  { %v2896_v10 = vpack.c.b16 %v2887_v8, %v2886_v42  ;;  %v2957_v7 = vpack.c.b16 %v2948_v51, %v2947_v49 }
 0x48f   :  { %v3549_v21 = vpop.trf.xlu2 }
 0x490   :  { %v3553_v60 = vunpack.i.h.bf16 %v3549_v21  ;;  %v3550_v40 = vunpack.i.l.bf16 %v3549_v21  ;;  %v2894_v21 = vpack.c.b16 %v2883_v18, %v2882_v26 }
 0x492   :  { %v2856_v41 = vpack.c.bf16 %v3553_v60, %v3553_v60  ;;  %v2840_v46 = vpack.c.bf16 %v3550_v40, %v3550_v40  ;;  %v2955_v60 = vpack.c.b16 %v2944_v31, %v2943_v37  ;;  %v4111_v40 = vld [vmem:[#allocation4] sm:$0xff] }
 0x493   :  { %v2824_v63 = vpack.c.bf16 %v4111_v40, %v4111_v40 }
 0x494   :  { %v2949_v59 = vunpack.c.l.b16 %v2856_v41  ;;  %v2888_v62 = vunpack.c.l.b16 %v2840_v46 }
 0x497   :  { %v3554_v35 = vpop.trf.xlu2 }
 0x498   :  { %v3558_v50 = vunpack.i.h.bf16 %v3554_v35  ;;  %v3555_v12 = vunpack.i.l.bf16 %v3554_v35 }
 0x49a   :  { %v2857_v58 = vpack.c.bf16 %v3558_v50, %v3558_v50  ;;  %v2841_v30 = vpack.c.bf16 %v3555_v12, %v3555_v12 }
 0x49c   :  { %v2950_v9 = vunpack.c.l.b16 %v2857_v58  ;;  %v2889_v5 = vunpack.c.l.b16 %v2841_v30 }
 0x49e   :  { %v2897_v1 = vpack.c.b16 %v2889_v5, %v2888_v62  ;;  %v2958_v32 = vpack.c.b16 %v2950_v9, %v2949_v59 }
 0x4a0   :  { %2906 = vmatpush.bf16.msra.mxu0 %v2897_v1  ;;  %2967 = vmatpush.bf16.msra.mxu1 %v2958_v32 }
 0x4a4   :  { %2907 = vmatpush.bf16.msra.mxu0 %v2896_v10  ;;  %2968 = vmatpush.bf16.msra.mxu1 %v2957_v7 }
 0x4a8   :  { %2908 = vmatpush.bf16.msra.mxu0 %v2895_v52  ;;  %2969 = vmatpush.bf16.msra.mxu1 %v2956_v24 }
 0x4ac   :  { %2909 = vmatpush.bf16.msra.mxu0 %v2894_v21  ;;  %2970 = vmatpush.bf16.msra.mxu1 %v2955_v60 }
 0x4b0   :  { %2910 = vmatpush.bf16.msra.mxu0 %v6619_v55  ;;  %2971 = vmatpush.bf16.msra.mxu1 %v6621_v17 }
 0x4b4   :  { %2911 = vmatpush.bf16.msra.mxu0 %v6615_v45  ;;  %2972 = vmatpush.bf16.msra.mxu1 %v6617_v22  ;;  %v2980_v45 = vld [vmem:[%s6647_s4] sm:$0x1] }
 0x4b5   :  { %vm2982_vm3 = vcmp.gt.f32.partialorder %v2980_v45, 0.5 }
 0x4b8   :  { %2912 = vmatpush.bf16.msra.mxu0 %v6611_v47  ;;  %2973 = vmatpush.bf16.msra.mxu1 %v6613_v44  ;;  %v2981_v47 = vld [vmem:[%s6647_s4 + $0x1] sm:$0x1]  ;;  %v4165_v44 = vmov 0   ;;  %s4166_s4 = smov [#allocation4]  }
 0x4b9   :  { %vm2983_vm4 = vcmp.gt.f32.partialorder %v2981_v47, 0.5  ;;  %s3031_s0 = sshll.u32 %s4166_s4, 4  ;;  %s3032_s0 = int_to_ptr.vmem [resolvable:$true] %s3031_s0 }
 0x4ba   :  { %v2985_v22 = vsel %vm2983_vm4, 1, %v4165_v44  ;;  %3039 = dma.vmem_to_hbm [thread:$0]  %s3032_s0, 256, %s3034_s20, [#allocation5], %s4167_s21, %s4167_s21, %s4168_s22  }
 0x4bb   :  { %v2987_v55 = vperm.slane %v2985_v22, 0 }
 0x4bc   :  { %2913 = vmatpush.bf16.msra.mxu0 %v6607_v36  ;;  %2974 = vmatpush.bf16.msra.mxu1 %v6609_v4  ;;  %v2984_v36 = vsel %vm2982_vm3, 1, %v4165_v44 }
 0x4bd   :  { %v2986_v4 = vperm.slane %v2984_v36, 0  ;;  %vm2989_vm6 = vcmp.eq.s32.totalorder %v2987_v55, 1 }
 0x4bf   :  { %2914 = vmatmul.bf16.vlgmr.msra.gmra.mxu0 %v2824_v63  ;;  %2975 = vmatmul.bf16.vlgmr.msra.gmra.mxu1 %v2825_v56  ;;  %vm2988_vm5 = vcmp.eq.s32.totalorder %v2986_v4, 1 }
 0x53c   :  { %v2915_v17 = vpop.f32.mrf.mxu0  ;;  %v2976_v28 = vpop.f32.mrf.mxu1 }
 0x53d   :  { %v2990_v41 = vsel %vm2988_vm5, %v2915_v17, -1e+09  ;;  %v2991_v46 = vsel %vm2989_vm6, %v2976_v28, -1e+09 }
 0x53e   :  { %2994 = vmax.xlane.f32.xlu1 %v2991_v46  ;;  %2992 = vmax.xlane.f32.xlu0 %v2990_v41 }
 0x544   :  { %v2917_v35 = vpop.f32.mrf.mxu0  ;;  %v2978_v50 = vpop.f32.mrf.mxu1 }
 0x5b1   :  { %v2995_v12 = vpop.xlane.xlu1 %2994  ;;  %v2993_v27 = vpop.xlane.xlu0 %2992 }
 0x5b2   :  { %v2997_v33 = vsub.f32 %v2991_v46, %v2995_v12  ;;  %v2996_v54 = vsub.f32 %v2990_v41, %v2993_v27 }
 0x5b4   :  { %v3000_v57 = vmul.f32 1.442695, %v2997_v33  ;;  %v2998_v58 = vmul.f32 1.442695, %v2996_v54 }
 0x5b6   :  { %4103 = vpow2.f32 %v3000_v57 }
 0x5b7   :  { %4105 = vpow2.f32 %v2998_v58 }
 0x5bc   :  { %v4104_v30 = vpop.eup %4103 }
 0x5bd   :  { %v4106_v38 = vpop.eup %4105  ;;  %3004 = vadd.xlane.f32.xlu1 %v4104_v30 }
 0x5be   :  { %3002 = vadd.xlane.f32.xlu0 %v4106_v38 }
 0x630   :  { %v3005_v29 = vpop.xlane.xlu1 %3004 }
 0x631   :  { %4107 = vrcp.f32 %v3005_v29  ;;  %v3003_v2 = vpop.xlane.xlu0 %3002 }
 0x632   :  { %4109 = vrcp.f32 %v3003_v2 }
 0x637   :  { %v4108_v13 = vpop.eup %4107 }
 0x638   :  { %v4110_v59 = vpop.eup %4109  ;;  %v3009_v62 = vmul.f32 %v4108_v13, %v4104_v30 }
 0x639   :  { %v3008_v9 = vmul.f32 %v4110_v59, %v4106_v38 }
 0x63a   :  { %3011 = vst [vmem:[#allocation2 + $0x8] sm:$0xff] %v3009_v62 }
 0x63b   :  { %3010 = vst [vmem:[#allocation2] sm:$0xff] %v3008_v9 }
 0x63c   :  { %3026 = dma.vmem_to_hbm [thread:$0]  %s3019_s24, 256, %s3021_s26, [#allocation3], %s4167_s21, %s4167_s21, %s4168_s22  }
 0x63d   :  { %4161 = dma.done.wait [#allocation3], 256  }
 0x63e   :  { %4162 = vsyncadd [#allocation3], 4294967040 }
 0x63f   :  { %4163 = dma.done.wait [#allocation5], 256  }
 0x640   :  { %4164 = vsyncadd [#allocation5], 4294967040 }
 0x641   :  { %3048 = vsyncpa [#allocation3], 1 }
 0x642   :  { %3049 = vsyncpa [#allocation5], 1 }

</bundles_post_ra>
